<compile_context>
chip_gen: v7x
topology: tpu7x:2x2x1
jax: 0.10.0
libtpu: 0.0.40
codegen_flags: <defaults>
</compile_context>

<pallas_src>
import jax
import jax.numpy as jnp
import numpy as np
from jax.experimental import pallas as pl
from jax.experimental.pallas import tpu as pltpu

# TimeHVAE hyper-parameters (small shapes consistent with the module:
# input_size=1, bidirectional LSTMs, latent vector, output_window=1).
INPUT_SIZE = 1
HIDDEN = 32            # per-direction hidden size (4H = 128, 8H = 256 lanes)
LATENT = 16
OUTPUT_WINDOW = 1

BATCH = 2
SEQ = 8

B_PAD = 8              # batch rows padded to one sublane tile inside the kernel
OUT_LANES = 128        # lane-dense output slab width

VMEM = pltpu.MemorySpace.VMEM


# ----------------------------------------------------------------------------
# in-kernel helpers
# ----------------------------------------------------------------------------
def _sigmoid(x):
    # single native EUP tanh instead of the exp/divide stable-logistic lowering
    return 0.5 * jnp.tanh(0.5 * x) + 0.5


def _swish(x):
    return x * _sigmoid(x)


def _bilstm_stacked(gxz, whh, H):
    """Interleaved forward+backward LSTM over a hoisted gate-input tensor.

    gxz : (T, B8, 8H) per-timestep input projection incl. bias (and any
          per-sequence constant contribution).  Lanes [0:4H] feed the forward
          direction, lanes [4H:8H] the backward direction (PyTorch gate order
          i, f, g, o inside each 4H block).
    whh : (H, 8H) recurrent weights, [fwd | bwd] packed along lanes.

    Both directions advance in ONE stacked chain: rows [:B8] of the state are
    the forward direction at timestep s, rows [B8:] the backward direction at
    timestep T-1-s, so each step issues one recurrent matmul, one sigmoid and
    one tanh for both directions.

    Returns (h_fwd_final, h_bwd_final, hf_hist, hb_hist);
    hf_hist[s] = fwd hidden at timestep s, hb_hist[s] = bwd hidden at T-1-s.
    """
    T, B8, _ = gxz.shape
    H4 = 4 * H
    h = jnp.zeros((2 * B8, H), jnp.float32)
    c = jnp.zeros((2 * B8, H), jnp.float32)
    hf_hist, hb_hist = [], []
    for s in range(T):
        # tile-aligned stacking: rows [:B8] = gxz[s] (fwd), rows [B8:] = gxz[T-1-s] (bwd)
        g_in = jnp.concatenate([gxz[s], gxz[T - 1 - s]], axis=0)        # (2B8, 8H)
        gates = g_in + jnp.dot(h, whh, preferred_element_type=jnp.float32)
        sg = _sigmoid(gates)      # one EUP pass: i, f, o gates, both directions
        th = jnp.tanh(gates)      # one EUP pass: g gate, both directions
        i_g = jnp.concatenate([sg[:B8, 0:H],           sg[B8:, H4:H4 + H]], axis=0)
        f_g = jnp.concatenate([sg[:B8, H:2 * H],       sg[B8:, H4 + H:H4 + 2 * H]], axis=0)
        g_g = jnp.concatenate([th[:B8, 2 * H:3 * H],   th[B8:, H4 + 2 * H:H4 + 3 * H]], axis=0)
        o_g = jnp.concatenate([sg[:B8, 3 * H:4 * H],   sg[B8:, H4 + 3 * H:H4 + 4 * H]], axis=0)
        c = f_g * c + i_g * g_g
        h = o_g * jnp.tanh(c)
        hf_hist.append(h[:B8])
        hb_hist.append(h[B8:])
    return h[:B8], h[B8:], hf_hist, hb_hist


# ----------------------------------------------------------------------------
# fully fused TimeHVAE forward kernel
# ----------------------------------------------------------------------------
def time_hvae_kernel(
    # activations / noise
    x_ref,        # (T, B8, 1)  time-major x, batch padded to 8 sublane rows
    eps1_ref,     # (B8, L)
    eps2_ref,     # (B8, L)
    # self.encoder
    e1_wih_ref,   # (1, 8H)   x -> gates row            [fwd | bwd]
    e1_whh_ref,   # (H, 8H)   recurrent weights         [fwd | bwd]
    e1_b_ref,     # (1, 8H)   b_ih + b_hh               [fwd | bwd]
    e1_wh_ref,    # (2H, 2L)  heads weights             [mean | logvar]
    e1_bh_ref,    # (1, 2L)
    # self.res_encoder (input = [x, z1])
    e2_wihx_ref,  # (1, 8H)
    e2_wihz_ref,  # (L, 8H)
    e2_whh_ref,   # (H, 8H)
    e2_b_ref,     # (1, 8H)
    e2_wh_ref,    # (2H, 2L)
    e2_bh_ref,    # (1, 2L)
    # fc_delta_z2_{mu,logvar}
    wd_ref,       # (L, 2L)   [dmu | dlogvar]
    bd_ref,       # (1, 2L)
    # decoder
    d_wih_ref,    # (L, 8H)
    d_whh_ref,    # (H, 8H)
    d_b_ref,      # (1, 8H)
    d_wo_ref,     # (2H, OUT)
    d_bo_ref,     # (1, OUT)
    # output
    out_ref,      # (B8, 128) [z1_mu | z1_logvar | z2_mu | z2_logvar | recon | 0]
):
    T, B8, _ = x_ref.shape
    H = e1_whh_ref.shape[0]
    L = eps1_ref.shape[1]
    OUT = d_wo_ref.shape[1]
    TOUT = OUTPUT_WINDOW

    x3 = x_ref[...]                                             # (T, B8, 1)

    # ---------------- encoder 1 (input_size == 1 -> broadcast outer product) --
    gxz1 = x3 * e1_wih_ref[...][None, :, :] + e1_b_ref[...][None, :, :]   # (T,B8,8H)
    h1f, h1b, _, _ = _bilstm_stacked(gxz1, e1_whh_ref[...], H)
    wh1 = e1_wh_ref[...]
    heads1 = (jnp.dot(_swish(h1f), wh1[:H, :], preferred_element_type=jnp.float32)
              + jnp.dot(_swish(h1b), wh1[H:, :], preferred_element_type=jnp.float32)
              + e1_bh_ref[...])                                  # (B8, 2L)
    z1_mu = heads1[:, :L]
    z1_logvar = heads1[:, L:]
    z1 = z1_mu + eps1_ref[...] * jnp.exp(0.5 * z1_logvar)        # (B8, L)

    # ---------------- res encoder on [x, z1] ---------------------------------
    gz2 = (jnp.dot(z1, e2_wihz_ref[...], preferred_element_type=jnp.float32)
           + e2_b_ref[...])                                      # (B8, 8H)
    gxz2 = x3 * e2_wihx_ref[...][None, :, :] + gz2[None, :, :]   # (T, B8, 8H)
    h2f, h2b, _, _ = _bilstm_stacked(gxz2, e2_whh_ref[...], H)
    wh2 = e2_wh_ref[...]
    heads2 = (jnp.dot(_swish(h2f), wh2[:H, :], preferred_element_type=jnp.float32)
              + jnp.dot(_swish(h2b), wh2[H:, :], preferred_element_type=jnp.float32)
              + e2_bh_ref[...])                                  # (B8, 2L)

    # ---------------- fc_delta + z2 reparameterize ----------------------------
    tot = heads2 + (jnp.dot(z1, wd_ref[...], preferred_element_type=jnp.float32)
                    + bd_ref[...])
    z2_mu = tot[:, :L]
    z2_logvar = tot[:, L:]
    z2 = z2_mu + eps2_ref[...] * jnp.exp(0.5 * z2_logvar)        # (B8, L)

    # ---------------- decoder: repeat(z2) -> biLSTM -> Swish -> fc_out --------
    gzd = (jnp.dot(z2, d_wih_ref[...], preferred_element_type=jnp.float32)
           + d_b_ref[...])                                       # (B8, 8H)
    gxzd = jnp.broadcast_to(gzd[None, :, :], (TOUT, B8, 8 * H))  # same z every step
    _, _, hdf, hdb = _bilstm_stacked(gxzd, d_whh_ref[...], H)
    wo = d_wo_ref[...]
    bo = d_bo_ref[...]
    recon_cols = []
    for t in range(TOUT):
        hf_t = hdf[t]                 # fwd hidden at timestep t
        hb_t = hdb[TOUT - 1 - t]      # bwd hidden at timestep t
        o_t = (jnp.dot(_swish(hf_t), wo[:H, :], preferred_element_type=jnp.float32)
               + jnp.dot(_swish(hb_t), wo[H:, :], preferred_element_type=jnp.float32)
               + bo)                                             # (B8, OUT)
        recon_cols.append(o_t)
    recon = recon_cols[0] if TOUT == 1 else jnp.concatenate(recon_cols, axis=1)

    # ---------------- single lane-dense output slab --------------------------
    used = 4 * L + TOUT * OUT
    pad = jnp.zeros((B8, OUT_LANES - used), jnp.float32)
    out_ref[...] = jnp.concatenate(
        [z1_mu, z1_logvar, z2_mu, z2_logvar, recon, pad], axis=1)


# ----------------------------------------------------------------------------
# wrapper: one pallas_call, everything VMEM resident
# ----------------------------------------------------------------------------
def _flatten_params(packed):
    enc1, enc2, latp, decp = packed
    return list(enc1) + list(enc2) + list(latp) + list(decp)


def time_hvae_forward(x, packed, eps1, eps2):
    """x: (B, T, 1) -> (recon_x, z1_mu, z1_logvar, z2_mu, z2_logvar)."""
    B, T, I = x.shape
    assert B <= B_PAD
    assert 4 * LATENT + OUTPUT_WINDOW * I <= OUT_LANES
    L = LATENT

    # time-major x, batch padded to one sublane tile (tiny wrapper-side pad)
    x_tm = jnp.zeros((T, B_PAD, 1), jnp.float32).at[:, :B, :].set(
        jnp.transpose(x, (1, 0, 2)))
    eps1_p = jnp.zeros((B_PAD, L), jnp.float32).at[:B].set(eps1)
    eps2_p = jnp.zeros((B_PAD, L), jnp.float32).at[:B].set(eps2)

    params = _flatten_params(packed)
    slab = pl.pallas_call(
        time_hvae_kernel,
        out_shape=jax.ShapeDtypeStruct((B_PAD, OUT_LANES), jnp.float32),
        in_specs=[pl.BlockSpec(memory_space=VMEM)] * (3 + len(params)),
        out_specs=pl.BlockSpec(memory_space=VMEM),
    )(x_tm, eps1_p, eps2_p, *params)

    z1_mu = slab[:B, 0:L]
    z1_logvar = slab[:B, L:2 * L]
    z2_mu = slab[:B, 2 * L:3 * L]
    z2_logvar = slab[:B, 3 * L:4 * L]
    recon_x = slab[:B, 4 * L:4 * L + OUTPUT_WINDOW * I].reshape(B, OUTPUT_WINDOW, I)
    return recon_x, z1_mu, z1_logvar, z2_mu, z2_logvar


# ----------------------------------------------------------------------------
# parameter init (deterministic) + packing into kernel layouts
# ----------------------------------------------------------------------------
def init_params(key):
    ks = iter(jax.random.split(key, 64))

    def uni(shape, scale):
        return jax.random.uniform(next(ks), shape, jnp.float32, -scale, scale)

    kH = 1.0 / np.sqrt(HIDDEN)

    def make_bilstm(in_size):
        return dict(
            w_ih_f=uni((4 * HIDDEN, in_size), kH), w_hh_f=uni((4 * HIDDEN, HIDDEN), kH),
            b_ih_f=uni((4 * HIDDEN,), kH), b_hh_f=uni((4 * HIDDEN,), kH),
            w_ih_b=uni((4 * HIDDEN, in_size), kH), w_hh_b=uni((4 * HIDDEN, HIDDEN), kH),
            b_ih_b=uni((4 * HIDDEN,), kH), b_hh_b=uni((4 * HIDDEN,), kH))

    def make_linear(out_f, in_f):
        s = 1.0 / np.sqrt(in_f)
        return dict(w=uni((out_f, in_f), s), b=uni((out_f,), s))

    raw = dict(
        enc1_lstm=make_bilstm(INPUT_SIZE),
        enc1_mean=make_linear(LATENT, 2 * HIDDEN),
        enc1_logvar=make_linear(LATENT, 2 * HIDDEN),
        enc2_lstm=make_bilstm(INPUT_SIZE + LATENT),
        enc2_mean=make_linear(LATENT, 2 * HIDDEN),
        enc2_logvar=make_linear(LATENT, 2 * HIDDEN),
        delta_mu=make_linear(LATENT, LATENT),
        delta_logvar=make_linear(LATENT, LATENT),
        dec_lstm=make_bilstm(LATENT),
        dec_out=make_linear(INPUT_SIZE, 2 * HIDDEN),
    )
    return pack_params(raw), raw


def pack_params(raw):
    H4 = 4 * HIDDEN
    L = LATENT

    def pack_bilstm(lstm, n_x):
        # x -> gates rows (n_x, 8H), z -> gates rows (L, 8H), both [fwd | bwd]
        wihx = jnp.concatenate([lstm["w_ih_f"][:, :n_x].T,
                                lstm["w_ih_b"][:, :n_x].T], axis=1)
        wihz = None
        if lstm["w_ih_f"].shape[1] > n_x:
            wihz = jnp.concatenate([lstm["w_ih_f"][:, n_x:].T,
                                    lstm["w_ih_b"][:, n_x:].T], axis=1)
        whh = jnp.concatenate([lstm["w_hh_f"].T, lstm["w_hh_b"].T], axis=1)  # (H, 8H)
        bias = jnp.concatenate([lstm["b_ih_f"] + lstm["b_hh_f"],
                                lstm["b_ih_b"] + lstm["b_hh_b"]]).reshape(1, 2 * H4)
        return wihx, wihz, whh, bias

    def pack_heads(fc_mean, fc_logvar):
        wh = jnp.concatenate([fc_mean["w"].T, fc_logvar["w"].T], axis=1)     # (2H, 2L)
        bh = jnp.concatenate([fc_mean["b"], fc_logvar["b"]]).reshape(1, 2 * L)
        return wh, bh

    w1x, _, w1hh, b1 = pack_bilstm(raw["enc1_lstm"], INPUT_SIZE)
    wh1, bh1 = pack_heads(raw["enc1_mean"], raw["enc1_logvar"])
    enc1 = (w1x, w1hh, b1, wh1, bh1)

    w2x, w2z, w2hh, b2 = pack_bilstm(raw["enc2_lstm"], INPUT_SIZE)
    wh2, bh2 = pack_heads(raw["enc2_mean"], raw["enc2_logvar"])
    enc2 = (w2x, w2z, w2hh, b2, wh2, bh2)

    latp = (jnp.concatenate([raw["delta_mu"]["w"].T, raw["delta_logvar"]["w"].T],
                            axis=1),                                          # (L, 2L)
            jnp.concatenate([raw["delta_mu"]["b"],
                             raw["delta_logvar"]["b"]]).reshape(1, 2 * L))

    dl = raw["dec_lstm"]
    dwih = jnp.concatenate([dl["w_ih_f"].T, dl["w_ih_b"].T], axis=1)          # (L, 8H)
    dwhh = jnp.concatenate([dl["w_hh_f"].T, dl["w_hh_b"].T], axis=1)          # (H, 8H)
    dbias = jnp.concatenate([dl["b_ih_f"] + dl["b_hh_f"],
                             dl["b_ih_b"] + dl["b_hh_b"]]).reshape(1, 2 * H4)
    decp = (dwih, dwhh, dbias, raw["dec_out"]["w"].T, raw["dec_out"]["b"].reshape(1, -1))
    return (enc1, enc2, latp, decp)


# ----------------------------------------------------------------------------
# pure-JAX reference matching torch.nn.LSTM(bidirectional) / Linear / Swish
# ----------------------------------------------------------------------------
def _bilstm_ref(x_seq, p):
    B = x_seq.shape[0]
    H = HIDDEN

    def run(seq, w_ih, w_hh, b_ih, b_hh):
        h = jnp.zeros((B, H), jnp.float32)
        c = jnp.zeros((B, H), jnp.float32)
        hs = []
        for t in range(seq.shape[1]):
            gates = seq[:, t] @ w_ih.T + b_ih + h @ w_hh.T + b_hh
            i = jax.nn.sigmoid(gates[:, :H])
            f = jax.nn.sigmoid(gates[:, H:2 * H])
            g = jnp.tanh(gates[:, 2 * H:3 * H])
            o = jax.nn.sigmoid(gates[:, 3 * H:])
            c = f * c + i * g
            h = o * jnp.tanh(c)
            hs.append(h)
        return jnp.stack(hs, axis=1), h

    out_f, h_f = run(x_seq, p["w_ih_f"], p["w_hh_f"], p["b_ih_f"], p["b_hh_f"])
    out_b_rev, h_b = run(x_seq[:, ::-1], p["w_ih_b"], p["w_hh_b"],
                         p["b_ih_b"], p["b_hh_b"])
    return jnp.concatenate([out_f, out_b_rev[:, ::-1]], axis=2), h_f, h_b


def _encoder_ref(x_seq, lstm, fc_mean, fc_logvar):
    _, h_f, h_b = _bilstm_ref(x_seq, lstm)
    h = jnp.concatenate([h_f, h_b], axis=1)
    h = h * jax.nn.sigmoid(h)
    return h @ fc_mean["w"].T + fc_mean["b"], h @ fc_logvar["w"].T + fc_logvar["b"]


def time_hvae_reference(x, raw, eps1, eps2):
    B, T, _ = x.shape
    z1_mu, z1_logvar = _encoder_ref(x, raw["enc1_lstm"], raw["enc1_mean"],
                                    raw["enc1_logvar"])
    z1 = z1_mu + eps1 * jnp.exp(0.5 * z1_logvar)
    x_with_z1 = jnp.concatenate([x, jnp.repeat(z1[:, None, :], T, axis=1)], axis=2)
    z2_mu, z2_logvar = _encoder_ref(x_with_z1, raw["enc2_lstm"], raw["enc2_mean"],
                                    raw["enc2_logvar"])
    z2_mu = z2_mu + z1 @ raw["delta_mu"]["w"].T + raw["delta_mu"]["b"]
    z2_logvar = z2_logvar + z1 @ raw["delta_logvar"]["w"].T + raw["delta_logvar"]["b"]
    z2 = z2_mu + eps2 * jnp.exp(0.5 * z2_logvar)
    z_rep = jnp.repeat(z2[:, None, :], OUTPUT_WINDOW, axis=1)
    out, _, _ = _bilstm_ref(z_rep, raw["dec_lstm"])
    out = out * jax.nn.sigmoid(out)
    recon = out @ raw["dec_out"]["w"].T + raw["dec_out"]["b"]
    return recon, z1_mu, z1_logvar, z2_mu, z2_logvar


if __name__ == "__main__":
    key = jax.random.PRNGKey(0)
    kp, kx, ke1, ke2 = jax.random.split(key, 4)
    packed, raw = init_params(kp)

    x = jax.random.normal(kx, (BATCH, SEQ, INPUT_SIZE), jnp.float32)
    # randn_like noise for reparameterize(), supplied explicitly for determinism
    eps1 = jax.random.normal(ke1, (BATCH, LATENT), jnp.float32)
    eps2 = jax.random.normal(ke2, (BATCH, LATENT), jnp.float32)

    fwd = jax.jit(time_hvae_forward)
    outs = fwd(x, packed, eps1, eps2)
    outs = jax.block_until_ready(outs)
    recon_x = outs[0]
    assert recon_x.shape == (BATCH, OUTPUT_WINDOW, INPUT_SIZE), recon_x.shape

    refs = time_hvae_reference(x, raw, eps1, eps2)
    names = ["recon_x", "z1_mu", "z1_logvar", "z2_mu", "z2_logvar"]
    for name, got, want in zip(names, outs, refs):
        assert got.shape == want.shape, (name, got.shape, want.shape)
        assert jnp.allclose(got, want, atol=1e-4, rtol=1e-4), (name, got, want)

    print("KERNEL_OK")
</pallas_src>

<mosaic_0001>
module attributes {stable_mosaic.version = 11 : i64} {
  func.func @time_hvae_kernel(%arg0: memref<8x8x1xf32, #tpu.memory_space<vmem>>, %arg1: memref<8x16xf32, #tpu.memory_space<vmem>>, %arg2: memref<8x16xf32, #tpu.memory_space<vmem>>, %arg3: memref<1x256xf32, #tpu.memory_space<vmem>>, %arg4: memref<32x256xf32, #tpu.memory_space<vmem>>, %arg5: memref<1x256xf32, #tpu.memory_space<vmem>>, %arg6: memref<64x32xf32, #tpu.memory_space<vmem>>, %arg7: memref<1x32xf32, #tpu.memory_space<vmem>>, %arg8: memref<1x256xf32, #tpu.memory_space<vmem>>, %arg9: memref<16x256xf32, #tpu.memory_space<vmem>>, %arg10: memref<32x256xf32, #tpu.memory_space<vmem>>, %arg11: memref<1x256xf32, #tpu.memory_space<vmem>>, %arg12: memref<64x32xf32, #tpu.memory_space<vmem>>, %arg13: memref<1x32xf32, #tpu.memory_space<vmem>>, %arg14: memref<16x32xf32, #tpu.memory_space<vmem>>, %arg15: memref<1x32xf32, #tpu.memory_space<vmem>>, %arg16: memref<16x256xf32, #tpu.memory_space<vmem>>, %arg17: memref<32x256xf32, #tpu.memory_space<vmem>>, %arg18: memref<1x256xf32, #tpu.memory_space<vmem>>, %arg19: memref<64x1xf32, #tpu.memory_space<vmem>>, %arg20: memref<1x1xf32, #tpu.memory_space<vmem>>, %arg21: memref<8x128xf32, #tpu.memory_space<vmem>>) attributes {dimension_semantics = [], scalar_prefetch = 0 : i64, scratch_operands = 0 : i64, tpu.core_type = #tpu.core_type<tc>} {
    %c0 = arith.constant 0 : index
    %c0_0 = arith.constant 0 : index
    %c0_1 = arith.constant 0 : index
    %0 = vector.load %arg0[%c0, %c0_0, %c0_1] : memref<8x8x1xf32, #tpu.memory_space<vmem>>, vector<8x8x1xf32>
    %c0_2 = arith.constant 0 : index
    %c0_3 = arith.constant 0 : index
    %1 = vector.load %arg3[%c0_2, %c0_3] : memref<1x256xf32, #tpu.memory_space<vmem>>, vector<1x256xf32>
    %2 = vector.shape_cast %1 : vector<1x256xf32> to vector<1x1x256xf32>
    %3 = vector.broadcast %0 : vector<8x8x1xf32> to vector<8x8x256xf32>
    %4 = vector.broadcast %2 : vector<1x1x256xf32> to vector<8x8x256xf32>
    %5 = arith.mulf %3, %4 : vector<8x8x256xf32>
    %c0_4 = arith.constant 0 : index
    %c0_5 = arith.constant 0 : index
    %6 = vector.load %arg5[%c0_4, %c0_5] : memref<1x256xf32, #tpu.memory_space<vmem>>, vector<1x256xf32>
    %7 = vector.shape_cast %6 : vector<1x256xf32> to vector<1x1x256xf32>
    %8 = vector.broadcast %7 : vector<1x1x256xf32> to vector<8x8x256xf32>
    %9 = arith.addf %5, %8 : vector<8x8x256xf32>
    %c0_6 = arith.constant 0 : index
    %c0_7 = arith.constant 0 : index
    %10 = vector.load %arg4[%c0_6, %c0_7] : memref<32x256xf32, #tpu.memory_space<vmem>>, vector<32x256xf32>
    %cst = arith.constant 0.000000e+00 : f32
    %11 = vector.broadcast %cst : f32 to vector<16x32xf32>
    %cst_8 = arith.constant 0.000000e+00 : f32
    %12 = vector.broadcast %cst_8 : f32 to vector<16x32xf32>
    %13 = vector.extract_strided_slice %9 {offsets = [0, 0, 0], sizes = [1, 8, 256], strides = [1, 1, 1]} : vector<8x8x256xf32> to vector<1x8x256xf32>
    %14 = vector.shape_cast %13 : vector<1x8x256xf32> to vector<8x256xf32>
    %15 = vector.extract_strided_slice %9 {offsets = [7, 0, 0], sizes = [1, 8, 256], strides = [1, 1, 1]} : vector<8x8x256xf32> to vector<1x8x256xf32>
    %16 = vector.shape_cast %15 : vector<1x8x256xf32> to vector<8x256xf32>
    %17 = tpu.concatenate %14, %16 in 0 : vector<8x256xf32>, vector<8x256xf32> -> vector<16x256xf32>
    %cst_9 = arith.constant dense<0.000000e+00> : vector<16x256xf32>
    %18 = tpu.matmul %11, %10, %cst_9 {dimension_numbers = #tpu.dot_dimension_numbers<[1], [0], [0], [1], [0, 0, 1, 1], [], []>} : vector<16x32xf32>, vector<32x256xf32>, vector<16x256xf32> -> vector<16x256xf32>
    %19 = arith.addf %17, %18 : vector<16x256xf32>
    %cst_10 = arith.constant 5.000000e-01 : f32
    %20 = vector.broadcast %cst_10 : f32 to vector<16x256xf32>
    %21 = arith.mulf %20, %19 : vector<16x256xf32>
    %22 = math.tanh %21 : vector<16x256xf32>
    %cst_11 = arith.constant 5.000000e-01 : f32
    %23 = vector.broadcast %cst_11 : f32 to vector<16x256xf32>
    %24 = arith.mulf %23, %22 : vector<16x256xf32>
    %cst_12 = arith.constant 5.000000e-01 : f32
    %25 = vector.broadcast %cst_12 : f32 to vector<16x256xf32>
    %26 = arith.addf %24, %25 : vector<16x256xf32>
    %27 = math.tanh %19 : vector<16x256xf32>
    %28 = vector.extract_strided_slice %26 {offsets = [0, 0], sizes = [8, 32], strides = [1, 1]} : vector<16x256xf32> to vector<8x32xf32>
    %29 = vector.extract_strided_slice %26 {offsets = [8, 128], sizes = [8, 32], strides = [1, 1]} : vector<16x256xf32> to vector<8x32xf32>
    %30 = tpu.concatenate %28, %29 in 0 : vector<8x32xf32>, vector<8x32xf32> -> vector<16x32xf32>
    %31 = vector.extract_strided_slice %26 {offsets = [0, 32], sizes = [8, 32], strides = [1, 1]} : vector<16x256xf32> to vector<8x32xf32>
    %32 = vector.extract_strided_slice %26 {offsets = [8, 160], sizes = [8, 32], strides = [1, 1]} : vector<16x256xf32> to vector<8x32xf32>
    %33 = tpu.concatenate %31, %32 in 0 : vector<8x32xf32>, vector<8x32xf32> -> vector<16x32xf32>
    %34 = vector.extract_strided_slice %27 {offsets = [0, 64], sizes = [8, 32], strides = [1, 1]} : vector<16x256xf32> to vector<8x32xf32>
    %35 = vector.extract_strided_slice %27 {offsets = [8, 192], sizes = [8, 32], strides = [1, 1]} : vector<16x256xf32> to vector<8x32xf32>
    %36 = tpu.concatenate %34, %35 in 0 : vector<8x32xf32>, vector<8x32xf32> -> vector<16x32xf32>
    %37 = vector.extract_strided_slice %26 {offsets = [0, 96], sizes = [8, 32], strides = [1, 1]} : vector<16x256xf32> to vector<8x32xf32>
    %38 = vector.extract_strided_slice %26 {offsets = [8, 224], sizes = [8, 32], strides = [1, 1]} : vector<16x256xf32> to vector<8x32xf32>
    %39 = tpu.concatenate %37, %38 in 0 : vector<8x32xf32>, vector<8x32xf32> -> vector<16x32xf32>
    %40 = arith.mulf %33, %12 : vector<16x32xf32>
    %41 = arith.mulf %30, %36 : vector<16x32xf32>
    %42 = arith.addf %40, %41 : vector<16x32xf32>
    %43 = math.tanh %42 : vector<16x32xf32>
    %44 = arith.mulf %39, %43 : vector<16x32xf32>
    %45 = vector.extract_strided_slice %9 {offsets = [1, 0, 0], sizes = [1, 8, 256], strides = [1, 1, 1]} : vector<8x8x256xf32> to vector<1x8x256xf32>
    %46 = vector.shape_cast %45 : vector<1x8x256xf32> to vector<8x256xf32>
    %47 = vector.extract_strided_slice %9 {offsets = [6, 0, 0], sizes = [1, 8, 256], strides = [1, 1, 1]} : vector<8x8x256xf32> to vector<1x8x256xf32>
    %48 = vector.shape_cast %47 : vector<1x8x256xf32> to vector<8x256xf32>
    %49 = tpu.concatenate %46, %48 in 0 : vector<8x256xf32>, vector<8x256xf32> -> vector<16x256xf32>
    %cst_13 = arith.constant dense<0.000000e+00> : vector<16x256xf32>
    %50 = tpu.matmul %44, %10, %cst_13 {dimension_numbers = #tpu.dot_dimension_numbers<[1], [0], [0], [1], [0, 0, 1, 1], [], []>} : vector<16x32xf32>, vector<32x256xf32>, vector<16x256xf32> -> vector<16x256xf32>
    %51 = arith.addf %49, %50 : vector<16x256xf32>
    %cst_14 = arith.constant 5.000000e-01 : f32
    %52 = vector.broadcast %cst_14 : f32 to vector<16x256xf32>
    %53 = arith.mulf %52, %51 : vector<16x256xf32>
    %54 = math.tanh %53 : vector<16x256xf32>
    %cst_15 = arith.constant 5.000000e-01 : f32
    %55 = vector.broadcast %cst_15 : f32 to vector<16x256xf32>
    %56 = arith.mulf %55, %54 : vector<16x256xf32>
    %cst_16 = arith.constant 5.000000e-01 : f32
    %57 = vector.broadcast %cst_16 : f32 to vector<16x256xf32>
    %58 = arith.addf %56, %57 : vector<16x256xf32>
    %59 = math.tanh %51 : vector<16x256xf32>
    %60 = vector.extract_strided_slice %58 {offsets = [0, 0], sizes = [8, 32], strides = [1, 1]} : vector<16x256xf32> to vector<8x32xf32>
    %61 = vector.extract_strided_slice %58 {offsets = [8, 128], sizes = [8, 32], strides = [1, 1]} : vector<16x256xf32> to vector<8x32xf32>
    %62 = tpu.concatenate %60, %61 in 0 : vector<8x32xf32>, vector<8x32xf32> -> vector<16x32xf32>
    %63 = vector.extract_strided_slice %58 {offsets = [0, 32], sizes = [8, 32], strides = [1, 1]} : vector<16x256xf32> to vector<8x32xf32>
    %64 = vector.extract_strided_slice %58 {offsets = [8, 160], sizes = [8, 32], strides = [1, 1]} : vector<16x256xf32> to vector<8x32xf32>
    %65 = tpu.concatenate %63, %64 in 0 : vector<8x32xf32>, vector<8x32xf32> -> vector<16x32xf32>
    %66 = vector.extract_strided_slice %59 {offsets = [0, 64], sizes = [8, 32], strides = [1, 1]} : vector<16x256xf32> to vector<8x32xf32>
    %67 = vector.extract_strided_slice %59 {offsets = [8, 192], sizes = [8, 32], strides = [1, 1]} : vector<16x256xf32> to vector<8x32xf32>
    %68 = tpu.concatenate %66, %67 in 0 : vector<8x32xf32>, vector<8x32xf32> -> vector<16x32xf32>
    %69 = vector.extract_strided_slice %58 {offsets = [0, 96], sizes = [8, 32], strides = [1, 1]} : vector<16x256xf32> to vector<8x32xf32>
    %70 = vector.extract_strided_slice %58 {offsets = [8, 224], sizes = [8, 32], strides = [1, 1]} : vector<16x256xf32> to vector<8x32xf32>
    %71 = tpu.concatenate %69, %70 in 0 : vector<8x32xf32>, vector<8x32xf32> -> vector<16x32xf32>
    %72 = arith.mulf %65, %42 : vector<16x32xf32>
    %73 = arith.mulf %62, %68 : vector<16x32xf32>
    %74 = arith.addf %72, %73 : vector<16x32xf32>
    %75 = math.tanh %74 : vector<16x32xf32>
    %76 = arith.mulf %71, %75 : vector<16x32xf32>
    %77 = vector.extract_strided_slice %9 {offsets = [2, 0, 0], sizes = [1, 8, 256], strides = [1, 1, 1]} : vector<8x8x256xf32> to vector<1x8x256xf32>
    %78 = vector.shape_cast %77 : vector<1x8x256xf32> to vector<8x256xf32>
    %79 = vector.extract_strided_slice %9 {offsets = [5, 0, 0], sizes = [1, 8, 256], strides = [1, 1, 1]} : vector<8x8x256xf32> to vector<1x8x256xf32>
    %80 = vector.shape_cast %79 : vector<1x8x256xf32> to vector<8x256xf32>
    %81 = tpu.concatenate %78, %80 in 0 : vector<8x256xf32>, vector<8x256xf32> -> vector<16x256xf32>
    %cst_17 = arith.constant dense<0.000000e+00> : vector<16x256xf32>
    %82 = tpu.matmul %76, %10, %cst_17 {dimension_numbers = #tpu.dot_dimension_numbers<[1], [0], [0], [1], [0, 0, 1, 1], [], []>} : vector<16x32xf32>, vector<32x256xf32>, vector<16x256xf32> -> vector<16x256xf32>
    %83 = arith.addf %81, %82 : vector<16x256xf32>
    %cst_18 = arith.constant 5.000000e-01 : f32
    %84 = vector.broadcast %cst_18 : f32 to vector<16x256xf32>
    %85 = arith.mulf %84, %83 : vector<16x256xf32>
    %86 = math.tanh %85 : vector<16x256xf32>
    %cst_19 = arith.constant 5.000000e-01 : f32
    %87 = vector.broadcast %cst_19 : f32 to vector<16x256xf32>
    %88 = arith.mulf %87, %86 : vector<16x256xf32>
    %cst_20 = arith.constant 5.000000e-01 : f32
    %89 = vector.broadcast %cst_20 : f32 to vector<16x256xf32>
    %90 = arith.addf %88, %89 : vector<16x256xf32>
    %91 = math.tanh %83 : vector<16x256xf32>
    %92 = vector.extract_strided_slice %90 {offsets = [0, 0], sizes = [8, 32], strides = [1, 1]} : vector<16x256xf32> to vector<8x32xf32>
    %93 = vector.extract_strided_slice %90 {offsets = [8, 128], sizes = [8, 32], strides = [1, 1]} : vector<16x256xf32> to vector<8x32xf32>
    %94 = tpu.concatenate %92, %93 in 0 : vector<8x32xf32>, vector<8x32xf32> -> vector<16x32xf32>
    %95 = vector.extract_strided_slice %90 {offsets = [0, 32], sizes = [8, 32], strides = [1, 1]} : vector<16x256xf32> to vector<8x32xf32>
    %96 = vector.extract_strided_slice %90 {offsets = [8, 160], sizes = [8, 32], strides = [1, 1]} : vector<16x256xf32> to vector<8x32xf32>
    %97 = tpu.concatenate %95, %96 in 0 : vector<8x32xf32>, vector<8x32xf32> -> vector<16x32xf32>
    %98 = vector.extract_strided_slice %91 {offsets = [0, 64], sizes = [8, 32], strides = [1, 1]} : vector<16x256xf32> to vector<8x32xf32>
    %99 = vector.extract_strided_slice %91 {offsets = [8, 192], sizes = [8, 32], strides = [1, 1]} : vector<16x256xf32> to vector<8x32xf32>
    %100 = tpu.concatenate %98, %99 in 0 : vector<8x32xf32>, vector<8x32xf32> -> vector<16x32xf32>
    %101 = vector.extract_strided_slice %90 {offsets = [0, 96], sizes = [8, 32], strides = [1, 1]} : vector<16x256xf32> to vector<8x32xf32>
    %102 = vector.extract_strided_slice %90 {offsets = [8, 224], sizes = [8, 32], strides = [1, 1]} : vector<16x256xf32> to vector<8x32xf32>
    %103 = tpu.concatenate %101, %102 in 0 : vector<8x32xf32>, vector<8x32xf32> -> vector<16x32xf32>
    %104 = arith.mulf %97, %74 : vector<16x32xf32>
    %105 = arith.mulf %94, %100 : vector<16x32xf32>
    %106 = arith.addf %104, %105 : vector<16x32xf32>
    %107 = math.tanh %106 : vector<16x32xf32>
    %108 = arith.mulf %103, %107 : vector<16x32xf32>
    %109 = vector.extract_strided_slice %9 {offsets = [3, 0, 0], sizes = [1, 8, 256], strides = [1, 1, 1]} : vector<8x8x256xf32> to vector<1x8x256xf32>
    %110 = vector.shape_cast %109 : vector<1x8x256xf32> to vector<8x256xf32>
    %111 = vector.extract_strided_slice %9 {offsets = [4, 0, 0], sizes = [1, 8, 256], strides = [1, 1, 1]} : vector<8x8x256xf32> to vector<1x8x256xf32>
    %112 = vector.shape_cast %111 : vector<1x8x256xf32> to vector<8x256xf32>
    %113 = tpu.concatenate %110, %112 in 0 : vector<8x256xf32>, vector<8x256xf32> -> vector<16x256xf32>
    %cst_21 = arith.constant dense<0.000000e+00> : vector<16x256xf32>
    %114 = tpu.matmul %108, %10, %cst_21 {dimension_numbers = #tpu.dot_dimension_numbers<[1], [0], [0], [1], [0, 0, 1, 1], [], []>} : vector<16x32xf32>, vector<32x256xf32>, vector<16x256xf32> -> vector<16x256xf32>
    %115 = arith.addf %113, %114 : vector<16x256xf32>
    %cst_22 = arith.constant 5.000000e-01 : f32
    %116 = vector.broadcast %cst_22 : f32 to vector<16x256xf32>
    %117 = arith.mulf %116, %115 : vector<16x256xf32>
    %118 = math.tanh %117 : vector<16x256xf32>
    %cst_23 = arith.constant 5.000000e-01 : f32
    %119 = vector.broadcast %cst_23 : f32 to vector<16x256xf32>
    %120 = arith.mulf %119, %118 : vector<16x256xf32>
    %cst_24 = arith.constant 5.000000e-01 : f32
    %121 = vector.broadcast %cst_24 : f32 to vector<16x256xf32>
    %122 = arith.addf %120, %121 : vector<16x256xf32>
    %123 = math.tanh %115 : vector<16x256xf32>
    %124 = vector.extract_strided_slice %122 {offsets = [0, 0], sizes = [8, 32], strides = [1, 1]} : vector<16x256xf32> to vector<8x32xf32>
    %125 = vector.extract_strided_slice %122 {offsets = [8, 128], sizes = [8, 32], strides = [1, 1]} : vector<16x256xf32> to vector<8x32xf32>
    %126 = tpu.concatenate %124, %125 in 0 : vector<8x32xf32>, vector<8x32xf32> -> vector<16x32xf32>
    %127 = vector.extract_strided_slice %122 {offsets = [0, 32], sizes = [8, 32], strides = [1, 1]} : vector<16x256xf32> to vector<8x32xf32>
    %128 = vector.extract_strided_slice %122 {offsets = [8, 160], sizes = [8, 32], strides = [1, 1]} : vector<16x256xf32> to vector<8x32xf32>
    %129 = tpu.concatenate %127, %128 in 0 : vector<8x32xf32>, vector<8x32xf32> -> vector<16x32xf32>
    %130 = vector.extract_strided_slice %123 {offsets = [0, 64], sizes = [8, 32], strides = [1, 1]} : vector<16x256xf32> to vector<8x32xf32>
    %131 = vector.extract_strided_slice %123 {offsets = [8, 192], sizes = [8, 32], strides = [1, 1]} : vector<16x256xf32> to vector<8x32xf32>
    %132 = tpu.concatenate %130, %131 in 0 : vector<8x32xf32>, vector<8x32xf32> -> vector<16x32xf32>
    %133 = vector.extract_strided_slice %122 {offsets = [0, 96], sizes = [8, 32], strides = [1, 1]} : vector<16x256xf32> to vector<8x32xf32>
    %134 = vector.extract_strided_slice %122 {offsets = [8, 224], sizes = [8, 32], strides = [1, 1]} : vector<16x256xf32> to vector<8x32xf32>
    %135 = tpu.concatenate %133, %134 in 0 : vector<8x32xf32>, vector<8x32xf32> -> vector<16x32xf32>
    %136 = arith.mulf %129, %106 : vector<16x32xf32>
    %137 = arith.mulf %126, %132 : vector<16x32xf32>
    %138 = arith.addf %136, %137 : vector<16x32xf32>
    %139 = math.tanh %138 : vector<16x32xf32>
    %140 = arith.mulf %135, %139 : vector<16x32xf32>
    %141 = vector.extract_strided_slice %9 {offsets = [4, 0, 0], sizes = [1, 8, 256], strides = [1, 1, 1]} : vector<8x8x256xf32> to vector<1x8x256xf32>
    %142 = vector.shape_cast %141 : vector<1x8x256xf32> to vector<8x256xf32>
    %143 = vector.extract_strided_slice %9 {offsets = [3, 0, 0], sizes = [1, 8, 256], strides = [1, 1, 1]} : vector<8x8x256xf32> to vector<1x8x256xf32>
    %144 = vector.shape_cast %143 : vector<1x8x256xf32> to vector<8x256xf32>
    %145 = tpu.concatenate %142, %144 in 0 : vector<8x256xf32>, vector<8x256xf32> -> vector<16x256xf32>
    %cst_25 = arith.constant dense<0.000000e+00> : vector<16x256xf32>
    %146 = tpu.matmul %140, %10, %cst_25 {dimension_numbers = #tpu.dot_dimension_numbers<[1], [0], [0], [1], [0, 0, 1, 1], [], []>} : vector<16x32xf32>, vector<32x256xf32>, vector<16x256xf32> -> vector<16x256xf32>
    %147 = arith.addf %145, %146 : vector<16x256xf32>
    %cst_26 = arith.constant 5.000000e-01 : f32
    %148 = vector.broadcast %cst_26 : f32 to vector<16x256xf32>
    %149 = arith.mulf %148, %147 : vector<16x256xf32>
    %150 = math.tanh %149 : vector<16x256xf32>
    %cst_27 = arith.constant 5.000000e-01 : f32
    %151 = vector.broadcast %cst_27 : f32 to vector<16x256xf32>
    %152 = arith.mulf %151, %150 : vector<16x256xf32>
    %cst_28 = arith.constant 5.000000e-01 : f32
    %153 = vector.broadcast %cst_28 : f32 to vector<16x256xf32>
    %154 = arith.addf %152, %153 : vector<16x256xf32>
    %155 = math.tanh %147 : vector<16x256xf32>
    %156 = vector.extract_strided_slice %154 {offsets = [0, 0], sizes = [8, 32], strides = [1, 1]} : vector<16x256xf32> to vector<8x32xf32>
    %157 = vector.extract_strided_slice %154 {offsets = [8, 128], sizes = [8, 32], strides = [1, 1]} : vector<16x256xf32> to vector<8x32xf32>
    %158 = tpu.concatenate %156, %157 in 0 : vector<8x32xf32>, vector<8x32xf32> -> vector<16x32xf32>
    %159 = vector.extract_strided_slice %154 {offsets = [0, 32], sizes = [8, 32], strides = [1, 1]} : vector<16x256xf32> to vector<8x32xf32>
    %160 = vector.extract_strided_slice %154 {offsets = [8, 160], sizes = [8, 32], strides = [1, 1]} : vector<16x256xf32> to vector<8x32xf32>
    %161 = tpu.concatenate %159, %160 in 0 : vector<8x32xf32>, vector<8x32xf32> -> vector<16x32xf32>
    %162 = vector.extract_strided_slice %155 {offsets = [0, 64], sizes = [8, 32], strides = [1, 1]} : vector<16x256xf32> to vector<8x32xf32>
    %163 = vector.extract_strided_slice %155 {offsets = [8, 192], sizes = [8, 32], strides = [1, 1]} : vector<16x256xf32> to vector<8x32xf32>
    %164 = tpu.concatenate %162, %163 in 0 : vector<8x32xf32>, vector<8x32xf32> -> vector<16x32xf32>
    %165 = vector.extract_strided_slice %154 {offsets = [0, 96], sizes = [8, 32], strides = [1, 1]} : vector<16x256xf32> to vector<8x32xf32>
    %166 = vector.extract_strided_slice %154 {offsets = [8, 224], sizes = [8, 32], strides = [1, 1]} : vector<16x256xf32> to vector<8x32xf32>
    %167 = tpu.concatenate %165, %166 in 0 : vector<8x32xf32>, vector<8x32xf32> -> vector<16x32xf32>
    %168 = arith.mulf %161, %138 : vector<16x32xf32>
    %169 = arith.mulf %158, %164 : vector<16x32xf32>
    %170 = arith.addf %168, %169 : vector<16x32xf32>
    %171 = math.tanh %170 : vector<16x32xf32>
    %172 = arith.mulf %167, %171 : vector<16x32xf32>
    %173 = vector.extract_strided_slice %9 {offsets = [5, 0, 0], sizes = [1, 8, 256], strides = [1, 1, 1]} : vector<8x8x256xf32> to vector<1x8x256xf32>
    %174 = vector.shape_cast %173 : vector<1x8x256xf32> to vector<8x256xf32>
    %175 = vector.extract_strided_slice %9 {offsets = [2, 0, 0], sizes = [1, 8, 256], strides = [1, 1, 1]} : vector<8x8x256xf32> to vector<1x8x256xf32>
    %176 = vector.shape_cast %175 : vector<1x8x256xf32> to vector<8x256xf32>
    %177 = tpu.concatenate %174, %176 in 0 : vector<8x256xf32>, vector<8x256xf32> -> vector<16x256xf32>
    %cst_29 = arith.constant dense<0.000000e+00> : vector<16x256xf32>
    %178 = tpu.matmul %172, %10, %cst_29 {dimension_numbers = #tpu.dot_dimension_numbers<[1], [0], [0], [1], [0, 0, 1, 1], [], []>} : vector<16x32xf32>, vector<32x256xf32>, vector<16x256xf32> -> vector<16x256xf32>
    %179 = arith.addf %177, %178 : vector<16x256xf32>
    %cst_30 = arith.constant 5.000000e-01 : f32
    %180 = vector.broadcast %cst_30 : f32 to vector<16x256xf32>
    %181 = arith.mulf %180, %179 : vector<16x256xf32>
    %182 = math.tanh %181 : vector<16x256xf32>
    %cst_31 = arith.constant 5.000000e-01 : f32
    %183 = vector.broadcast %cst_31 : f32 to vector<16x256xf32>
    %184 = arith.mulf %183, %182 : vector<16x256xf32>
    %cst_32 = arith.constant 5.000000e-01 : f32
    %185 = vector.broadcast %cst_32 : f32 to vector<16x256xf32>
    %186 = arith.addf %184, %185 : vector<16x256xf32>
    %187 = math.tanh %179 : vector<16x256xf32>
    %188 = vector.extract_strided_slice %186 {offsets = [0, 0], sizes = [8, 32], strides = [1, 1]} : vector<16x256xf32> to vector<8x32xf32>
    %189 = vector.extract_strided_slice %186 {offsets = [8, 128], sizes = [8, 32], strides = [1, 1]} : vector<16x256xf32> to vector<8x32xf32>
    %190 = tpu.concatenate %188, %189 in 0 : vector<8x32xf32>, vector<8x32xf32> -> vector<16x32xf32>
    %191 = vector.extract_strided_slice %186 {offsets = [0, 32], sizes = [8, 32], strides = [1, 1]} : vector<16x256xf32> to vector<8x32xf32>
    %192 = vector.extract_strided_slice %186 {offsets = [8, 160], sizes = [8, 32], strides = [1, 1]} : vector<16x256xf32> to vector<8x32xf32>
    %193 = tpu.concatenate %191, %192 in 0 : vector<8x32xf32>, vector<8x32xf32> -> vector<16x32xf32>
    %194 = vector.extract_strided_slice %187 {offsets = [0, 64], sizes = [8, 32], strides = [1, 1]} : vector<16x256xf32> to vector<8x32xf32>
    %195 = vector.extract_strided_slice %187 {offsets = [8, 192], sizes = [8, 32], strides = [1, 1]} : vector<16x256xf32> to vector<8x32xf32>
    %196 = tpu.concatenate %194, %195 in 0 : vector<8x32xf32>, vector<8x32xf32> -> vector<16x32xf32>
    %197 = vector.extract_strided_slice %186 {offsets = [0, 96], sizes = [8, 32], strides = [1, 1]} : vector<16x256xf32> to vector<8x32xf32>
    %198 = vector.extract_strided_slice %186 {offsets = [8, 224], sizes = [8, 32], strides = [1, 1]} : vector<16x256xf32> to vector<8x32xf32>
    %199 = tpu.concatenate %197, %198 in 0 : vector<8x32xf32>, vector<8x32xf32> -> vector<16x32xf32>
    %200 = arith.mulf %193, %170 : vector<16x32xf32>
    %201 = arith.mulf %190, %196 : vector<16x32xf32>
    %202 = arith.addf %200, %201 : vector<16x32xf32>
    %203 = math.tanh %202 : vector<16x32xf32>
    %204 = arith.mulf %199, %203 : vector<16x32xf32>
    %205 = vector.extract_strided_slice %9 {offsets = [6, 0, 0], sizes = [1, 8, 256], strides = [1, 1, 1]} : vector<8x8x256xf32> to vector<1x8x256xf32>
    %206 = vector.shape_cast %205 : vector<1x8x256xf32> to vector<8x256xf32>
    %207 = vector.extract_strided_slice %9 {offsets = [1, 0, 0], sizes = [1, 8, 256], strides = [1, 1, 1]} : vector<8x8x256xf32> to vector<1x8x256xf32>
    %208 = vector.shape_cast %207 : vector<1x8x256xf32> to vector<8x256xf32>
    %209 = tpu.concatenate %206, %208 in 0 : vector<8x256xf32>, vector<8x256xf32> -> vector<16x256xf32>
    %cst_33 = arith.constant dense<0.000000e+00> : vector<16x256xf32>
    %210 = tpu.matmul %204, %10, %cst_33 {dimension_numbers = #tpu.dot_dimension_numbers<[1], [0], [0], [1], [0, 0, 1, 1], [], []>} : vector<16x32xf32>, vector<32x256xf32>, vector<16x256xf32> -> vector<16x256xf32>
    %211 = arith.addf %209, %210 : vector<16x256xf32>
    %cst_34 = arith.constant 5.000000e-01 : f32
    %212 = vector.broadcast %cst_34 : f32 to vector<16x256xf32>
    %213 = arith.mulf %212, %211 : vector<16x256xf32>
    %214 = math.tanh %213 : vector<16x256xf32>
    %cst_35 = arith.constant 5.000000e-01 : f32
    %215 = vector.broadcast %cst_35 : f32 to vector<16x256xf32>
    %216 = arith.mulf %215, %214 : vector<16x256xf32>
    %cst_36 = arith.constant 5.000000e-01 : f32
    %217 = vector.broadcast %cst_36 : f32 to vector<16x256xf32>
    %218 = arith.addf %216, %217 : vector<16x256xf32>
    %219 = math.tanh %211 : vector<16x256xf32>
    %220 = vector.extract_strided_slice %218 {offsets = [0, 0], sizes = [8, 32], strides = [1, 1]} : vector<16x256xf32> to vector<8x32xf32>
    %221 = vector.extract_strided_slice %218 {offsets = [8, 128], sizes = [8, 32], strides = [1, 1]} : vector<16x256xf32> to vector<8x32xf32>
    %222 = tpu.concatenate %220, %221 in 0 : vector<8x32xf32>, vector<8x32xf32> -> vector<16x32xf32>
    %223 = vector.extract_strided_slice %218 {offsets = [0, 32], sizes = [8, 32], strides = [1, 1]} : vector<16x256xf32> to vector<8x32xf32>
    %224 = vector.extract_strided_slice %218 {offsets = [8, 160], sizes = [8, 32], strides = [1, 1]} : vector<16x256xf32> to vector<8x32xf32>
    %225 = tpu.concatenate %223, %224 in 0 : vector<8x32xf32>, vector<8x32xf32> -> vector<16x32xf32>
    %226 = vector.extract_strided_slice %219 {offsets = [0, 64], sizes = [8, 32], strides = [1, 1]} : vector<16x256xf32> to vector<8x32xf32>
    %227 = vector.extract_strided_slice %219 {offsets = [8, 192], sizes = [8, 32], strides = [1, 1]} : vector<16x256xf32> to vector<8x32xf32>
    %228 = tpu.concatenate %226, %227 in 0 : vector<8x32xf32>, vector<8x32xf32> -> vector<16x32xf32>
    %229 = vector.extract_strided_slice %218 {offsets = [0, 96], sizes = [8, 32], strides = [1, 1]} : vector<16x256xf32> to vector<8x32xf32>
    %230 = vector.extract_strided_slice %218 {offsets = [8, 224], sizes = [8, 32], strides = [1, 1]} : vector<16x256xf32> to vector<8x32xf32>
    %231 = tpu.concatenate %229, %230 in 0 : vector<8x32xf32>, vector<8x32xf32> -> vector<16x32xf32>
    %232 = arith.mulf %225, %202 : vector<16x32xf32>
    %233 = arith.mulf %222, %228 : vector<16x32xf32>
    %234 = arith.addf %232, %233 : vector<16x32xf32>
    %235 = math.tanh %234 : vector<16x32xf32>
    %236 = arith.mulf %231, %235 : vector<16x32xf32>
    %237 = vector.extract_strided_slice %9 {offsets = [7, 0, 0], sizes = [1, 8, 256], strides = [1, 1, 1]} : vector<8x8x256xf32> to vector<1x8x256xf32>
    %238 = vector.shape_cast %237 : vector<1x8x256xf32> to vector<8x256xf32>
    %239 = vector.extract_strided_slice %9 {offsets = [0, 0, 0], sizes = [1, 8, 256], strides = [1, 1, 1]} : vector<8x8x256xf32> to vector<1x8x256xf32>
    %240 = vector.shape_cast %239 : vector<1x8x256xf32> to vector<8x256xf32>
    %241 = tpu.concatenate %238, %240 in 0 : vector<8x256xf32>, vector<8x256xf32> -> vector<16x256xf32>
    %cst_37 = arith.constant dense<0.000000e+00> : vector<16x256xf32>
    %242 = tpu.matmul %236, %10, %cst_37 {dimension_numbers = #tpu.dot_dimension_numbers<[1], [0], [0], [1], [0, 0, 1, 1], [], []>} : vector<16x32xf32>, vector<32x256xf32>, vector<16x256xf32> -> vector<16x256xf32>
    %243 = arith.addf %241, %242 : vector<16x256xf32>
    %cst_38 = arith.constant 5.000000e-01 : f32
    %244 = vector.broadcast %cst_38 : f32 to vector<16x256xf32>
    %245 = arith.mulf %244, %243 : vector<16x256xf32>
    %246 = math.tanh %245 : vector<16x256xf32>
    %cst_39 = arith.constant 5.000000e-01 : f32
    %247 = vector.broadcast %cst_39 : f32 to vector<16x256xf32>
    %248 = arith.mulf %247, %246 : vector<16x256xf32>
    %cst_40 = arith.constant 5.000000e-01 : f32
    %249 = vector.broadcast %cst_40 : f32 to vector<16x256xf32>
    %250 = arith.addf %248, %249 : vector<16x256xf32>
    %251 = math.tanh %243 : vector<16x256xf32>
    %252 = vector.extract_strided_slice %250 {offsets = [0, 0], sizes = [8, 32], strides = [1, 1]} : vector<16x256xf32> to vector<8x32xf32>
    %253 = vector.extract_strided_slice %250 {offsets = [8, 128], sizes = [8, 32], strides = [1, 1]} : vector<16x256xf32> to vector<8x32xf32>
    %254 = tpu.concatenate %252, %253 in 0 : vector<8x32xf32>, vector<8x32xf32> -> vector<16x32xf32>
    %255 = vector.extract_strided_slice %250 {offsets = [0, 32], sizes = [8, 32], strides = [1, 1]} : vector<16x256xf32> to vector<8x32xf32>
    %256 = vector.extract_strided_slice %250 {offsets = [8, 160], sizes = [8, 32], strides = [1, 1]} : vector<16x256xf32> to vector<8x32xf32>
    %257 = tpu.concatenate %255, %256 in 0 : vector<8x32xf32>, vector<8x32xf32> -> vector<16x32xf32>
    %258 = vector.extract_strided_slice %251 {offsets = [0, 64], sizes = [8, 32], strides = [1, 1]} : vector<16x256xf32> to vector<8x32xf32>
    %259 = vector.extract_strided_slice %251 {offsets = [8, 192], sizes = [8, 32], strides = [1, 1]} : vector<16x256xf32> to vector<8x32xf32>
    %260 = tpu.concatenate %258, %259 in 0 : vector<8x32xf32>, vector<8x32xf32> -> vector<16x32xf32>
    %261 = vector.extract_strided_slice %250 {offsets = [0, 96], sizes = [8, 32], strides = [1, 1]} : vector<16x256xf32> to vector<8x32xf32>
    %262 = vector.extract_strided_slice %250 {offsets = [8, 224], sizes = [8, 32], strides = [1, 1]} : vector<16x256xf32> to vector<8x32xf32>
    %263 = tpu.concatenate %261, %262 in 0 : vector<8x32xf32>, vector<8x32xf32> -> vector<16x32xf32>
    %264 = arith.mulf %257, %234 : vector<16x32xf32>
    %265 = arith.mulf %254, %260 : vector<16x32xf32>
    %266 = arith.addf %264, %265 : vector<16x32xf32>
    %267 = math.tanh %266 : vector<16x32xf32>
    %268 = arith.mulf %263, %267 : vector<16x32xf32>
    %269 = vector.extract_strided_slice %268 {offsets = [0, 0], sizes = [8, 32], strides = [1, 1]} : vector<16x32xf32> to vector<8x32xf32>
    %270 = vector.extract_strided_slice %268 {offsets = [8, 0], sizes = [8, 32], strides = [1, 1]} : vector<16x32xf32> to vector<8x32xf32>
    %c0_41 = arith.constant 0 : index
    %c0_42 = arith.constant 0 : index
    %271 = vector.load %arg6[%c0_41, %c0_42] : memref<64x32xf32, #tpu.memory_space<vmem>>, vector<64x32xf32>
    %cst_43 = arith.constant 5.000000e-01 : f32
    %272 = vector.broadcast %cst_43 : f32 to vector<8x32xf32>
    %273 = arith.mulf %272, %269 : vector<8x32xf32>
    %274 = math.tanh %273 : vector<8x32xf32>
    %cst_44 = arith.constant 5.000000e-01 : f32
    %275 = vector.broadcast %cst_44 : f32 to vector<8x32xf32>
    %276 = arith.mulf %275, %274 : vector<8x32xf32>
    %cst_45 = arith.constant 5.000000e-01 : f32
    %277 = vector.broadcast %cst_45 : f32 to vector<8x32xf32>
    %278 = arith.addf %276, %277 : vector<8x32xf32>
    %279 = arith.mulf %269, %278 : vector<8x32xf32>
    %280 = vector.extract_strided_slice %271 {offsets = [0, 0], sizes = [32, 32], strides = [1, 1]} : vector<64x32xf32> to vector<32x32xf32>
    %cst_46 = arith.constant dense<0.000000e+00> : vector<8x32xf32>
    %281 = tpu.matmul %279, %280, %cst_46 {dimension_numbers = #tpu.dot_dimension_numbers<[1], [0], [0], [1], [0, 0, 1, 1], [], []>} : vector<8x32xf32>, vector<32x32xf32>, vector<8x32xf32> -> vector<8x32xf32>
    %cst_47 = arith.constant 5.000000e-01 : f32
    %282 = vector.broadcast %cst_47 : f32 to vector<8x32xf32>
    %283 = arith.mulf %282, %270 : vector<8x32xf32>
    %284 = math.tanh %283 : vector<8x32xf32>
    %cst_48 = arith.constant 5.000000e-01 : f32
    %285 = vector.broadcast %cst_48 : f32 to vector<8x32xf32>
    %286 = arith.mulf %285, %284 : vector<8x32xf32>
    %cst_49 = arith.constant 5.000000e-01 : f32
    %287 = vector.broadcast %cst_49 : f32 to vector<8x32xf32>
    %288 = arith.addf %286, %287 : vector<8x32xf32>
    %289 = arith.mulf %270, %288 : vector<8x32xf32>
    %290 = vector.extract_strided_slice %271 {offsets = [32, 0], sizes = [32, 32], strides = [1, 1]} : vector<64x32xf32> to vector<32x32xf32>
    %cst_50 = arith.constant dense<0.000000e+00> : vector<8x32xf32>
    %291 = tpu.matmul %289, %290, %cst_50 {dimension_numbers = #tpu.dot_dimension_numbers<[1], [0], [0], [1], [0, 0, 1, 1], [], []>} : vector<8x32xf32>, vector<32x32xf32>, vector<8x32xf32> -> vector<8x32xf32>
    %292 = arith.addf %281, %291 : vector<8x32xf32>
    %c0_51 = arith.constant 0 : index
    %c0_52 = arith.constant 0 : index
    %293 = vector.load %arg7[%c0_51, %c0_52] : memref<1x32xf32, #tpu.memory_space<vmem>>, vector<1x32xf32>
    %294 = vector.broadcast %293 : vector<1x32xf32> to vector<8x32xf32>
    %295 = arith.addf %292, %294 : vector<8x32xf32>
    %296 = vector.extract_strided_slice %295 {offsets = [0, 0], sizes = [8, 16], strides = [1, 1]} : vector<8x32xf32> to vector<8x16xf32>
    %297 = vector.extract_strided_slice %295 {offsets = [0, 16], sizes = [8, 16], strides = [1, 1]} : vector<8x32xf32> to vector<8x16xf32>
    %c0_53 = arith.constant 0 : index
    %c0_54 = arith.constant 0 : index
    %298 = vector.load %arg1[%c0_53, %c0_54] : memref<8x16xf32, #tpu.memory_space<vmem>>, vector<8x16xf32>
    %cst_55 = arith.constant 5.000000e-01 : f32
    %299 = vector.broadcast %cst_55 : f32 to vector<8x16xf32>
    %300 = arith.mulf %299, %297 : vector<8x16xf32>
    %301 = math.exp %300 : vector<8x16xf32>
    %302 = arith.mulf %298, %301 : vector<8x16xf32>
    %303 = arith.addf %296, %302 : vector<8x16xf32>
    %c0_56 = arith.constant 0 : index
    %c0_57 = arith.constant 0 : index
    %304 = vector.load %arg9[%c0_56, %c0_57] : memref<16x256xf32, #tpu.memory_space<vmem>>, vector<16x256xf32>
    %cst_58 = arith.constant dense<0.000000e+00> : vector<8x256xf32>
    %305 = tpu.matmul %303, %304, %cst_58 {dimension_numbers = #tpu.dot_dimension_numbers<[1], [0], [0], [1], [0, 0, 1, 1], [], []>} : vector<8x16xf32>, vector<16x256xf32>, vector<8x256xf32> -> vector<8x256xf32>
    %c0_59 = arith.constant 0 : index
    %c0_60 = arith.constant 0 : index
    %306 = vector.load %arg11[%c0_59, %c0_60] : memref<1x256xf32, #tpu.memory_space<vmem>>, vector<1x256xf32>
    %307 = vector.broadcast %306 : vector<1x256xf32> to vector<8x256xf32>
    %308 = arith.addf %305, %307 : vector<8x256xf32>
    %c0_61 = arith.constant 0 : index
    %c0_62 = arith.constant 0 : index
    %309 = vector.load %arg8[%c0_61, %c0_62] : memref<1x256xf32, #tpu.memory_space<vmem>>, vector<1x256xf32>
    %310 = vector.shape_cast %309 : vector<1x256xf32> to vector<1x1x256xf32>
    %311 = vector.broadcast %0 : vector<8x8x1xf32> to vector<8x8x256xf32>
    %312 = vector.broadcast %310 : vector<1x1x256xf32> to vector<8x8x256xf32>
    %313 = arith.mulf %311, %312 : vector<8x8x256xf32>
    %314 = vector.shape_cast %308 : vector<8x256xf32> to vector<1x8x256xf32>
    %315 = vector.broadcast %314 : vector<1x8x256xf32> to vector<8x8x256xf32>
    %316 = arith.addf %313, %315 : vector<8x8x256xf32>
    %c0_63 = arith.constant 0 : index
    %c0_64 = arith.constant 0 : index
    %317 = vector.load %arg10[%c0_63, %c0_64] : memref<32x256xf32, #tpu.memory_space<vmem>>, vector<32x256xf32>
    %cst_65 = arith.constant 0.000000e+00 : f32
    %318 = vector.broadcast %cst_65 : f32 to vector<16x32xf32>
    %cst_66 = arith.constant 0.000000e+00 : f32
    %319 = vector.broadcast %cst_66 : f32 to vector<16x32xf32>
    %320 = vector.extract_strided_slice %316 {offsets = [0, 0, 0], sizes = [1, 8, 256], strides = [1, 1, 1]} : vector<8x8x256xf32> to vector<1x8x256xf32>
    %321 = vector.shape_cast %320 : vector<1x8x256xf32> to vector<8x256xf32>
    %322 = vector.extract_strided_slice %316 {offsets = [7, 0, 0], sizes = [1, 8, 256], strides = [1, 1, 1]} : vector<8x8x256xf32> to vector<1x8x256xf32>
    %323 = vector.shape_cast %322 : vector<1x8x256xf32> to vector<8x256xf32>
    %324 = tpu.concatenate %321, %323 in 0 : vector<8x256xf32>, vector<8x256xf32> -> vector<16x256xf32>
    %cst_67 = arith.constant dense<0.000000e+00> : vector<16x256xf32>
    %325 = tpu.matmul %318, %317, %cst_67 {dimension_numbers = #tpu.dot_dimension_numbers<[1], [0], [0], [1], [0, 0, 1, 1], [], []>} : vector<16x32xf32>, vector<32x256xf32>, vector<16x256xf32> -> vector<16x256xf32>
    %326 = arith.addf %324, %325 : vector<16x256xf32>
    %cst_68 = arith.constant 5.000000e-01 : f32
    %327 = vector.broadcast %cst_68 : f32 to vector<16x256xf32>
    %328 = arith.mulf %327, %326 : vector<16x256xf32>
    %329 = math.tanh %328 : vector<16x256xf32>
    %cst_69 = arith.constant 5.000000e-01 : f32
    %330 = vector.broadcast %cst_69 : f32 to vector<16x256xf32>
    %331 = arith.mulf %330, %329 : vector<16x256xf32>
    %cst_70 = arith.constant 5.000000e-01 : f32
    %332 = vector.broadcast %cst_70 : f32 to vector<16x256xf32>
    %333 = arith.addf %331, %332 : vector<16x256xf32>
    %334 = math.tanh %326 : vector<16x256xf32>
    %335 = vector.extract_strided_slice %333 {offsets = [0, 0], sizes = [8, 32], strides = [1, 1]} : vector<16x256xf32> to vector<8x32xf32>
    %336 = vector.extract_strided_slice %333 {offsets = [8, 128], sizes = [8, 32], strides = [1, 1]} : vector<16x256xf32> to vector<8x32xf32>
    %337 = tpu.concatenate %335, %336 in 0 : vector<8x32xf32>, vector<8x32xf32> -> vector<16x32xf32>
    %338 = vector.extract_strided_slice %333 {offsets = [0, 32], sizes = [8, 32], strides = [1, 1]} : vector<16x256xf32> to vector<8x32xf32>
    %339 = vector.extract_strided_slice %333 {offsets = [8, 160], sizes = [8, 32], strides = [1, 1]} : vector<16x256xf32> to vector<8x32xf32>
    %340 = tpu.concatenate %338, %339 in 0 : vector<8x32xf32>, vector<8x32xf32> -> vector<16x32xf32>
    %341 = vector.extract_strided_slice %334 {offsets = [0, 64], sizes = [8, 32], strides = [1, 1]} : vector<16x256xf32> to vector<8x32xf32>
    %342 = vector.extract_strided_slice %334 {offsets = [8, 192], sizes = [8, 32], strides = [1, 1]} : vector<16x256xf32> to vector<8x32xf32>
    %343 = tpu.concatenate %341, %342 in 0 : vector<8x32xf32>, vector<8x32xf32> -> vector<16x32xf32>
    %344 = vector.extract_strided_slice %333 {offsets = [0, 96], sizes = [8, 32], strides = [1, 1]} : vector<16x256xf32> to vector<8x32xf32>
    %345 = vector.extract_strided_slice %333 {offsets = [8, 224], sizes = [8, 32], strides = [1, 1]} : vector<16x256xf32> to vector<8x32xf32>
    %346 = tpu.concatenate %344, %345 in 0 : vector<8x32xf32>, vector<8x32xf32> -> vector<16x32xf32>
    %347 = arith.mulf %340, %319 : vector<16x32xf32>
    %348 = arith.mulf %337, %343 : vector<16x32xf32>
    %349 = arith.addf %347, %348 : vector<16x32xf32>
    %350 = math.tanh %349 : vector<16x32xf32>
    %351 = arith.mulf %346, %350 : vector<16x32xf32>
    %352 = vector.extract_strided_slice %316 {offsets = [1, 0, 0], sizes = [1, 8, 256], strides = [1, 1, 1]} : vector<8x8x256xf32> to vector<1x8x256xf32>
    %353 = vector.shape_cast %352 : vector<1x8x256xf32> to vector<8x256xf32>
    %354 = vector.extract_strided_slice %316 {offsets = [6, 0, 0], sizes = [1, 8, 256], strides = [1, 1, 1]} : vector<8x8x256xf32> to vector<1x8x256xf32>
    %355 = vector.shape_cast %354 : vector<1x8x256xf32> to vector<8x256xf32>
    %356 = tpu.concatenate %353, %355 in 0 : vector<8x256xf32>, vector<8x256xf32> -> vector<16x256xf32>
    %cst_71 = arith.constant dense<0.000000e+00> : vector<16x256xf32>
    %357 = tpu.matmul %351, %317, %cst_71 {dimension_numbers = #tpu.dot_dimension_numbers<[1], [0], [0], [1], [0, 0, 1, 1], [], []>} : vector<16x32xf32>, vector<32x256xf32>, vector<16x256xf32> -> vector<16x256xf32>
    %358 = arith.addf %356, %357 : vector<16x256xf32>
    %cst_72 = arith.constant 5.000000e-01 : f32
    %359 = vector.broadcast %cst_72 : f32 to vector<16x256xf32>
    %360 = arith.mulf %359, %358 : vector<16x256xf32>
    %361 = math.tanh %360 : vector<16x256xf32>
    %cst_73 = arith.constant 5.000000e-01 : f32
    %362 = vector.broadcast %cst_73 : f32 to vector<16x256xf32>
    %363 = arith.mulf %362, %361 : vector<16x256xf32>
    %cst_74 = arith.constant 5.000000e-01 : f32
    %364 = vector.broadcast %cst_74 : f32 to vector<16x256xf32>
    %365 = arith.addf %363, %364 : vector<16x256xf32>
    %366 = math.tanh %358 : vector<16x256xf32>
    %367 = vector.extract_strided_slice %365 {offsets = [0, 0], sizes = [8, 32], strides = [1, 1]} : vector<16x256xf32> to vector<8x32xf32>
    %368 = vector.extract_strided_slice %365 {offsets = [8, 128], sizes = [8, 32], strides = [1, 1]} : vector<16x256xf32> to vector<8x32xf32>
    %369 = tpu.concatenate %367, %368 in 0 : vector<8x32xf32>, vector<8x32xf32> -> vector<16x32xf32>
    %370 = vector.extract_strided_slice %365 {offsets = [0, 32], sizes = [8, 32], strides = [1, 1]} : vector<16x256xf32> to vector<8x32xf32>
    %371 = vector.extract_strided_slice %365 {offsets = [8, 160], sizes = [8, 32], strides = [1, 1]} : vector<16x256xf32> to vector<8x32xf32>
    %372 = tpu.concatenate %370, %371 in 0 : vector<8x32xf32>, vector<8x32xf32> -> vector<16x32xf32>
    %373 = vector.extract_strided_slice %366 {offsets = [0, 64], sizes = [8, 32], strides = [1, 1]} : vector<16x256xf32> to vector<8x32xf32>
    %374 = vector.extract_strided_slice %366 {offsets = [8, 192], sizes = [8, 32], strides = [1, 1]} : vector<16x256xf32> to vector<8x32xf32>
    %375 = tpu.concatenate %373, %374 in 0 : vector<8x32xf32>, vector<8x32xf32> -> vector<16x32xf32>
    %376 = vector.extract_strided_slice %365 {offsets = [0, 96], sizes = [8, 32], strides = [1, 1]} : vector<16x256xf32> to vector<8x32xf32>
    %377 = vector.extract_strided_slice %365 {offsets = [8, 224], sizes = [8, 32], strides = [1, 1]} : vector<16x256xf32> to vector<8x32xf32>
    %378 = tpu.concatenate %376, %377 in 0 : vector<8x32xf32>, vector<8x32xf32> -> vector<16x32xf32>
    %379 = arith.mulf %372, %349 : vector<16x32xf32>
    %380 = arith.mulf %369, %375 : vector<16x32xf32>
    %381 = arith.addf %379, %380 : vector<16x32xf32>
    %382 = math.tanh %381 : vector<16x32xf32>
    %383 = arith.mulf %378, %382 : vector<16x32xf32>
    %384 = vector.extract_strided_slice %316 {offsets = [2, 0, 0], sizes = [1, 8, 256], strides = [1, 1, 1]} : vector<8x8x256xf32> to vector<1x8x256xf32>
    %385 = vector.shape_cast %384 : vector<1x8x256xf32> to vector<8x256xf32>
    %386 = vector.extract_strided_slice %316 {offsets = [5, 0, 0], sizes = [1, 8, 256], strides = [1, 1, 1]} : vector<8x8x256xf32> to vector<1x8x256xf32>
    %387 = vector.shape_cast %386 : vector<1x8x256xf32> to vector<8x256xf32>
    %388 = tpu.concatenate %385, %387 in 0 : vector<8x256xf32>, vector<8x256xf32> -> vector<16x256xf32>
    %cst_75 = arith.constant dense<0.000000e+00> : vector<16x256xf32>
    %389 = tpu.matmul %383, %317, %cst_75 {dimension_numbers = #tpu.dot_dimension_numbers<[1], [0], [0], [1], [0, 0, 1, 1], [], []>} : vector<16x32xf32>, vector<32x256xf32>, vector<16x256xf32> -> vector<16x256xf32>
    %390 = arith.addf %388, %389 : vector<16x256xf32>
    %cst_76 = arith.constant 5.000000e-01 : f32
    %391 = vector.broadcast %cst_76 : f32 to vector<16x256xf32>
    %392 = arith.mulf %391, %390 : vector<16x256xf32>
    %393 = math.tanh %392 : vector<16x256xf32>
    %cst_77 = arith.constant 5.000000e-01 : f32
    %394 = vector.broadcast %cst_77 : f32 to vector<16x256xf32>
    %395 = arith.mulf %394, %393 : vector<16x256xf32>
    %cst_78 = arith.constant 5.000000e-01 : f32
    %396 = vector.broadcast %cst_78 : f32 to vector<16x256xf32>
    %397 = arith.addf %395, %396 : vector<16x256xf32>
    %398 = math.tanh %390 : vector<16x256xf32>
    %399 = vector.extract_strided_slice %397 {offsets = [0, 0], sizes = [8, 32], strides = [1, 1]} : vector<16x256xf32> to vector<8x32xf32>
    %400 = vector.extract_strided_slice %397 {offsets = [8, 128], sizes = [8, 32], strides = [1, 1]} : vector<16x256xf32> to vector<8x32xf32>
    %401 = tpu.concatenate %399, %400 in 0 : vector<8x32xf32>, vector<8x32xf32> -> vector<16x32xf32>
    %402 = vector.extract_strided_slice %397 {offsets = [0, 32], sizes = [8, 32], strides = [1, 1]} : vector<16x256xf32> to vector<8x32xf32>
    %403 = vector.extract_strided_slice %397 {offsets = [8, 160], sizes = [8, 32], strides = [1, 1]} : vector<16x256xf32> to vector<8x32xf32>
    %404 = tpu.concatenate %402, %403 in 0 : vector<8x32xf32>, vector<8x32xf32> -> vector<16x32xf32>
    %405 = vector.extract_strided_slice %398 {offsets = [0, 64], sizes = [8, 32], strides = [1, 1]} : vector<16x256xf32> to vector<8x32xf32>
    %406 = vector.extract_strided_slice %398 {offsets = [8, 192], sizes = [8, 32], strides = [1, 1]} : vector<16x256xf32> to vector<8x32xf32>
    %407 = tpu.concatenate %405, %406 in 0 : vector<8x32xf32>, vector<8x32xf32> -> vector<16x32xf32>
    %408 = vector.extract_strided_slice %397 {offsets = [0, 96], sizes = [8, 32], strides = [1, 1]} : vector<16x256xf32> to vector<8x32xf32>
    %409 = vector.extract_strided_slice %397 {offsets = [8, 224], sizes = [8, 32], strides = [1, 1]} : vector<16x256xf32> to vector<8x32xf32>
    %410 = tpu.concatenate %408, %409 in 0 : vector<8x32xf32>, vector<8x32xf32> -> vector<16x32xf32>
    %411 = arith.mulf %404, %381 : vector<16x32xf32>
    %412 = arith.mulf %401, %407 : vector<16x32xf32>
    %413 = arith.addf %411, %412 : vector<16x32xf32>
    %414 = math.tanh %413 : vector<16x32xf32>
    %415 = arith.mulf %410, %414 : vector<16x32xf32>
    %416 = vector.extract_strided_slice %316 {offsets = [3, 0, 0], sizes = [1, 8, 256], strides = [1, 1, 1]} : vector<8x8x256xf32> to vector<1x8x256xf32>
    %417 = vector.shape_cast %416 : vector<1x8x256xf32> to vector<8x256xf32>
    %418 = vector.extract_strided_slice %316 {offsets = [4, 0, 0], sizes = [1, 8, 256], strides = [1, 1, 1]} : vector<8x8x256xf32> to vector<1x8x256xf32>
    %419 = vector.shape_cast %418 : vector<1x8x256xf32> to vector<8x256xf32>
    %420 = tpu.concatenate %417, %419 in 0 : vector<8x256xf32>, vector<8x256xf32> -> vector<16x256xf32>
    %cst_79 = arith.constant dense<0.000000e+00> : vector<16x256xf32>
    %421 = tpu.matmul %415, %317, %cst_79 {dimension_numbers = #tpu.dot_dimension_numbers<[1], [0], [0], [1], [0, 0, 1, 1], [], []>} : vector<16x32xf32>, vector<32x256xf32>, vector<16x256xf32> -> vector<16x256xf32>
    %422 = arith.addf %420, %421 : vector<16x256xf32>
    %cst_80 = arith.constant 5.000000e-01 : f32
    %423 = vector.broadcast %cst_80 : f32 to vector<16x256xf32>
    %424 = arith.mulf %423, %422 : vector<16x256xf32>
    %425 = math.tanh %424 : vector<16x256xf32>
    %cst_81 = arith.constant 5.000000e-01 : f32
    %426 = vector.broadcast %cst_81 : f32 to vector<16x256xf32>
    %427 = arith.mulf %426, %425 : vector<16x256xf32>
    %cst_82 = arith.constant 5.000000e-01 : f32
    %428 = vector.broadcast %cst_82 : f32 to vector<16x256xf32>
    %429 = arith.addf %427, %428 : vector<16x256xf32>
    %430 = math.tanh %422 : vector<16x256xf32>
    %431 = vector.extract_strided_slice %429 {offsets = [0, 0], sizes = [8, 32], strides = [1, 1]} : vector<16x256xf32> to vector<8x32xf32>
    %432 = vector.extract_strided_slice %429 {offsets = [8, 128], sizes = [8, 32], strides = [1, 1]} : vector<16x256xf32> to vector<8x32xf32>
    %433 = tpu.concatenate %431, %432 in 0 : vector<8x32xf32>, vector<8x32xf32> -> vector<16x32xf32>
    %434 = vector.extract_strided_slice %429 {offsets = [0, 32], sizes = [8, 32], strides = [1, 1]} : vector<16x256xf32> to vector<8x32xf32>
    %435 = vector.extract_strided_slice %429 {offsets = [8, 160], sizes = [8, 32], strides = [1, 1]} : vector<16x256xf32> to vector<8x32xf32>
    %436 = tpu.concatenate %434, %435 in 0 : vector<8x32xf32>, vector<8x32xf32> -> vector<16x32xf32>
    %437 = vector.extract_strided_slice %430 {offsets = [0, 64], sizes = [8, 32], strides = [1, 1]} : vector<16x256xf32> to vector<8x32xf32>
    %438 = vector.extract_strided_slice %430 {offsets = [8, 192], sizes = [8, 32], strides = [1, 1]} : vector<16x256xf32> to vector<8x32xf32>
    %439 = tpu.concatenate %437, %438 in 0 : vector<8x32xf32>, vector<8x32xf32> -> vector<16x32xf32>
    %440 = vector.extract_strided_slice %429 {offsets = [0, 96], sizes = [8, 32], strides = [1, 1]} : vector<16x256xf32> to vector<8x32xf32>
    %441 = vector.extract_strided_slice %429 {offsets = [8, 224], sizes = [8, 32], strides = [1, 1]} : vector<16x256xf32> to vector<8x32xf32>
    %442 = tpu.concatenate %440, %441 in 0 : vector<8x32xf32>, vector<8x32xf32> -> vector<16x32xf32>
    %443 = arith.mulf %436, %413 : vector<16x32xf32>
    %444 = arith.mulf %433, %439 : vector<16x32xf32>
    %445 = arith.addf %443, %444 : vector<16x32xf32>
    %446 = math.tanh %445 : vector<16x32xf32>
    %447 = arith.mulf %442, %446 : vector<16x32xf32>
    %448 = vector.extract_strided_slice %316 {offsets = [4, 0, 0], sizes = [1, 8, 256], strides = [1, 1, 1]} : vector<8x8x256xf32> to vector<1x8x256xf32>
    %449 = vector.shape_cast %448 : vector<1x8x256xf32> to vector<8x256xf32>
    %450 = vector.extract_strided_slice %316 {offsets = [3, 0, 0], sizes = [1, 8, 256], strides = [1, 1, 1]} : vector<8x8x256xf32> to vector<1x8x256xf32>
    %451 = vector.shape_cast %450 : vector<1x8x256xf32> to vector<8x256xf32>
    %452 = tpu.concatenate %449, %451 in 0 : vector<8x256xf32>, vector<8x256xf32> -> vector<16x256xf32>
    %cst_83 = arith.constant dense<0.000000e+00> : vector<16x256xf32>
    %453 = tpu.matmul %447, %317, %cst_83 {dimension_numbers = #tpu.dot_dimension_numbers<[1], [0], [0], [1], [0, 0, 1, 1], [], []>} : vector<16x32xf32>, vector<32x256xf32>, vector<16x256xf32> -> vector<16x256xf32>
    %454 = arith.addf %452, %453 : vector<16x256xf32>
    %cst_84 = arith.constant 5.000000e-01 : f32
    %455 = vector.broadcast %cst_84 : f32 to vector<16x256xf32>
    %456 = arith.mulf %455, %454 : vector<16x256xf32>
    %457 = math.tanh %456 : vector<16x256xf32>
    %cst_85 = arith.constant 5.000000e-01 : f32
    %458 = vector.broadcast %cst_85 : f32 to vector<16x256xf32>
    %459 = arith.mulf %458, %457 : vector<16x256xf32>
    %cst_86 = arith.constant 5.000000e-01 : f32
    %460 = vector.broadcast %cst_86 : f32 to vector<16x256xf32>
    %461 = arith.addf %459, %460 : vector<16x256xf32>
    %462 = math.tanh %454 : vector<16x256xf32>
    %463 = vector.extract_strided_slice %461 {offsets = [0, 0], sizes = [8, 32], strides = [1, 1]} : vector<16x256xf32> to vector<8x32xf32>
    %464 = vector.extract_strided_slice %461 {offsets = [8, 128], sizes = [8, 32], strides = [1, 1]} : vector<16x256xf32> to vector<8x32xf32>
    %465 = tpu.concatenate %463, %464 in 0 : vector<8x32xf32>, vector<8x32xf32> -> vector<16x32xf32>
    %466 = vector.extract_strided_slice %461 {offsets = [0, 32], sizes = [8, 32], strides = [1, 1]} : vector<16x256xf32> to vector<8x32xf32>
    %467 = vector.extract_strided_slice %461 {offsets = [8, 160], sizes = [8, 32], strides = [1, 1]} : vector<16x256xf32> to vector<8x32xf32>
    %468 = tpu.concatenate %466, %467 in 0 : vector<8x32xf32>, vector<8x32xf32> -> vector<16x32xf32>
    %469 = vector.extract_strided_slice %462 {offsets = [0, 64], sizes = [8, 32], strides = [1, 1]} : vector<16x256xf32> to vector<8x32xf32>
    %470 = vector.extract_strided_slice %462 {offsets = [8, 192], sizes = [8, 32], strides = [1, 1]} : vector<16x256xf32> to vector<8x32xf32>
    %471 = tpu.concatenate %469, %470 in 0 : vector<8x32xf32>, vector<8x32xf32> -> vector<16x32xf32>
    %472 = vector.extract_strided_slice %461 {offsets = [0, 96], sizes = [8, 32], strides = [1, 1]} : vector<16x256xf32> to vector<8x32xf32>
    %473 = vector.extract_strided_slice %461 {offsets = [8, 224], sizes = [8, 32], strides = [1, 1]} : vector<16x256xf32> to vector<8x32xf32>
    %474 = tpu.concatenate %472, %473 in 0 : vector<8x32xf32>, vector<8x32xf32> -> vector<16x32xf32>
    %475 = arith.mulf %468, %445 : vector<16x32xf32>
    %476 = arith.mulf %465, %471 : vector<16x32xf32>
    %477 = arith.addf %475, %476 : vector<16x32xf32>
    %478 = math.tanh %477 : vector<16x32xf32>
    %479 = arith.mulf %474, %478 : vector<16x32xf32>
    %480 = vector.extract_strided_slice %316 {offsets = [5, 0, 0], sizes = [1, 8, 256], strides = [1, 1, 1]} : vector<8x8x256xf32> to vector<1x8x256xf32>
    %481 = vector.shape_cast %480 : vector<1x8x256xf32> to vector<8x256xf32>
    %482 = vector.extract_strided_slice %316 {offsets = [2, 0, 0], sizes = [1, 8, 256], strides = [1, 1, 1]} : vector<8x8x256xf32> to vector<1x8x256xf32>
    %483 = vector.shape_cast %482 : vector<1x8x256xf32> to vector<8x256xf32>
    %484 = tpu.concatenate %481, %483 in 0 : vector<8x256xf32>, vector<8x256xf32> -> vector<16x256xf32>
    %cst_87 = arith.constant dense<0.000000e+00> : vector<16x256xf32>
    %485 = tpu.matmul %479, %317, %cst_87 {dimension_numbers = #tpu.dot_dimension_numbers<[1], [0], [0], [1], [0, 0, 1, 1], [], []>} : vector<16x32xf32>, vector<32x256xf32>, vector<16x256xf32> -> vector<16x256xf32>
    %486 = arith.addf %484, %485 : vector<16x256xf32>
    %cst_88 = arith.constant 5.000000e-01 : f32
    %487 = vector.broadcast %cst_88 : f32 to vector<16x256xf32>
    %488 = arith.mulf %487, %486 : vector<16x256xf32>
    %489 = math.tanh %488 : vector<16x256xf32>
    %cst_89 = arith.constant 5.000000e-01 : f32
    %490 = vector.broadcast %cst_89 : f32 to vector<16x256xf32>
    %491 = arith.mulf %490, %489 : vector<16x256xf32>
    %cst_90 = arith.constant 5.000000e-01 : f32
    %492 = vector.broadcast %cst_90 : f32 to vector<16x256xf32>
    %493 = arith.addf %491, %492 : vector<16x256xf32>
    %494 = math.tanh %486 : vector<16x256xf32>
    %495 = vector.extract_strided_slice %493 {offsets = [0, 0], sizes = [8, 32], strides = [1, 1]} : vector<16x256xf32> to vector<8x32xf32>
    %496 = vector.extract_strided_slice %493 {offsets = [8, 128], sizes = [8, 32], strides = [1, 1]} : vector<16x256xf32> to vector<8x32xf32>
    %497 = tpu.concatenate %495, %496 in 0 : vector<8x32xf32>, vector<8x32xf32> -> vector<16x32xf32>
    %498 = vector.extract_strided_slice %493 {offsets = [0, 32], sizes = [8, 32], strides = [1, 1]} : vector<16x256xf32> to vector<8x32xf32>
    %499 = vector.extract_strided_slice %493 {offsets = [8, 160], sizes = [8, 32], strides = [1, 1]} : vector<16x256xf32> to vector<8x32xf32>
    %500 = tpu.concatenate %498, %499 in 0 : vector<8x32xf32>, vector<8x32xf32> -> vector<16x32xf32>
    %501 = vector.extract_strided_slice %494 {offsets = [0, 64], sizes = [8, 32], strides = [1, 1]} : vector<16x256xf32> to vector<8x32xf32>
    %502 = vector.extract_strided_slice %494 {offsets = [8, 192], sizes = [8, 32], strides = [1, 1]} : vector<16x256xf32> to vector<8x32xf32>
    %503 = tpu.concatenate %501, %502 in 0 : vector<8x32xf32>, vector<8x32xf32> -> vector<16x32xf32>
    %504 = vector.extract_strided_slice %493 {offsets = [0, 96], sizes = [8, 32], strides = [1, 1]} : vector<16x256xf32> to vector<8x32xf32>
    %505 = vector.extract_strided_slice %493 {offsets = [8, 224], sizes = [8, 32], strides = [1, 1]} : vector<16x256xf32> to vector<8x32xf32>
    %506 = tpu.concatenate %504, %505 in 0 : vector<8x32xf32>, vector<8x32xf32> -> vector<16x32xf32>
    %507 = arith.mulf %500, %477 : vector<16x32xf32>
    %508 = arith.mulf %497, %503 : vector<16x32xf32>
    %509 = arith.addf %507, %508 : vector<16x32xf32>
    %510 = math.tanh %509 : vector<16x32xf32>
    %511 = arith.mulf %506, %510 : vector<16x32xf32>
    %512 = vector.extract_strided_slice %316 {offsets = [6, 0, 0], sizes = [1, 8, 256], strides = [1, 1, 1]} : vector<8x8x256xf32> to vector<1x8x256xf32>
    %513 = vector.shape_cast %512 : vector<1x8x256xf32> to vector<8x256xf32>
    %514 = vector.extract_strided_slice %316 {offsets = [1, 0, 0], sizes = [1, 8, 256], strides = [1, 1, 1]} : vector<8x8x256xf32> to vector<1x8x256xf32>
    %515 = vector.shape_cast %514 : vector<1x8x256xf32> to vector<8x256xf32>
    %516 = tpu.concatenate %513, %515 in 0 : vector<8x256xf32>, vector<8x256xf32> -> vector<16x256xf32>
    %cst_91 = arith.constant dense<0.000000e+00> : vector<16x256xf32>
    %517 = tpu.matmul %511, %317, %cst_91 {dimension_numbers = #tpu.dot_dimension_numbers<[1], [0], [0], [1], [0, 0, 1, 1], [], []>} : vector<16x32xf32>, vector<32x256xf32>, vector<16x256xf32> -> vector<16x256xf32>
    %518 = arith.addf %516, %517 : vector<16x256xf32>
    %cst_92 = arith.constant 5.000000e-01 : f32
    %519 = vector.broadcast %cst_92 : f32 to vector<16x256xf32>
    %520 = arith.mulf %519, %518 : vector<16x256xf32>
    %521 = math.tanh %520 : vector<16x256xf32>
    %cst_93 = arith.constant 5.000000e-01 : f32
    %522 = vector.broadcast %cst_93 : f32 to vector<16x256xf32>
    %523 = arith.mulf %522, %521 : vector<16x256xf32>
    %cst_94 = arith.constant 5.000000e-01 : f32
    %524 = vector.broadcast %cst_94 : f32 to vector<16x256xf32>
    %525 = arith.addf %523, %524 : vector<16x256xf32>
    %526 = math.tanh %518 : vector<16x256xf32>
    %527 = vector.extract_strided_slice %525 {offsets = [0, 0], sizes = [8, 32], strides = [1, 1]} : vector<16x256xf32> to vector<8x32xf32>
    %528 = vector.extract_strided_slice %525 {offsets = [8, 128], sizes = [8, 32], strides = [1, 1]} : vector<16x256xf32> to vector<8x32xf32>
    %529 = tpu.concatenate %527, %528 in 0 : vector<8x32xf32>, vector<8x32xf32> -> vector<16x32xf32>
    %530 = vector.extract_strided_slice %525 {offsets = [0, 32], sizes = [8, 32], strides = [1, 1]} : vector<16x256xf32> to vector<8x32xf32>
    %531 = vector.extract_strided_slice %525 {offsets = [8, 160], sizes = [8, 32], strides = [1, 1]} : vector<16x256xf32> to vector<8x32xf32>
    %532 = tpu.concatenate %530, %531 in 0 : vector<8x32xf32>, vector<8x32xf32> -> vector<16x32xf32>
    %533 = vector.extract_strided_slice %526 {offsets = [0, 64], sizes = [8, 32], strides = [1, 1]} : vector<16x256xf32> to vector<8x32xf32>
    %534 = vector.extract_strided_slice %526 {offsets = [8, 192], sizes = [8, 32], strides = [1, 1]} : vector<16x256xf32> to vector<8x32xf32>
    %535 = tpu.concatenate %533, %534 in 0 : vector<8x32xf32>, vector<8x32xf32> -> vector<16x32xf32>
    %536 = vector.extract_strided_slice %525 {offsets = [0, 96], sizes = [8, 32], strides = [1, 1]} : vector<16x256xf32> to vector<8x32xf32>
    %537 = vector.extract_strided_slice %525 {offsets = [8, 224], sizes = [8, 32], strides = [1, 1]} : vector<16x256xf32> to vector<8x32xf32>
    %538 = tpu.concatenate %536, %537 in 0 : vector<8x32xf32>, vector<8x32xf32> -> vector<16x32xf32>
    %539 = arith.mulf %532, %509 : vector<16x32xf32>
    %540 = arith.mulf %529, %535 : vector<16x32xf32>
    %541 = arith.addf %539, %540 : vector<16x32xf32>
    %542 = math.tanh %541 : vector<16x32xf32>
    %543 = arith.mulf %538, %542 : vector<16x32xf32>
    %544 = vector.extract_strided_slice %316 {offsets = [7, 0, 0], sizes = [1, 8, 256], strides = [1, 1, 1]} : vector<8x8x256xf32> to vector<1x8x256xf32>
    %545 = vector.shape_cast %544 : vector<1x8x256xf32> to vector<8x256xf32>
    %546 = vector.extract_strided_slice %316 {offsets = [0, 0, 0], sizes = [1, 8, 256], strides = [1, 1, 1]} : vector<8x8x256xf32> to vector<1x8x256xf32>
    %547 = vector.shape_cast %546 : vector<1x8x256xf32> to vector<8x256xf32>
    %548 = tpu.concatenate %545, %547 in 0 : vector<8x256xf32>, vector<8x256xf32> -> vector<16x256xf32>
    %cst_95 = arith.constant dense<0.000000e+00> : vector<16x256xf32>
    %549 = tpu.matmul %543, %317, %cst_95 {dimension_numbers = #tpu.dot_dimension_numbers<[1], [0], [0], [1], [0, 0, 1, 1], [], []>} : vector<16x32xf32>, vector<32x256xf32>, vector<16x256xf32> -> vector<16x256xf32>
    %550 = arith.addf %548, %549 : vector<16x256xf32>
    %cst_96 = arith.constant 5.000000e-01 : f32
    %551 = vector.broadcast %cst_96 : f32 to vector<16x256xf32>
    %552 = arith.mulf %551, %550 : vector<16x256xf32>
    %553 = math.tanh %552 : vector<16x256xf32>
    %cst_97 = arith.constant 5.000000e-01 : f32
    %554 = vector.broadcast %cst_97 : f32 to vector<16x256xf32>
    %555 = arith.mulf %554, %553 : vector<16x256xf32>
    %cst_98 = arith.constant 5.000000e-01 : f32
    %556 = vector.broadcast %cst_98 : f32 to vector<16x256xf32>
    %557 = arith.addf %555, %556 : vector<16x256xf32>
    %558 = math.tanh %550 : vector<16x256xf32>
    %559 = vector.extract_strided_slice %557 {offsets = [0, 0], sizes = [8, 32], strides = [1, 1]} : vector<16x256xf32> to vector<8x32xf32>
    %560 = vector.extract_strided_slice %557 {offsets = [8, 128], sizes = [8, 32], strides = [1, 1]} : vector<16x256xf32> to vector<8x32xf32>
    %561 = tpu.concatenate %559, %560 in 0 : vector<8x32xf32>, vector<8x32xf32> -> vector<16x32xf32>
    %562 = vector.extract_strided_slice %557 {offsets = [0, 32], sizes = [8, 32], strides = [1, 1]} : vector<16x256xf32> to vector<8x32xf32>
    %563 = vector.extract_strided_slice %557 {offsets = [8, 160], sizes = [8, 32], strides = [1, 1]} : vector<16x256xf32> to vector<8x32xf32>
    %564 = tpu.concatenate %562, %563 in 0 : vector<8x32xf32>, vector<8x32xf32> -> vector<16x32xf32>
    %565 = vector.extract_strided_slice %558 {offsets = [0, 64], sizes = [8, 32], strides = [1, 1]} : vector<16x256xf32> to vector<8x32xf32>
    %566 = vector.extract_strided_slice %558 {offsets = [8, 192], sizes = [8, 32], strides = [1, 1]} : vector<16x256xf32> to vector<8x32xf32>
    %567 = tpu.concatenate %565, %566 in 0 : vector<8x32xf32>, vector<8x32xf32> -> vector<16x32xf32>
    %568 = vector.extract_strided_slice %557 {offsets = [0, 96], sizes = [8, 32], strides = [1, 1]} : vector<16x256xf32> to vector<8x32xf32>
    %569 = vector.extract_strided_slice %557 {offsets = [8, 224], sizes = [8, 32], strides = [1, 1]} : vector<16x256xf32> to vector<8x32xf32>
    %570 = tpu.concatenate %568, %569 in 0 : vector<8x32xf32>, vector<8x32xf32> -> vector<16x32xf32>
    %571 = arith.mulf %564, %541 : vector<16x32xf32>
    %572 = arith.mulf %561, %567 : vector<16x32xf32>
    %573 = arith.addf %571, %572 : vector<16x32xf32>
    %574 = math.tanh %573 : vector<16x32xf32>
    %575 = arith.mulf %570, %574 : vector<16x32xf32>
    %576 = vector.extract_strided_slice %575 {offsets = [0, 0], sizes = [8, 32], strides = [1, 1]} : vector<16x32xf32> to vector<8x32xf32>
    %577 = vector.extract_strided_slice %575 {offsets = [8, 0], sizes = [8, 32], strides = [1, 1]} : vector<16x32xf32> to vector<8x32xf32>
    %c0_99 = arith.constant 0 : index
    %c0_100 = arith.constant 0 : index
    %578 = vector.load %arg12[%c0_99, %c0_100] : memref<64x32xf32, #tpu.memory_space<vmem>>, vector<64x32xf32>
    %cst_101 = arith.constant 5.000000e-01 : f32
    %579 = vector.broadcast %cst_101 : f32 to vector<8x32xf32>
    %580 = arith.mulf %579, %576 : vector<8x32xf32>
    %581 = math.tanh %580 : vector<8x32xf32>
    %cst_102 = arith.constant 5.000000e-01 : f32
    %582 = vector.broadcast %cst_102 : f32 to vector<8x32xf32>
    %583 = arith.mulf %582, %581 : vector<8x32xf32>
    %cst_103 = arith.constant 5.000000e-01 : f32
    %584 = vector.broadcast %cst_103 : f32 to vector<8x32xf32>
    %585 = arith.addf %583, %584 : vector<8x32xf32>
    %586 = arith.mulf %576, %585 : vector<8x32xf32>
    %587 = vector.extract_strided_slice %578 {offsets = [0, 0], sizes = [32, 32], strides = [1, 1]} : vector<64x32xf32> to vector<32x32xf32>
    %cst_104 = arith.constant dense<0.000000e+00> : vector<8x32xf32>
    %588 = tpu.matmul %586, %587, %cst_104 {dimension_numbers = #tpu.dot_dimension_numbers<[1], [0], [0], [1], [0, 0, 1, 1], [], []>} : vector<8x32xf32>, vector<32x32xf32>, vector<8x32xf32> -> vector<8x32xf32>
    %cst_105 = arith.constant 5.000000e-01 : f32
    %589 = vector.broadcast %cst_105 : f32 to vector<8x32xf32>
    %590 = arith.mulf %589, %577 : vector<8x32xf32>
    %591 = math.tanh %590 : vector<8x32xf32>
    %cst_106 = arith.constant 5.000000e-01 : f32
    %592 = vector.broadcast %cst_106 : f32 to vector<8x32xf32>
    %593 = arith.mulf %592, %591 : vector<8x32xf32>
    %cst_107 = arith.constant 5.000000e-01 : f32
    %594 = vector.broadcast %cst_107 : f32 to vector<8x32xf32>
    %595 = arith.addf %593, %594 : vector<8x32xf32>
    %596 = arith.mulf %577, %595 : vector<8x32xf32>
    %597 = vector.extract_strided_slice %578 {offsets = [32, 0], sizes = [32, 32], strides = [1, 1]} : vector<64x32xf32> to vector<32x32xf32>
    %cst_108 = arith.constant dense<0.000000e+00> : vector<8x32xf32>
    %598 = tpu.matmul %596, %597, %cst_108 {dimension_numbers = #tpu.dot_dimension_numbers<[1], [0], [0], [1], [0, 0, 1, 1], [], []>} : vector<8x32xf32>, vector<32x32xf32>, vector<8x32xf32> -> vector<8x32xf32>
    %599 = arith.addf %588, %598 : vector<8x32xf32>
    %c0_109 = arith.constant 0 : index
    %c0_110 = arith.constant 0 : index
    %600 = vector.load %arg13[%c0_109, %c0_110] : memref<1x32xf32, #tpu.memory_space<vmem>>, vector<1x32xf32>
    %601 = vector.broadcast %600 : vector<1x32xf32> to vector<8x32xf32>
    %602 = arith.addf %599, %601 : vector<8x32xf32>
    %c0_111 = arith.constant 0 : index
    %c0_112 = arith.constant 0 : index
    %603 = vector.load %arg14[%c0_111, %c0_112] : memref<16x32xf32, #tpu.memory_space<vmem>>, vector<16x32xf32>
    %cst_113 = arith.constant dense<0.000000e+00> : vector<8x32xf32>
    %604 = tpu.matmul %303, %603, %cst_113 {dimension_numbers = #tpu.dot_dimension_numbers<[1], [0], [0], [1], [0, 0, 1, 1], [], []>} : vector<8x16xf32>, vector<16x32xf32>, vector<8x32xf32> -> vector<8x32xf32>
    %c0_114 = arith.constant 0 : index
    %c0_115 = arith.constant 0 : index
    %605 = vector.load %arg15[%c0_114, %c0_115] : memref<1x32xf32, #tpu.memory_space<vmem>>, vector<1x32xf32>
    %606 = vector.broadcast %605 : vector<1x32xf32> to vector<8x32xf32>
    %607 = arith.addf %604, %606 : vector<8x32xf32>
    %608 = arith.addf %602, %607 : vector<8x32xf32>
    %609 = vector.extract_strided_slice %608 {offsets = [0, 0], sizes = [8, 16], strides = [1, 1]} : vector<8x32xf32> to vector<8x16xf32>
    %610 = vector.extract_strided_slice %608 {offsets = [0, 16], sizes = [8, 16], strides = [1, 1]} : vector<8x32xf32> to vector<8x16xf32>
    %c0_116 = arith.constant 0 : index
    %c0_117 = arith.constant 0 : index
    %611 = vector.load %arg2[%c0_116, %c0_117] : memref<8x16xf32, #tpu.memory_space<vmem>>, vector<8x16xf32>
    %cst_118 = arith.constant 5.000000e-01 : f32
    %612 = vector.broadcast %cst_118 : f32 to vector<8x16xf32>
    %613 = arith.mulf %612, %610 : vector<8x16xf32>
    %614 = math.exp %613 : vector<8x16xf32>
    %615 = arith.mulf %611, %614 : vector<8x16xf32>
    %616 = arith.addf %609, %615 : vector<8x16xf32>
    %c0_119 = arith.constant 0 : index
    %c0_120 = arith.constant 0 : index
    %617 = vector.load %arg16[%c0_119, %c0_120] : memref<16x256xf32, #tpu.memory_space<vmem>>, vector<16x256xf32>
    %cst_121 = arith.constant dense<0.000000e+00> : vector<8x256xf32>
    %618 = tpu.matmul %616, %617, %cst_121 {dimension_numbers = #tpu.dot_dimension_numbers<[1], [0], [0], [1], [0, 0, 1, 1], [], []>} : vector<8x16xf32>, vector<16x256xf32>, vector<8x256xf32> -> vector<8x256xf32>
    %c0_122 = arith.constant 0 : index
    %c0_123 = arith.constant 0 : index
    %619 = vector.load %arg18[%c0_122, %c0_123] : memref<1x256xf32, #tpu.memory_space<vmem>>, vector<1x256xf32>
    %620 = vector.broadcast %619 : vector<1x256xf32> to vector<8x256xf32>
    %621 = arith.addf %618, %620 : vector<8x256xf32>
    %622 = vector.shape_cast %621 : vector<8x256xf32> to vector<1x8x256xf32>
    %c0_124 = arith.constant 0 : index
    %c0_125 = arith.constant 0 : index
    %623 = vector.load %arg17[%c0_124, %c0_125] : memref<32x256xf32, #tpu.memory_space<vmem>>, vector<32x256xf32>
    %cst_126 = arith.constant 0.000000e+00 : f32
    %624 = vector.broadcast %cst_126 : f32 to vector<16x32xf32>
    %cst_127 = arith.constant 0.000000e+00 : f32
    %625 = vector.broadcast %cst_127 : f32 to vector<16x32xf32>
    %626 = vector.shape_cast %622 : vector<1x8x256xf32> to vector<8x256xf32>
    %627 = vector.shape_cast %622 : vector<1x8x256xf32> to vector<8x256xf32>
    %628 = tpu.concatenate %626, %627 in 0 : vector<8x256xf32>, vector<8x256xf32> -> vector<16x256xf32>
    %cst_128 = arith.constant dense<0.000000e+00> : vector<16x256xf32>
    %629 = tpu.matmul %624, %623, %cst_128 {dimension_numbers = #tpu.dot_dimension_numbers<[1], [0], [0], [1], [0, 0, 1, 1], [], []>} : vector<16x32xf32>, vector<32x256xf32>, vector<16x256xf32> -> vector<16x256xf32>
    %630 = arith.addf %628, %629 : vector<16x256xf32>
    %cst_129 = arith.constant 5.000000e-01 : f32
    %631 = vector.broadcast %cst_129 : f32 to vector<16x256xf32>
    %632 = arith.mulf %631, %630 : vector<16x256xf32>
    %633 = math.tanh %632 : vector<16x256xf32>
    %cst_130 = arith.constant 5.000000e-01 : f32
    %634 = vector.broadcast %cst_130 : f32 to vector<16x256xf32>
    %635 = arith.mulf %634, %633 : vector<16x256xf32>
    %cst_131 = arith.constant 5.000000e-01 : f32
    %636 = vector.broadcast %cst_131 : f32 to vector<16x256xf32>
    %637 = arith.addf %635, %636 : vector<16x256xf32>
    %638 = math.tanh %630 : vector<16x256xf32>
    %639 = vector.extract_strided_slice %637 {offsets = [0, 0], sizes = [8, 32], strides = [1, 1]} : vector<16x256xf32> to vector<8x32xf32>
    %640 = vector.extract_strided_slice %637 {offsets = [8, 128], sizes = [8, 32], strides = [1, 1]} : vector<16x256xf32> to vector<8x32xf32>
    %641 = tpu.concatenate %639, %640 in 0 : vector<8x32xf32>, vector<8x32xf32> -> vector<16x32xf32>
    %642 = vector.extract_strided_slice %637 {offsets = [0, 32], sizes = [8, 32], strides = [1, 1]} : vector<16x256xf32> to vector<8x32xf32>
    %643 = vector.extract_strided_slice %637 {offsets = [8, 160], sizes = [8, 32], strides = [1, 1]} : vector<16x256xf32> to vector<8x32xf32>
    %644 = tpu.concatenate %642, %643 in 0 : vector<8x32xf32>, vector<8x32xf32> -> vector<16x32xf32>
    %645 = vector.extract_strided_slice %638 {offsets = [0, 64], sizes = [8, 32], strides = [1, 1]} : vector<16x256xf32> to vector<8x32xf32>
    %646 = vector.extract_strided_slice %638 {offsets = [8, 192], sizes = [8, 32], strides = [1, 1]} : vector<16x256xf32> to vector<8x32xf32>
    %647 = tpu.concatenate %645, %646 in 0 : vector<8x32xf32>, vector<8x32xf32> -> vector<16x32xf32>
    %648 = vector.extract_strided_slice %637 {offsets = [0, 96], sizes = [8, 32], strides = [1, 1]} : vector<16x256xf32> to vector<8x32xf32>
    %649 = vector.extract_strided_slice %637 {offsets = [8, 224], sizes = [8, 32], strides = [1, 1]} : vector<16x256xf32> to vector<8x32xf32>
    %650 = tpu.concatenate %648, %649 in 0 : vector<8x32xf32>, vector<8x32xf32> -> vector<16x32xf32>
    %651 = arith.mulf %644, %625 : vector<16x32xf32>
    %652 = arith.mulf %641, %647 : vector<16x32xf32>
    %653 = arith.addf %651, %652 : vector<16x32xf32>
    %654 = math.tanh %653 : vector<16x32xf32>
    %655 = arith.mulf %650, %654 : vector<16x32xf32>
    %656 = vector.extract_strided_slice %655 {offsets = [0, 0], sizes = [8, 32], strides = [1, 1]} : vector<16x32xf32> to vector<8x32xf32>
    %657 = vector.extract_strided_slice %655 {offsets = [8, 0], sizes = [8, 32], strides = [1, 1]} : vector<16x32xf32> to vector<8x32xf32>
    %c0_132 = arith.constant 0 : index
    %c0_133 = arith.constant 0 : index
    %658 = vector.load %arg19[%c0_132, %c0_133] : memref<64x1xf32, #tpu.memory_space<vmem>>, vector<64x1xf32>
    %c0_134 = arith.constant 0 : index
    %c0_135 = arith.constant 0 : index
    %659 = vector.load %arg20[%c0_134, %c0_135] : memref<1x1xf32, #tpu.memory_space<vmem>>, vector<1x1xf32>
    %cst_136 = arith.constant 5.000000e-01 : f32
    %660 = vector.broadcast %cst_136 : f32 to vector<8x32xf32>
    %661 = arith.mulf %660, %656 : vector<8x32xf32>
    %662 = math.tanh %661 : vector<8x32xf32>
    %cst_137 = arith.constant 5.000000e-01 : f32
    %663 = vector.broadcast %cst_137 : f32 to vector<8x32xf32>
    %664 = arith.mulf %663, %662 : vector<8x32xf32>
    %cst_138 = arith.constant 5.000000e-01 : f32
    %665 = vector.broadcast %cst_138 : f32 to vector<8x32xf32>
    %666 = arith.addf %664, %665 : vector<8x32xf32>
    %667 = arith.mulf %656, %666 : vector<8x32xf32>
    %668 = vector.extract_strided_slice %658 {offsets = [0, 0], sizes = [32, 1], strides = [1, 1]} : vector<64x1xf32> to vector<32x1xf32>
    %cst_139 = arith.constant dense<0.000000e+00> : vector<8x1xf32>
    %669 = tpu.matmul %667, %668, %cst_139 {dimension_numbers = #tpu.dot_dimension_numbers<[1], [0], [0], [1], [0, 0, 1, 1], [], []>} : vector<8x32xf32>, vector<32x1xf32>, vector<8x1xf32> -> vector<8x1xf32>
    %cst_140 = arith.constant 5.000000e-01 : f32
    %670 = vector.broadcast %cst_140 : f32 to vector<8x32xf32>
    %671 = arith.mulf %670, %657 : vector<8x32xf32>
    %672 = math.tanh %671 : vector<8x32xf32>
    %cst_141 = arith.constant 5.000000e-01 : f32
    %673 = vector.broadcast %cst_141 : f32 to vector<8x32xf32>
    %674 = arith.mulf %673, %672 : vector<8x32xf32>
    %cst_142 = arith.constant 5.000000e-01 : f32
    %675 = vector.broadcast %cst_142 : f32 to vector<8x32xf32>
    %676 = arith.addf %674, %675 : vector<8x32xf32>
    %677 = arith.mulf %657, %676 : vector<8x32xf32>
    %678 = vector.extract_strided_slice %658 {offsets = [32, 0], sizes = [32, 1], strides = [1, 1]} : vector<64x1xf32> to vector<32x1xf32>
    %cst_143 = arith.constant dense<0.000000e+00> : vector<8x1xf32>
    %679 = tpu.matmul %677, %678, %cst_143 {dimension_numbers = #tpu.dot_dimension_numbers<[1], [0], [0], [1], [0, 0, 1, 1], [], []>} : vector<8x32xf32>, vector<32x1xf32>, vector<8x1xf32> -> vector<8x1xf32>
    %680 = arith.addf %669, %679 : vector<8x1xf32>
    %681 = vector.broadcast %659 : vector<1x1xf32> to vector<8x1xf32>
    %682 = arith.addf %680, %681 : vector<8x1xf32>
    %cst_144 = arith.constant 0.000000e+00 : f32
    %683 = vector.broadcast %cst_144 : f32 to vector<8x63xf32>
    %684 = tpu.concatenate %296, %297, %609, %610, %682, %683 in 1 : vector<8x16xf32>, vector<8x16xf32>, vector<8x16xf32>, vector<8x16xf32>, vector<8x1xf32>, vector<8x63xf32> -> vector<8x128xf32>
    %c0_145 = arith.constant 0 : index
    %c0_146 = arith.constant 0 : index
    %685 = vector.load %arg21[%c0_145, %c0_146] : memref<8x128xf32, #tpu.memory_space<vmem>>, vector<8x128xf32>
    tpu.vector_store %arg21[%c0_145, %c0_146], %684 {strides = array<i32>} : memref<8x128xf32, #tpu.memory_space<vmem>>, vector<8x128xf32>,
    return
  }
}

</mosaic_0001>

<bundles_post_ra>
// kernel: time_hvae_forward.1
= control target key start
LH: loop header
LB: loop body
LE: loop exit
PB: predicated region body
PF: predicated region fallthrough
CT: control target
= control target key end

     0   :  { %v3837_v3 = vmov 0.0   ;;  %v3838_v4 = vmov 0   ;;  %v120_v16 = vlaneseq  ;;  %s3840_s24 = smov 32   ;;  %vm182_vm0 = vcmask 261120   ;;  %s4695_s4 = inlined_call_operand.vmem [shape: f32[32,256], index: 4, kind: input, shape index: {}]   ;;  %s4696_s0 = inlined_call_operand.vmem [shape: f32[8,8,1], index: 0, kind: input, shape index: {}]   ;;  %s4697_s3 = inlined_call_operand.vmem [shape: f32[1,256], index: 3, kind: input, shape index: {}]   ;;  %s4698_s5 = inlined_call_operand.vmem [shape: f32[1,256], index: 5, kind: input, shape index: {}]   ;;  %s4699_s6 = inlined_call_operand.vmem [shape: f32[64,32], index: 6, kind: input, shape index: {}]   ;;  %s4700_s10 = inlined_call_operand.vmem [shape: f32[32,256], index: 10, kind: input, shape index: {}]   ;;  %s4701_s9 = inlined_call_operand.vmem [shape: f32[16,256], index: 9, kind: input, shape index: {}]   ;;  %s4702_s7 = inlined_call_operand.vmem [shape: f32[1,32], index: 7, kind: input, shape index: {}]   ;;  %s4703_s1 = inlined_call_operand.vmem [shape: f32[8,16], index: 1, kind: input, shape index: {}]   ;;  %s4704_s11 = inlined_call_operand.vmem [shape: f32[1,256], index: 11, kind: input, shape index: {}]   ;;  %s4705_s8 = inlined_call_operand.vmem [shape: f32[1,256], index: 8, kind: input, shape index: {}]   ;;  %s4706_s12 = inlined_call_operand.vmem [shape: f32[64,32], index: 12, kind: input, shape index: {}]   ;;  %s4707_s14 = inlined_call_operand.vmem [shape: f32[16,32], index: 14, kind: input, shape index: {}]   ;;  %s4708_s16 = inlined_call_operand.vmem [shape: f32[16,256], index: 16, kind: input, shape index: {}]   ;;  %s4709_s13 = inlined_call_operand.vmem [shape: f32[1,32], index: 13, kind: input, shape index: {}]   ;;  %s4710_s15 = inlined_call_operand.vmem [shape: f32[1,32], index: 15, kind: input, shape index: {}]   ;;  %s4711_s17 = inlined_call_operand.vmem [shape: f32[32,256], index: 17, kind: input, shape index: {}]   ;;  %s4712_s2 = inlined_call_operand.vmem [shape: f32[8,16], index: 2, kind: input, shape index: {}]   ;;  %s4713_s18 = inlined_call_operand.vmem [shape: f32[1,256], index: 18, kind: input, shape index: {}]   ;;  %s4714_s19 = inlined_call_operand.vmem [shape: f32[64,1], index: 19, kind: input, shape index: {}]   ;;  %s4715_s20 = inlined_call_operand.<no memory space> [shape: f32[1,1], index: 20, kind: input, shape index: {}]   ;;  %s4716_s21 = inlined_call_operand.vmem [shape: f32[8,128], index: 21, kind: output, shape index: {}]  }
   0x1   :  { %4721 = sst [smem:[#allocation3_spill]] %s4695_s4  ;;  %250 = vmatprep.mubr.f32.mxu0 %v3837_v3  ;;  %3615 = vset.pattern.permute.xlu0 %v3838_v4  ;;  %vm3842_vm1 = vmmov 0   ;;  %vm1426_vm2 = vcmask 130048   ;;  %vm3261_vm3 = vcmask 392192   ;;  %vm3263_vm4 = vcmask 523264  }
   0x2   :  { %4722 = sst [smem:[#allocation4_spill]] %s4696_s0  ;;  %s4727_s26 = sld [smem:[#allocation3_spill]]  ;;  %381 = vmatprep.mubr.f32.mxu1 %v3837_v3  ;;  %3616 = vset.pattern.permute.xlu1 %v3838_v4  ;;  %v121_v17 = vshrl.u32 %v120_v16, 7  ;;  %vm3265_vm5 = vcmask 531456  }
   0x3   :  { %4723 = sst [smem:[#allocation5_spill]] %s4697_s3  ;;  %s4728_s28 = sld [smem:[#allocation4_spill]] }
   0x4   :  { %4724 = sst [smem:[#allocation6_spill]] %s4698_s5  ;;  %v4012_v18 = vsub.s32 0, %v121_v17  ;;  %s4729_s30 = sld [smem:[#allocation5_spill]]  ;;  %v4025_v23 = vsub.s32 1, %v121_v17 }
   0x5   :  { %4725 = sst [smem:[#allocation7_spill]] %s4699_s6  ;;  %s4730_s23 = sld [smem:[#allocation6_spill]] }
   0x6   :  { %4726 = sst [smem:[#allocation8_spill]] %s4700_s10  ;;  %s3839_s0 = smov 64  }
   0x7   :  { %s4731_s25 = sld [smem:[#allocation7_spill]]  ;;  %s4732_s4 = sld [smem:[#allocation8_spill]] }
   0x8   :  { %v175_v0 = vld [vmem:[%s4727_s26 + $0x8] sm:$0xff]  ;;  %v177_v1 = vld [vmem:[%s4727_s26 + $0x18] sm:$0xff]  ;;  %v174_v2 = vld [vmem:[%s4727_s26] sm:$0xff] }
   0x9   :  { %v3964_v5 = vpack.c.bf16 %v177_v1, %v175_v0  ;;  %v176_v6 = vld [vmem:[%s4727_s26 + $0x10] sm:$0xff]  ;;  %v179_v7 = vld [vmem:[%s4727_s26 + $0x28] sm:$0xff]  ;;  %v181_v8 = vld [vmem:[%s4727_s26 + $0x38] sm:$0xff] }
   0xa   :  { %v3976_v9 = vpack.c.bf16 %v176_v6, %v174_v2  ;;  %v3978_v10 = vpack.c.bf16 %v181_v8, %v179_v7  ;;  %v178_v11 = vld [vmem:[%s4727_s26 + $0x20] sm:$0xff]  ;;  %v180_v12 = vld [vmem:[%s4727_s26 + $0x30] sm:$0xff]  ;;  %v77_v15 = vld [vmem:[%s4728_s28 + $0x38] sm:$0xff] }
   0xb   :  { %v70_v13 = vld [vmem:[%s4728_s28] sm:$0xff]  ;;  %3420 = vmatprep.subr.bf16.mxu0 %v3964_v5  ;;  %v3991_v14 = vpack.c.bf16 %v180_v12, %v178_v11  ;;  %3428 = vmatprep.subr.bf16.mxu1 %v3964_v5  ;;  %v71_v62 = vld [vmem:[%s4728_s28 + $0x8] sm:$0xff]  ;;  %v76_v1 = vld [vmem:[%s4728_s28 + $0x30] sm:$0xff] }
   0xc   :  { %81 = vperm.xlu0 %3615, %v70_v13   ;;  %3422 = vmatpush1.bf16.msra.mxu0 %v3976_v9  ;;  %v78_v19 = vld [vmem:[%s4729_s30] sm:$0x3] }
   0xd   :  { %3424 = vmatprep.subr.bf16.mxu0 %v3978_v10  ;;  %3430 = vmatpush1.bf16.msra.mxu1 %v3976_v9  ;;  %v4018_v20 = vrot.slane %v78_v19, %v4012_v18  ;;  %v146_v21 = vld [vmem:[%s4730_s23] sm:$0x3]  ;;  %v4033_v26 = vrot.slane %v78_v19, %v4025_v23 }
   0xe   :  { %3432 = vmatprep.subr.bf16.mxu1 %v3978_v10  ;;  %v4030_v25 = vrot.slane %v146_v21, %v4012_v18  ;;  %v4041_v31 = vrot.slane %v146_v21, %v4025_v23 }
  0x10   :  { %116 = vperm.xlu0 %3615, %v77_v15   ;;  %3426 = vmatpush1.bf16.msra.mxu0 %v3991_v14 }
  0x11   :  { %3434 = vmatpush1.bf16.msra.mxu1 %v3991_v14  ;;  %3436 = vmatprep.subr.bf16.mxu0 %v3964_v5 }
  0x12   :  { %3444 = vmatprep.subr.bf16.mxu1 %v3964_v5 }
  0x13   :  { %251 = vmatmul.mubr.f32.vlgmr.msra.gmra.mrb[0].mxu0 %v3837_v3 }
  0x14   :  { %255 = vmatprep.mubr.f32.mxu0 %v3837_v3  ;;  %3438 = vmatpush1.bf16.msra.mxu0 %v3976_v9 }
  0x15   :  { %3440 = vmatprep.subr.bf16.mxu0 %v3978_v10 }
  0x17   :  { %256 = vmatmul.mubr.f32.gmra.mrb[2].mxu0 %v3837_v3 }
  0x18   :  { %3442 = vmatpush1.bf16.msra.mxu0 %v3991_v14  ;;  %512 = vmatprep.mubr.f32.mxu0 %v3837_v3 }
  0x19   :  { %3452 = vmatprep.subr.bf16.mxu0 %v3964_v5 }
  0x8b   :  { %v4023_v22 = vpop.permute.xlu0 %81 }
  0x8c   :  { %v130_v24 = vmul.f32 %v4018_v20, %v4023_v22 }
  0x8e   :  { %v158_v28 = vadd.f32 %v4030_v25, %v130_v24 }
  0x8f   :  { %v4035_v27 = vpop.permute.xlu0 %116 }
  0x90   :  { %v145_v30 = vmul.f32 %v4033_v26, %v4035_v27 }
  0x92   :  { %v173_v35 = vadd.f32 %v4041_v31, %v145_v30 }
  0xe6   :  { %v252_v29 = vpop.f32.mrb[0].mxu0 }
  0xe7   :  { %v261_v32 = vadd.f32 %v252_v29, %v158_v28  ;;  %v254_v33 = vpop.f32.mrb[1].mxu0 }
  0xe9   :  { %3617 = vtanh.f32 %v261_v32  ;;  %v263_v40 = vmul.f32 0.5, %v261_v32 }
  0xea   :  { %v257_v34 = vpop.f32.mrb[2].mxu0 }
  0xeb   :  { %v258_v36 = vpop.f32.mrb[3].mxu0 }
  0xec   :  { %v262_v37 = vadd.f32 %v258_v36, %v173_v35 }
  0xee   :  { %3619 = vtanh.f32 %v262_v37  ;;  %v264_v41 = vmul.f32 0.5, %v262_v37 }
  0xef   :  { %3621 = vtanh.f32 %v263_v40 }
  0xf0   :  { %3623 = vtanh.f32 %v264_v41 }
  0xf3   :  { %v3618_v38 = vpop.eup %3617 }
  0xf4   :  { %277 = vrot.lane.b32.xlu1 %v3618_v38, %s3839_s0 }
  0xf8   :  { %v3620_v39 = vpop.eup %3619 }
  0xf9   :  { %279 = vrot.lane.b32.xlu1 %v3620_v39, %s3839_s0  ;;  %v3622_v42 = vpop.eup %3621 }
  0xfa   :  { %v267_v43 = vmul.f32 0.5, %v3622_v42  ;;  %v3624_v44 = vpop.eup %3623 }
  0xfb   :  { %v268_v46 = vmul.f32 0.5, %v3624_v44 }
  0xfc   :  { %v269_v45 = vadd.f32 0.5, %v267_v43 }
  0xfd   :  { %v270_v49 = vadd.f32 0.5, %v268_v46 }
  0xfe   :  { %v273_v52 = vmul.f32 0.0, %v269_v45 }
  0xff   :  { %v274_v55 = vmul.f32 0.0, %v270_v49 }
 0x166   :  { %v278_v47 = vpop.permute.xlu1 %277 }
 0x167   :  { %v283_v48 = vmul.f32 %v278_v47, %v269_v45 }
 0x169   :  { %287 = vrot.lane.b32.xlu0 %v283_v48, %s3840_s24 }
 0x16b   :  { %v280_v50 = vpop.permute.xlu1 %279 }
 0x16c   :  { %v284_v51 = vmul.f32 %v280_v50, %v270_v49 }
 0x16e   :  { %289 = vrot.lane.b32.xlu1 %v284_v51, %s3840_s24 }
 0x1db   :  { %v288_v53 = vpop.permute.xlu0 %287 }
 0x1dc   :  { %v4048_v54 = vadd.f32 %v288_v53, %v273_v52  ;;  %v72_v53 = vld [vmem:[%s4728_s28 + $0x10] sm:$0xff] }
 0x1de   :  { %3625 = vtanh.f32 %v4048_v54 }
 0x1e0   :  { %v290_v56 = vpop.permute.xlu1 %289 }
 0x1e1   :  { %v4051_v57 = vadd.f32 %v290_v56, %v274_v55  ;;  %v75_v56 = vld [vmem:[%s4728_s28 + $0x28] sm:$0xff] }
 0x1e3   :  { %3627 = vtanh.f32 %v4051_v57 }
 0x1e8   :  { %v3626_v58 = vpop.eup %3625 }
 0x1e9   :  { %299 = vrot.lane.b32.xlu0 %v3626_v58, %s3839_s0 }
 0x1ed   :  { %v3628_v59 = vpop.eup %3627 }
 0x1ee   :  { %301 = vrot.lane.b32.xlu1 %v3628_v59, %s3839_s0 }
 0x25b   :  { %v300_v60 = vpop.permute.xlu0 %299 }
 0x25c   :  { %v305_v61 = vmul.f32 %v300_v60, %v269_v45 }
 0x25e   :  { %309 = vrot.lane.b32.xlu0 %v305_v61, %s3840_s24 }
 0x260   :  { %v302_v63 = vpop.permute.xlu1 %301 }
 0x261   :  { %v306_v0 = vmul.f32 %v302_v63, %v270_v49 }
 0x262   :  { %86 = vperm.xlu0 %3615, %v71_v62  }
 0x263   :  { %311 = vrot.lane.b32.xlu1 %v306_v0, %s3840_s24 }
 0x267   :  { %111 = vperm.xlu1 %3616, %v76_v1  }
 0x2d0   :  { %v310_v2 = vpop.permute.xlu0 %309 }
 0x2d1   :  { %3272 = vmatmul.mubr.msk.f32.vlgmr.msra.gmra.mrb[0].mxu1 %vm182_vm0, %v310_v2 }
 0x2d2   :  { %386 = vmatprep.mubr.f32.mxu1 %v3837_v3  ;;  %3446 = vmatpush1.bf16.msra.mxu1 %v3976_v9 }
 0x2d3   :  { %3448 = vmatprep.subr.bf16.mxu1 %v3978_v10 }
 0x2d5   :  { %v312_v4 = vpop.permute.xlu1 %311 }
 0x2d6   :  { %3273 = vmatmul.mubr.msk.f32.gmra.mrb[2].mxu1 %vm182_vm0, %v312_v4 }
 0x2d7   :  { %3450 = vmatpush1.bf16.msra.mxu1 %v3991_v14  ;;  %643 = vmatprep.mubr.f32.mxu1 %v3837_v3 }
 0x2d8   :  { %3460 = vmatprep.subr.bf16.mxu1 %v3964_v5 }
 0x2e1   :  { %v4072_v6 = vpop.permute.xlu0 %86 }
 0x2e2   :  { %v132_v7 = vmul.f32 %v4018_v20, %v4072_v6 }
 0x2e4   :  { %v160_v11 = vadd.f32 %v4030_v25, %v132_v7 }
 0x2e6   :  { %v4076_v8 = vpop.permute.xlu1 %111 }
 0x2e7   :  { %v143_v12 = vmul.f32 %v4033_v26, %v4076_v8 }
 0x2e9   :  { %v171_v17 = vadd.f32 %v4041_v31, %v143_v12 }
 0x3a4   :  { %v383_v13 = vpop.f32.mrb[0].mxu1 }
 0x3a5   :  { %v392_v15 = vadd.f32 %v383_v13, %v160_v11  ;;  %v385_v16 = vpop.f32.mrb[1].mxu1 }
 0x3a7   :  { %3629 = vtanh.f32 %v392_v15  ;;  %v394_v30 = vmul.f32 0.5, %v392_v15 }
 0x3a9   :  { %v388_v19 = vpop.f32.mrb[2].mxu1 }
 0x3aa   :  { %v389_v21 = vpop.f32.mrb[3].mxu1 }
 0x3ab   :  { %v393_v24 = vadd.f32 %v389_v21, %v171_v17 }
 0x3ad   :  { %3631 = vtanh.f32 %v393_v24  ;;  %v395_v32 = vmul.f32 0.5, %v393_v24 }
 0x3ae   :  { %3633 = vtanh.f32 %v394_v30 }
 0x3af   :  { %3635 = vtanh.f32 %v395_v32 }
 0x3b1   :  { %v3630_v28 = vpop.eup %3629 }
 0x3b2   :  { %408 = vrot.lane.b32.xlu0 %v3630_v28, %s3839_s0 }
 0x3b7   :  { %v3632_v29 = vpop.eup %3631 }
 0x3b8   :  { %410 = vrot.lane.b32.xlu1 %v3632_v29, %s3839_s0  ;;  %v3634_v33 = vpop.eup %3633 }
 0x3b9   :  { %v398_v34 = vmul.f32 0.5, %v3634_v33  ;;  %v3636_v35 = vpop.eup %3635 }
 0x3ba   :  { %v399_v38 = vmul.f32 0.5, %v3636_v35 }
 0x3bb   :  { %v400_v36 = vadd.f32 0.5, %v398_v34 }
 0x3bc   :  { %v401_v40 = vadd.f32 0.5, %v399_v38 }
 0x3bd   :  { %v404_v43 = vmul.f32 %v400_v36, %v4048_v54 }
 0x3be   :  { %v405_v46 = vmul.f32 %v401_v40, %v4051_v57 }
 0x424   :  { %v409_v37 = vpop.permute.xlu0 %408 }
 0x425   :  { %v414_v39 = vmul.f32 %v409_v37, %v400_v36 }
 0x427   :  { %418 = vrot.lane.b32.xlu0 %v414_v39, %s3840_s24 }
 0x42a   :  { %v411_v41 = vpop.permute.xlu1 %410 }
 0x42b   :  { %v415_v42 = vmul.f32 %v411_v41, %v401_v40 }
 0x42d   :  { %420 = vrot.lane.b32.xlu1 %v415_v42, %s3840_s24 }
 0x499   :  { %v419_v44 = vpop.permute.xlu0 %418 }
 0x49a   :  { %v4087_v45 = vadd.f32 %v419_v44, %v404_v43 }
 0x49c   :  { %3637 = vtanh.f32 %v4087_v45 }
 0x49f   :  { %v421_v47 = vpop.permute.xlu1 %420 }
 0x4a0   :  { %v4091_v48 = vadd.f32 %v421_v47, %v405_v46  ;;  %v73_v46 = vld [vmem:[%s4728_s28 + $0x18] sm:$0xff] }
 0x4a2   :  { %3639 = vtanh.f32 %v4091_v48 }
 0x4a6   :  { %v3638_v49 = vpop.eup %3637 }
 0x4a7   :  { %430 = vrot.lane.b32.xlu0 %v3638_v49, %s3839_s0  ;;  %v74_v49 = vld [vmem:[%s4728_s28 + $0x20] sm:$0xff] }
 0x4ac   :  { %v3640_v50 = vpop.eup %3639 }
 0x4ad   :  { %432 = vrot.lane.b32.xlu1 %v3640_v50, %s3839_s0 }
 0x519   :  { %v431_v51 = vpop.permute.xlu0 %430 }
 0x51a   :  { %v436_v52 = vmul.f32 %v431_v51, %v400_v36 }
 0x51c   :  { %440 = vrot.lane.b32.xlu0 %v436_v52, %s3840_s24 }
 0x51f   :  { %v433_v54 = vpop.permute.xlu1 %432 }
 0x520   :  { %v437_v55 = vmul.f32 %v433_v54, %v401_v40  ;;  %91 = vperm.xlu0 %3615, %v72_v53  }
 0x522   :  { %442 = vrot.lane.b32.xlu1 %v437_v55, %s3840_s24 }
 0x526   :  { %106 = vperm.xlu1 %3616, %v75_v56  }
 0x58e   :  { %v441_v57 = vpop.permute.xlu0 %440 }
 0x58f   :  { %3274 = vmatmul.mubr.msk.f32.vlgmr.msra.gmra.mrb[4].mxu0 %vm182_vm0, %v441_v57 }
 0x590   :  { %517 = vmatprep.mubr.f32.mxu0 %v3837_v3  ;;  %3454 = vmatpush1.bf16.msra.mxu0 %v3976_v9 }
 0x591   :  { %3456 = vmatprep.subr.bf16.mxu0 %v3978_v10 }
 0x594   :  { %v443_v58 = vpop.permute.xlu1 %442  ;;  %3458 = vmatpush1.bf16.msra.mxu0 %v3991_v14 }
 0x595   :  { %3275 = vmatmul.mubr.msk.f32.gmra.mrb[6].mxu0 %vm182_vm0, %v443_v58  ;;  %3468 = vmatprep.subr.bf16.mxu0 %v3964_v5 }
 0x596   :  { %774 = vmatprep.mubr.f32.mxu0 %v3837_v3 }
 0x59f   :  { %v4112_v59 = vpop.permute.xlu0 %91 }
 0x5a0   :  { %v134_v60 = vmul.f32 %v4018_v20, %v4112_v59 }
 0x5a2   :  { %v162_v62 = vadd.f32 %v4030_v25, %v134_v60 }
 0x5a5   :  { %v4116_v61 = vpop.permute.xlu1 %106 }
 0x5a6   :  { %v141_v2 = vmul.f32 %v4033_v26, %v4116_v61 }
 0x5a8   :  { %v169_v7 = vadd.f32 %v4041_v31, %v141_v2 }
 0x662   :  { %v514_v63 = vpop.f32.mrb[4].mxu0 }
 0x663   :  { %v523_v0 = vadd.f32 %v514_v63, %v162_v62  ;;  %v516_v1 = vpop.f32.mrb[5].mxu0 }
 0x665   :  { %3641 = vtanh.f32 %v523_v0  ;;  %v525_v16 = vmul.f32 0.5, %v523_v0 }
 0x668   :  { %v519_v4 = vpop.f32.mrb[6].mxu0 }
 0x669   :  { %v520_v11 = vpop.f32.mrb[7].mxu0 }
 0x66a   :  { %v524_v12 = vadd.f32 %v520_v11, %v169_v7 }
 0x66c   :  { %3643 = vtanh.f32 %v524_v12  ;;  %v526_v17 = vmul.f32 0.5, %v524_v12 }
 0x66d   :  { %3645 = vtanh.f32 %v525_v16 }
 0x66e   :  { %3647 = vtanh.f32 %v526_v17 }
 0x66f   :  { %v3642_v13 = vpop.eup %3641 }
 0x670   :  { %539 = vrot.lane.b32.xlu0 %v3642_v13, %s3839_s0 }
 0x676   :  { %v3644_v15 = vpop.eup %3643 }
 0x677   :  { %541 = vrot.lane.b32.xlu1 %v3644_v15, %s3839_s0  ;;  %v3646_v19 = vpop.eup %3645 }
 0x678   :  { %v529_v21 = vmul.f32 0.5, %v3646_v19  ;;  %v3648_v24 = vpop.eup %3647 }
 0x679   :  { %v530_v32 = vmul.f32 0.5, %v3648_v24 }
 0x67a   :  { %v531_v28 = vadd.f32 0.5, %v529_v21 }
 0x67b   :  { %v532_v33 = vadd.f32 0.5, %v530_v32 }
 0x67c   :  { %v535_v36 = vmul.f32 %v531_v28, %v4087_v45 }
 0x67d   :  { %v536_v39 = vmul.f32 %v532_v33, %v4091_v48 }
 0x6e2   :  { %v540_v29 = vpop.permute.xlu0 %539 }
 0x6e3   :  { %v545_v30 = vmul.f32 %v540_v29, %v531_v28 }
 0x6e5   :  { %549 = vrot.lane.b32.xlu0 %v545_v30, %s3840_s24 }
 0x6e9   :  { %v542_v34 = vpop.permute.xlu1 %541 }
 0x6ea   :  { %v546_v35 = vmul.f32 %v542_v34, %v532_v33 }
 0x6ec   :  { %551 = vrot.lane.b32.xlu1 %v546_v35, %s3840_s24 }
 0x757   :  { %v550_v37 = vpop.permute.xlu0 %549 }
 0x758   :  { %v4127_v38 = vadd.f32 %v550_v37, %v535_v36 }
 0x75a   :  { %3649 = vtanh.f32 %v4127_v38 }
 0x75e   :  { %v552_v40 = vpop.permute.xlu1 %551 }
 0x75f   :  { %v4131_v41 = vadd.f32 %v552_v40, %v536_v39 }
 0x761   :  { %3651 = vtanh.f32 %v4131_v41 }
 0x764   :  { %v3650_v42 = vpop.eup %3649 }
 0x765   :  { %561 = vrot.lane.b32.xlu0 %v3650_v42, %s3839_s0 }
 0x76b   :  { %v3652_v43 = vpop.eup %3651 }
 0x76c   :  { %563 = vrot.lane.b32.xlu1 %v3652_v43, %s3839_s0 }
 0x7d7   :  { %v562_v44 = vpop.permute.xlu0 %561 }
 0x7d8   :  { %v567_v45 = vmul.f32 %v562_v44, %v531_v28 }
 0x7da   :  { %571 = vrot.lane.b32.xlu0 %v567_v45, %s3840_s24 }
 0x7de   :  { %v564_v47 = vpop.permute.xlu1 %563  ;;  %96 = vperm.xlu0 %3615, %v73_v46  }
 0x7df   :  { %v568_v48 = vmul.f32 %v564_v47, %v532_v33 }
 0x7e1   :  { %573 = vrot.lane.b32.xlu1 %v568_v48, %s3840_s24 }
 0x7e5   :  { %101 = vperm.xlu1 %3616, %v74_v49  }
 0x84c   :  { %v572_v50 = vpop.permute.xlu0 %571 }
 0x84d   :  { %3276 = vmatmul.mubr.msk.f32.vlgmr.msra.gmra.mrb[4].mxu1 %vm182_vm0, %v572_v50 }
 0x84e   :  { %648 = vmatprep.mubr.f32.mxu1 %v3837_v3  ;;  %3462 = vmatpush1.bf16.msra.mxu1 %v3976_v9 }
 0x84f   :  { %3464 = vmatprep.subr.bf16.mxu1 %v3978_v10 }
 0x852   :  { %3466 = vmatpush1.bf16.msra.mxu1 %v3991_v14 }
 0x853   :  { %v574_v51 = vpop.permute.xlu1 %573  ;;  %3476 = vmatprep.subr.bf16.mxu1 %v3964_v5 }
 0x854   :  { %3277 = vmatmul.mubr.msk.f32.gmra.mrb[6].mxu1 %vm182_vm0, %v574_v51 }
 0x855   :  { %905 = vmatprep.mubr.f32.mxu1 %v3837_v3 }
 0x85d   :  { %v4152_v52 = vpop.permute.xlu0 %96 }
 0x85e   :  { %v136_v53 = vmul.f32 %v4018_v20, %v4152_v52  ;;  %v137_v49 = vmul.f32 %v4033_v26, %v4152_v52 }
 0x860   :  { %v164_v54 = vadd.f32 %v4030_v25, %v136_v53  ;;  %v165_v51 = vadd.f32 %v4041_v31, %v137_v49 }
 0x864   :  { %v4157_v55 = vpop.permute.xlu1 %101 }
 0x865   :  { %v139_v5 = vmul.f32 %v4033_v26, %v4157_v55  ;;  %v138_v44 = vmul.f32 %v4018_v20, %v4157_v55 }
 0x867   :  { %v167_v62 = vadd.f32 %v4041_v31, %v139_v5  ;;  %v166_v45 = vadd.f32 %v4030_v25, %v138_v44 }
 0x920   :  { %v645_v56 = vpop.f32.mrb[4].mxu1 }
 0x921   :  { %v654_v57 = vadd.f32 %v645_v56, %v164_v54  ;;  %v647_v58 = vpop.f32.mrb[5].mxu1 }
 0x923   :  { %3653 = vtanh.f32 %v654_v57  ;;  %v656_v4 = vmul.f32 0.5, %v654_v57 }
 0x927   :  { %v650_v60 = vpop.f32.mrb[6].mxu1 }
 0x928   :  { %v651_v63 = vpop.f32.mrb[7].mxu1 }
 0x929   :  { %v655_v0 = vadd.f32 %v651_v63, %v167_v62 }
 0x92b   :  { %3655 = vtanh.f32 %v655_v0  ;;  %v657_v7 = vmul.f32 0.5, %v655_v0 }
 0x92c   :  { %3657 = vtanh.f32 %v656_v4 }
 0x92d   :  { %v3654_v1 = vpop.eup %3653  ;;  %3659 = vtanh.f32 %v657_v7 }
 0x92e   :  { %670 = vrot.lane.b32.xlu0 %v3654_v1, %s3839_s0 }
 0x935   :  { %v3656_v2 = vpop.eup %3655 }
 0x936   :  { %672 = vrot.lane.b32.xlu1 %v3656_v2, %s3839_s0  ;;  %v3658_v11 = vpop.eup %3657 }
 0x937   :  { %v660_v12 = vmul.f32 0.5, %v3658_v11  ;;  %v3660_v15 = vpop.eup %3659 }
 0x938   :  { %v661_v19 = vmul.f32 0.5, %v3660_v15 }
 0x939   :  { %v662_v13 = vadd.f32 0.5, %v660_v12 }
 0x93a   :  { %v663_v21 = vadd.f32 0.5, %v661_v19 }
 0x93b   :  { %v666_v29 = vmul.f32 %v662_v13, %v4127_v38 }
 0x93c   :  { %v667_v33 = vmul.f32 %v663_v21, %v4131_v41 }
 0x9a0   :  { %v671_v16 = vpop.permute.xlu0 %670 }
 0x9a1   :  { %v676_v17 = vmul.f32 %v671_v16, %v662_v13 }
 0x9a3   :  { %680 = vrot.lane.b32.xlu0 %v676_v17, %s3840_s24 }
 0x9a8   :  { %v673_v24 = vpop.permute.xlu1 %672 }
 0x9a9   :  { %v677_v28 = vmul.f32 %v673_v24, %v663_v21 }
 0x9ab   :  { %682 = vrot.lane.b32.xlu1 %v677_v28, %s3840_s24 }
 0xa15   :  { %v681_v30 = vpop.permute.xlu0 %680 }
 0xa16   :  { %v686_v32 = vadd.f32 %v681_v30, %v666_v29 }
 0xa18   :  { %3661 = vtanh.f32 %v686_v32 }
 0xa1d   :  { %v683_v34 = vpop.permute.xlu1 %682 }
 0xa1e   :  { %v687_v35 = vadd.f32 %v683_v34, %v667_v33 }
 0xa20   :  { %3663 = vtanh.f32 %v687_v35 }
 0xa22   :  { %v3662_v36 = vpop.eup %3661 }
 0xa23   :  { %692 = vrot.lane.b32.xlu0 %v3662_v36, %s3839_s0  ;;  %v140_v36 = vmul.f32 %v4018_v20, %v4116_v61 }
 0xa2a   :  { %v3664_v37 = vpop.eup %3663 }
 0xa2b   :  { %694 = vrot.lane.b32.xlu1 %v3664_v37, %s3839_s0  ;;  %v168_v37 = vadd.f32 %v4030_v25, %v140_v36 }
 0xa95   :  { %v693_v39 = vpop.permute.xlu0 %692 }
 0xa96   :  { %v698_v40 = vmul.f32 %v693_v39, %v662_v13 }
 0xa98   :  { %702 = vrot.lane.b32.xlu0 %v698_v40, %s3840_s24 }
 0xa9d   :  { %v695_v42 = vpop.permute.xlu1 %694 }
 0xa9e   :  { %v699_v38 = vmul.f32 %v695_v42, %v663_v21 }
 0xaa0   :  { %704 = vrot.lane.b32.xlu1 %v699_v38, %s3840_s24 }
 0xb0a   :  { %v703_v43 = vpop.permute.xlu0 %702 }
 0xb0b   :  { %3278 = vmatmul.mubr.msk.f32.vlgmr.msra.gmra.mrb[8].mxu0 %vm182_vm0, %v703_v43 }
 0xb0c   :  { %779 = vmatprep.mubr.f32.mxu0 %v3837_v3  ;;  %3470 = vmatpush1.bf16.msra.mxu0 %v3976_v9 }
 0xb0d   :  { %3472 = vmatprep.subr.bf16.mxu0 %v3978_v10 }
 0xb10   :  { %3474 = vmatpush1.bf16.msra.mxu0 %v3991_v14 }
 0xb12   :  { %v705_v41 = vpop.permute.xlu1 %704 }
 0xb13   :  { %3279 = vmatmul.mubr.msk.f32.gmra.mrb[10].mxu0 %vm182_vm0, %v705_v41 }
 0xb14   :  { %1036 = vmatprep.mubr.f32.mxu0 %v3837_v3 }
 0xbde   :  { %v776_v46 = vpop.f32.mrb[8].mxu0 }
 0xbdf   :  { %v785_v47 = vadd.f32 %v776_v46, %v166_v45  ;;  %v778_v48 = vpop.f32.mrb[9].mxu0 }
 0xbe1   :  { %3665 = vtanh.f32 %v785_v47  ;;  %v787_v58 = vmul.f32 0.5, %v785_v47 }
 0xbe6   :  { %v781_v50 = vpop.f32.mrb[10].mxu0 }
 0xbe7   :  { %v782_v53 = vpop.f32.mrb[11].mxu0 }
 0xbe8   :  { %v786_v54 = vadd.f32 %v782_v53, %v165_v51 }
 0xbea   :  { %3667 = vtanh.f32 %v786_v54  ;;  %v788_v5 = vmul.f32 0.5, %v786_v54 }
 0xbeb   :  { %v3666_v56 = vpop.eup %3665  ;;  %3669 = vtanh.f32 %v787_v58 }
 0xbec   :  { %801 = vrot.lane.b32.xlu0 %v3666_v56, %s3839_s0  ;;  %3671 = vtanh.f32 %v788_v5 }
 0xbf4   :  { %v3668_v57 = vpop.eup %3667 }
 0xbf5   :  { %803 = vrot.lane.b32.xlu1 %v3668_v57, %s3839_s0  ;;  %v3670_v60 = vpop.eup %3669 }
 0xbf6   :  { %v791_v62 = vmul.f32 0.5, %v3670_v60  ;;  %v3672_v1 = vpop.eup %3671 }
 0xbf7   :  { %v792_v4 = vmul.f32 0.5, %v3672_v1 }
 0xbf8   :  { %v793_v63 = vadd.f32 0.5, %v791_v62 }
 0xbf9   :  { %v794_v7 = vadd.f32 0.5, %v792_v4 }
 0xbfa   :  { %v797_v13 = vmul.f32 %v793_v63, %v686_v32 }
 0xbfb   :  { %v798_v17 = vmul.f32 %v794_v7, %v687_v35 }
 0xc5e   :  { %v802_v0 = vpop.permute.xlu0 %801 }
 0xc5f   :  { %v807_v2 = vmul.f32 %v802_v0, %v793_v63 }
 0xc61   :  { %811 = vrot.lane.b32.xlu0 %v807_v2, %s3840_s24 }
 0xc67   :  { %v804_v11 = vpop.permute.xlu1 %803 }
 0xc68   :  { %v808_v12 = vmul.f32 %v804_v11, %v794_v7 }
 0xc6a   :  { %813 = vrot.lane.b32.xlu1 %v808_v12, %s3840_s24 }
 0xcd3   :  { %v812_v15 = vpop.permute.xlu0 %811 }
 0xcd4   :  { %v817_v16 = vadd.f32 %v812_v15, %v797_v13 }
 0xcd6   :  { %3673 = vtanh.f32 %v817_v16 }
 0xcdc   :  { %v814_v19 = vpop.permute.xlu1 %813 }
 0xcdd   :  { %v818_v21 = vadd.f32 %v814_v19, %v798_v17  ;;  %v142_v17 = vmul.f32 %v4018_v20, %v4076_v8 }
 0xcdf   :  { %3675 = vtanh.f32 %v818_v21  ;;  %v170_v19 = vadd.f32 %v4030_v25, %v142_v17 }
 0xce0   :  { %v3674_v24 = vpop.eup %3673 }
 0xce1   :  { %823 = vrot.lane.b32.xlu0 %v3674_v24, %s3839_s0 }
 0xce9   :  { %v3676_v28 = vpop.eup %3675 }
 0xcea   :  { %825 = vrot.lane.b32.xlu1 %v3676_v28, %s3839_s0 }
 0xd53   :  { %v824_v29 = vpop.permute.xlu0 %823 }
 0xd54   :  { %v829_v30 = vmul.f32 %v824_v29, %v793_v63  ;;  %v133_v29 = vmul.f32 %v4033_v26, %v4072_v6 }
 0xd56   :  { %833 = vrot.lane.b32.xlu0 %v829_v30, %s3840_s24 }
 0xd5c   :  { %v826_v33 = vpop.permute.xlu1 %825 }
 0xd5d   :  { %v830_v34 = vmul.f32 %v826_v33, %v794_v7  ;;  %v161_v33 = vadd.f32 %v4041_v31, %v133_v29 }
 0xd5f   :  { %835 = vrot.lane.b32.xlu1 %v830_v34, %s3840_s24 }
 0xdc8   :  { %v834_v32 = vpop.permute.xlu0 %833 }
 0xdc9   :  { %3280 = vmatmul.mubr.msk.f32.vlgmr.msra.gmra.mrb[8].mxu1 %vm182_vm0, %v834_v32 }
 0xdca   :  { %910 = vmatprep.mubr.f32.mxu1 %v3837_v3  ;;  %3478 = vmatpush1.bf16.msra.mxu1 %v3976_v9  ;;  %v135_v9 = vmul.f32 %v4033_v26, %v4112_v59 }
 0xdcb   :  { %3480 = vmatprep.subr.bf16.mxu1 %v3978_v10 }
 0xdce   :  { %3482 = vmatpush1.bf16.msra.mxu1 %v3991_v14  ;;  %v163_v14 = vadd.f32 %v4041_v31, %v135_v9 }
 0xdd1   :  { %v836_v35 = vpop.permute.xlu1 %835 }
 0xdd2   :  { %3281 = vmatmul.mubr.msk.f32.gmra.mrb[10].mxu1 %vm182_vm0, %v836_v35 }
 0xdd3   :  { %1167 = vmatprep.mubr.f32.mxu1 %v3837_v3 }
 0xe9c   :  { %v907_v39 = vpop.f32.mrb[8].mxu1 }
 0xe9d   :  { %v916_v40 = vadd.f32 %v907_v39, %v168_v37  ;;  %v909_v42 = vpop.f32.mrb[9].mxu1 }
 0xe9f   :  { %3677 = vtanh.f32 %v916_v40  ;;  %v918_v45 = vmul.f32 0.5, %v916_v40 }
 0xea5   :  { %v912_v10 = vpop.f32.mrb[10].mxu1 }
 0xea6   :  { %v913_v38 = vpop.f32.mrb[11].mxu1 }
 0xea7   :  { %v917_v43 = vadd.f32 %v913_v38, %v163_v14 }
 0xea9   :  { %v3678_v41 = vpop.eup %3677  ;;  %3679 = vtanh.f32 %v917_v43  ;;  %v919_v46 = vmul.f32 0.5, %v917_v43 }
 0xeaa   :  { %932 = vrot.lane.b32.xlu0 %v3678_v41, %s3839_s0  ;;  %3681 = vtanh.f32 %v918_v45 }
 0xeab   :  { %3683 = vtanh.f32 %v919_v46 }
 0xeb3   :  { %v3680_v44 = vpop.eup %3679 }
 0xeb4   :  { %934 = vrot.lane.b32.xlu1 %v3680_v44, %s3839_s0  ;;  %v3682_v47 = vpop.eup %3681 }
 0xeb5   :  { %v922_v48 = vmul.f32 0.5, %v3682_v47  ;;  %v3684_v53 = vpop.eup %3683 }
 0xeb6   :  { %v923_v54 = vmul.f32 0.5, %v3684_v53 }
 0xeb7   :  { %v924_v49 = vadd.f32 0.5, %v922_v48 }
 0xeb8   :  { %v925_v56 = vadd.f32 0.5, %v923_v54 }
 0xeb9   :  { %v928_v5 = vmul.f32 %v924_v49, %v817_v16 }
 0xeba   :  { %v929_v63 = vmul.f32 %v925_v56, %v818_v21 }
 0xf1c   :  { %v933_v50 = vpop.permute.xlu0 %932 }
 0xf1d   :  { %v938_v51 = vmul.f32 %v933_v50, %v924_v49 }
 0xf1f   :  { %942 = vrot.lane.b32.xlu0 %v938_v51, %s3840_s24 }
 0xf26   :  { %v935_v57 = vpop.permute.xlu1 %934 }
 0xf27   :  { %v939_v58 = vmul.f32 %v935_v57, %v925_v56 }
 0xf29   :  { %944 = vrot.lane.b32.xlu1 %v939_v58, %s3840_s24 }
 0xf91   :  { %v943_v60 = vpop.permute.xlu0 %942 }
 0xf92   :  { %v948_v62 = vadd.f32 %v943_v60, %v928_v5 }
 0xf94   :  { %3685 = vtanh.f32 %v948_v62 }
 0xf9b   :  { %v945_v0 = vpop.permute.xlu1 %944 }
 0xf9c   :  { %v949_v1 = vadd.f32 %v945_v0, %v929_v63  ;;  %v144_v63 = vmul.f32 %v4018_v20, %v4035_v27 }
 0xf9e   :  { %v3686_v2 = vpop.eup %3685  ;;  %3687 = vtanh.f32 %v949_v1  ;;  %v172_v0 = vadd.f32 %v4030_v25, %v144_v63 }
 0xf9f   :  { %954 = vrot.lane.b32.xlu0 %v3686_v2, %s3839_s0 }
 0xfa8   :  { %v3688_v4 = vpop.eup %3687 }
 0xfa9   :  { %956 = vrot.lane.b32.xlu1 %v3688_v4, %s3839_s0 }
0x1011   :  { %v955_v7 = vpop.permute.xlu0 %954 }
0x1012   :  { %v960_v11 = vmul.f32 %v955_v7, %v924_v49  ;;  %v131_v7 = vmul.f32 %v4033_v26, %v4023_v22 }
0x1014   :  { %964 = vrot.lane.b32.xlu0 %v960_v11, %s3840_s24 }
0x101b   :  { %v957_v12 = vpop.permute.xlu1 %956 }
0x101c   :  { %v961_v13 = vmul.f32 %v957_v12, %v925_v56  ;;  %v159_v12 = vadd.f32 %v4041_v31, %v131_v7 }
0x101e   :  { %966 = vrot.lane.b32.xlu1 %v961_v13, %s3840_s24 }
0x1086   :  { %v965_v15 = vpop.permute.xlu0 %964 }
0x1087   :  { %3282 = vmatmul.mubr.msk.f32.vlgmr.msra.gmra.mrb[12].mxu0 %vm182_vm0, %v965_v15 }
0x1088   :  { %1041 = vmatprep.mubr.f32.mxu0 %v3837_v3 }
0x1090   :  { %v967_v16 = vpop.permute.xlu1 %966 }
0x1091   :  { %3283 = vmatmul.mubr.msk.f32.gmra.mrb[14].mxu0 %vm182_vm0, %v967_v16 }
0x1092   :  { %3354 = vmatprep.mubr.msk.f32.mxu0 %vm3842_vm1, %v3837_v3 }
0x115a   :  { %v1038_v21 = vpop.f32.mrb[12].mxu0 }
0x115b   :  { %v1047_v24 = vadd.f32 %v1038_v21, %v170_v19  ;;  %v1040_v28 = vpop.f32.mrb[13].mxu0 }
0x115d   :  { %3689 = vtanh.f32 %v1047_v24  ;;  %v1049_v37 = vmul.f32 0.5, %v1047_v24 }
0x1164   :  { %v1043_v30 = vpop.f32.mrb[14].mxu0 }
0x1165   :  { %v1044_v34 = vpop.f32.mrb[15].mxu0 }
0x1166   :  { %v1048_v32 = vadd.f32 %v1044_v34, %v161_v33 }
0x1167   :  { %v3690_v35 = vpop.eup %3689 }
0x1168   :  { %3691 = vtanh.f32 %v1048_v32  ;;  %1063 = vrot.lane.b32.xlu0 %v3690_v35, %s3839_s0  ;;  %v1050_v39 = vmul.f32 0.5, %v1048_v32 }
0x1169   :  { %3693 = vtanh.f32 %v1049_v37 }
0x116a   :  { %3695 = vtanh.f32 %v1050_v39 }
0x1172   :  { %v3692_v36 = vpop.eup %3691 }
0x1173   :  { %1065 = vrot.lane.b32.xlu1 %v3692_v36, %s3839_s0  ;;  %v3694_v40 = vpop.eup %3693 }
0x1174   :  { %v1053_v42 = vmul.f32 0.5, %v3694_v40  ;;  %v3696_v38 = vpop.eup %3695 }
0x1175   :  { %v1054_v43 = vmul.f32 0.5, %v3696_v38  ;;  %v1225_v38 = vld [vmem:[%s4731_s25 + $0x8] sm:$0xff] }
0x1176   :  { %v1055_v9 = vadd.f32 0.5, %v1053_v42 }
0x1177   :  { %v1056_v41 = vadd.f32 0.5, %v1054_v43  ;;  %v1226_v43 = vld [vmem:[%s4731_s25 + $0x10] sm:$0xff] }
0x1178   :  { %v1059_v46 = vmul.f32 %v1055_v9, %v948_v62 }
0x1179   :  { %v1060_v49 = vmul.f32 %v1056_v41, %v949_v1 }
0x11da   :  { %v1064_v10 = vpop.permute.xlu0 %1063 }
0x11db   :  { %v1069_v14 = vmul.f32 %v1064_v10, %v1055_v9  ;;  %v3841_v10 = vmov 0.0|0.0  }
0x11dc   :  { %3489 = vmatprep.subr.bf16.mxu1 %v3841_v10  ;;  %3483 = vmatprep.subr.bf16.mxu0 %v3841_v10 }
0x11dd   :  { %1073 = vrot.lane.b32.xlu0 %v1069_v14, %s3840_s24  ;;  %v1224_v14 = vld [vmem:[%s4731_s25] sm:$0xff] }
0x11e5   :  { %v1066_v44 = vpop.permute.xlu1 %1065 }
0x11e6   :  { %v1070_v45 = vmul.f32 %v1066_v44, %v1056_v41  ;;  %v1227_v44 = vld [vmem:[%s4731_s25 + $0x18] sm:$0xff] }
0x11e8   :  { %1075 = vrot.lane.b32.xlu1 %v1070_v45, %s3840_s24  ;;  %v3493_v45 = vpack.c.bf16 %v1227_v44, %v1226_v43  ;;  %v1400_v44 = vld [vmem:[%s4703_s1] sm:$0xff] }
0x124f   :  { %v1074_v47 = vpop.permute.xlu0 %1073 }
0x1250   :  { %v1079_v48 = vadd.f32 %v1074_v47, %v1059_v46 }
0x1252   :  { %3697 = vtanh.f32 %v1079_v48 }
0x125a   :  { %v1076_v50 = vpop.permute.xlu1 %1075 }
0x125b   :  { %v1080_v51 = vadd.f32 %v1076_v50, %v1060_v49  ;;  %v1228_v49 = vld [vmem:[%s4731_s25 + $0x20] sm:$0xff]  ;;  %v1229_v50 = vld [vmem:[%s4731_s25 + $0x28] sm:$0xff] }
0x125c   :  { %v3698_v53 = vpop.eup %3697 }
0x125d   :  { %3699 = vtanh.f32 %v1080_v51  ;;  %1085 = vrot.lane.b32.xlu0 %v3698_v53, %s3839_s0  ;;  %v3484_v53 = vpack.c.bf16 %v1229_v50, %v1228_v49 }
0x125f   :  { %3485 = vmatpush3.bf16.msra.mxu0 %v3484_v53  ;;  %v1414_v53 = vld [vmem:[%s4704_s11] sm:$0x3] }
0x1260   :  { %3486 = vmatprep.subr.bf16.mxu0 %v3841_v10 }
0x1267   :  { %v3700_v54 = vpop.eup %3699 }
0x1268   :  { %1087 = vrot.lane.b32.xlu1 %v3700_v54, %s3839_s0  ;;  %v1231_v54 = vld [vmem:[%s4731_s25 + $0x38] sm:$0xff] }
0x12cf   :  { %v1086_v56 = vpop.permute.xlu0 %1085 }
0x12d0   :  { %v1091_v57 = vmul.f32 %v1086_v56, %v1055_v9 }
0x12d2   :  { %1095 = vrot.lane.b32.xlu0 %v1091_v57, %s3840_s24 }
0x12da   :  { %v1088_v58 = vpop.permute.xlu1 %1087 }
0x12db   :  { %v1092_v5 = vmul.f32 %v1088_v58, %v1056_v41  ;;  %v3490_v41 = vpack.c.bf16 %v1225_v38, %v1224_v14  ;;  %v1551_v14 = vld [vmem:[%s4732_s4 + $0x30] sm:$0xff] }
0x12dd   :  { %1097 = vrot.lane.b32.xlu1 %v1092_v5, %s3840_s24 }
0x1344   :  { %v1096_v60 = vpop.permute.xlu0 %1095 }
0x1345   :  { %3284 = vmatmul.mubr.msk.f32.vlgmr.msra.gmra.mrb[12].mxu1 %vm182_vm0, %v1096_v60 }
0x1346   :  { %1172 = vmatprep.mubr.f32.mxu1 %v3837_v3  ;;  %3491 = vmatpush3.bf16.msra.mxu1 %v3490_v41 }
0x1347   :  { %3492 = vmatprep.subr.bf16.mxu1 %v3841_v10 }
0x134a   :  { %3494 = vmatpush3.bf16.msra.mxu1 %v3493_v45 }
0x134f   :  { %v1098_v62 = vpop.permute.xlu1 %1097 }
0x1350   :  { %3285 = vmatmul.mubr.msk.f32.gmra.mrb[14].mxu1 %vm182_vm0, %v1098_v62 }
0x1351   :  { %3365 = vmatprep.mubr.msk.f32.mxu1 %vm3842_vm1, %v3837_v3 }
0x1418   :  { %v1169_v1 = vpop.f32.mrb[12].mxu1 }
0x1419   :  { %v1178_v2 = vadd.f32 %v1169_v1, %v172_v0  ;;  %v1171_v4 = vpop.f32.mrb[13].mxu1 }
0x141b   :  { %3701 = vtanh.f32 %v1178_v2  ;;  %v1180_v20 = vmul.f32 0.5, %v1178_v2 }
0x1423   :  { %v1174_v11 = vpop.f32.mrb[14].mxu1 }
0x1424   :  { %v1175_v13 = vpop.f32.mrb[15].mxu1 }
0x1425   :  { %v3702_v15 = vpop.eup %3701  ;;  %v1179_v16 = vadd.f32 %v1175_v13, %v159_v12  ;;  %v1546_v13 = vld [vmem:[%s4732_s4 + $0x8] sm:$0xff] }
0x1426   :  { %1194 = vrot.lane.b32.xlu0 %v3702_v15, %s3839_s0  ;;  %v1548_v15 = vld [vmem:[%s4732_s4 + $0x18] sm:$0xff] }
0x1427   :  { %3703 = vtanh.f32 %v1179_v16  ;;  %v1181_v25 = vmul.f32 0.5, %v1179_v16  ;;  %v1545_v16 = vld [vmem:[%s4732_s4] sm:$0xff] }
0x1428   :  { %3705 = vtanh.f32 %v1180_v20  ;;  %v1547_v20 = vld [vmem:[%s4732_s4 + $0x10] sm:$0xff] }
0x1429   :  { %3707 = vtanh.f32 %v1181_v25  ;;  %v1411_v25 = vld [vmem:[%s4701_s9 + $0x8] sm:$0xff] }
0x1431   :  { %v3704_v17 = vpop.eup %3703 }
0x1432   :  { %1196 = vrot.lane.b32.xlu1 %v3704_v17, %s3839_s0  ;;  %v3706_v19 = vpop.eup %3705  ;;  %v4293_v17 = vpack.c.bf16 %v1548_v15, %v1546_v13 }
0x1433   :  { %v1184_v21 = vmul.f32 0.5, %v3706_v19  ;;  %v3708_v31 = vpop.eup %3707  ;;  %v1413_v19 = vld [vmem:[%s4701_s9 + $0x18] sm:$0xff] }
0x1434   :  { %v1185_v29 = vmul.f32 0.5, %v3708_v31  ;;  %3500 = vmatprep.subr.bf16.mxu1 %v4293_v17 }
0x1435   :  { %v1186_v24 = vadd.f32 0.5, %v1184_v21  ;;  %v4304_v21 = vpack.c.bf16 %v1547_v20, %v1545_v16 }
0x1436   :  { %v1187_v30 = vadd.f32 0.5, %v1185_v29  ;;  %v3288_v29 = vld [vmem:[%s4702_s7] ss:$0 sm:$0xff] }
0x1437   :  { %v1190_v32 = vmul.f32 %v1186_v24, %v1079_v48 }
0x1438   :  { %v1191_v37 = vmul.f32 %v1187_v30, %v1080_v51  ;;  %v1230_v51 = vld [vmem:[%s4731_s25 + $0x30] sm:$0xff] }
0x1439   :  { %v3487_v57 = vpack.c.bf16 %v1231_v54, %v1230_v51  ;;  %v1501_v54 = vld [vmem:[%s4705_s8] sm:$0x3] }
0x143b   :  { %3488 = vmatpush3.bf16.msra.mxu0 %v3487_v57  ;;  %v4370_v57 = vrot.slane %v1501_v54, %v4012_v18 }
0x1498   :  { %v1195_v26 = vpop.permute.xlu0 %1194 }
0x1499   :  { %v1200_v28 = vmul.f32 %v1195_v26, %v1186_v24 }
0x149b   :  { %1204 = vrot.lane.b32.xlu0 %v1200_v28, %s3840_s24 }
0x14a4   :  { %v1197_v33 = vpop.permute.xlu1 %1196 }
0x14a5   :  { %v1201_v34 = vmul.f32 %v1197_v33, %v1187_v30 }
0x14a7   :  { %1206 = vrot.lane.b32.xlu1 %v1201_v34, %s3840_s24 }
0x150d   :  { %v1205_v35 = vpop.permute.xlu0 %1204 }
0x150e   :  { %v1210_v36 = vadd.f32 %v1205_v35, %v1190_v32  ;;  %v1550_v32 = vld [vmem:[%s4732_s4 + $0x28] sm:$0xff]  ;;  %v1552_v35 = vld [vmem:[%s4732_s4 + $0x38] sm:$0xff] }
0x1510   :  { %3709 = vtanh.f32 %v1210_v36 }
0x1519   :  { %v1207_v39 = vpop.permute.xlu1 %1206 }
0x151a   :  { %v3710_v40 = vpop.eup %3709  ;;  %v1211_v42 = vadd.f32 %v1207_v39, %v1191_v37  ;;  %v1410_v37 = vld [vmem:[%s4701_s9] sm:$0xff]  ;;  %v1412_v39 = vld [vmem:[%s4701_s9 + $0x10] sm:$0xff]  ;;  %s3843_s9 = smov 112  }
0x151b   :  { %1216 = vrot.lane.b32.xlu0 %v3710_v40, %s3839_s0  ;;  %v4326_v40 = vpack.c.bf16 %v1552_v35, %v1550_v32 }
0x151c   :  { %3711 = vtanh.f32 %v1211_v42  ;;  %v1549_v42 = vld [vmem:[%s4732_s4 + $0x20] sm:$0xff] }
0x151d   :  { %v4335_v43 = vpack.c.bf16 %v1551_v14, %v1549_v42 }
0x1526   :  { %v3712_v9 = vpop.eup %3711 }
0x1527   :  { %1218 = vrot.lane.b32.xlu1 %v3712_v9, %s3839_s0  ;;  %v3497_v9 = vpack.c.bf16 %v1412_v39, %v1410_v37 }
0x158d   :  { %v1217_v46 = vpop.permute.xlu0 %1216 }
0x158e   :  { %v1222_v47 = vmul.f32 %v1217_v46, %v1186_v24  ;;  %v3495_v24 = vpack.c.bf16 %v1413_v19, %v1411_v25 }
0x1590   :  { %v1232_v48 = vmul.f32 0.5, %v1222_v47  ;;  %3496 = vmatprep.subr.bf16.mxu0 %v3495_v24 }
0x1592   :  { %3713 = vtanh.f32 %v1232_v48 }
0x1599   :  { %v1219_v56 = vpop.permute.xlu1 %1218 }
0x159a   :  { %v1223_v58 = vmul.f32 %v1219_v56, %v1187_v30  ;;  %v1419_v56 = vrot.slane %v1414_v53, %v4012_v18 }
0x159c   :  { %v3714_v5 = vpop.eup %3713  ;;  %v1237_v60 = vmul.f32 0.5, %v1223_v58 }
0x159d   :  { %v1234_v62 = vmul.f32 0.5, %v3714_v5  ;;  %v4374_v5 = vrot.slane %v1501_v54, %v4025_v23 }
0x159e   :  { %3715 = vtanh.f32 %v1237_v60 }
0x159f   :  { %v1235_v63 = vadd.f32 0.5, %v1234_v62 }
0x15a1   :  { %v1236_v0 = vmul.f32 %v1235_v63, %v1222_v47 }
0x15a3   :  { %1318 = vrot.lane.b32.xlu1 %v1236_v0, %s3840_s24  ;;  %v1513_v0 = vmul.f32 %v4370_v57, %v4023_v22 }
0x15a8   :  { %v3716_v1 = vpop.eup %3715 }
0x15a9   :  { %v1239_v2 = vmul.f32 0.5, %v3716_v1 }
0x15ab   :  { %v1240_v4 = vadd.f32 0.5, %v1239_v2  ;;  %v1528_v2 = vmul.f32 %v4374_v5, %v4035_v27 }
0x15ad   :  { %v1241_v7 = vmul.f32 %v1240_v4, %v1223_v58  ;;  %v1423_v58 = vrot.slane %v1414_v53, %v4025_v23 }
0x15af   :  { %1243 = vrot.lane.b32.xlu0 %v1241_v7, %s3840_s24 }
0x1615   :  { %v1319_v11 = vpop.permute.xlu1 %1318 }
0x1616   :  { %3366 = vmatmul.mubr.msk.f32.vlgmr.msra.gmra.mrb[16].mxu1 %vm182_vm0, %v1319_v11 }
0x1617   :  { %1617 = vmatprep.mubr.f32.mxu1 %v3837_v3  ;;  %3502 = vmatpush1.bf16.msra.mxu1 %v4304_v21 }
0x1618   :  { %3504 = vmatprep.subr.bf16.mxu1 %v4326_v40 }
0x161b   :  { %3506 = vmatpush1.bf16.msra.mxu1 %v4335_v43 }
0x161c   :  { %3516 = vmatprep.subr.bf16.mxu1 %v4293_v17 }
0x161e   :  { %1618 = vmatmul.mubr.f32.vlgmr.msra.gmra.mrb[18].mxu1 %v3837_v3 }
0x161f   :  { %1622 = vmatprep.mubr.f32.mxu1 %v3837_v3  ;;  %3518 = vmatpush1.bf16.msra.mxu1 %v4304_v21 }
0x1620   :  { %3520 = vmatprep.subr.bf16.mxu1 %v4326_v40 }
0x1621   :  { %v1244_v12 = vpop.permute.xlu0 %1243 }
0x1622   :  { %3355 = vmatmul.mubr.msk.f32.vlgmr.msra.gmra.mrb[16].mxu0 %vm182_vm0, %v1244_v12  ;;  %1623 = vmatmul.mubr.f32.gmra.mrb[20].mxu1 %v3837_v3 }
0x1623   :  { %1494 = vmatprep.mubr.f32.mxu0 %v3837_v3  ;;  %3498 = vmatpush1.bf16.msra.mxu0 %v3497_v9 }
0x1624   :  { %3508 = vmatprep.subr.bf16.mxu0 %v4293_v17  ;;  %3522 = vmatpush1.bf16.msra.mxu1 %v4335_v43 }
0x1625   :  { %1879 = vmatprep.mubr.f32.mxu1 %v3837_v3  ;;  %3532 = vmatprep.subr.bf16.mxu1 %v4293_v17 }
0x16e9   :  { %v1388_v26 = vpop.f32.mrb[16].mxu1 }
0x16ea   :  { %v3367_v28 = vpop.f32.mrb[17].mxu1 }
0x16f1   :  { %v1619_v48 = vpop.f32.mrb[18].mxu1 }
0x16f2   :  { %v1621_v49 = vpop.f32.mrb[19].mxu1 }
0x16f5   :  { %v1313_v31 = vpop.f32.mrb[16].mxu0  ;;  %v1624_v50 = vpop.f32.mrb[20].mxu1 }
0x16f6   :  { %v1389_v30 = vadd.f32 %v1388_v26, %v1313_v31  ;;  %v3356_v33 = vpop.f32.mrb[17].mxu0  ;;  %v1625_v51 = vpop.f32.mrb[21].mxu1  ;;  %v1515_v50 = vmul.f32 %v4370_v57, %v4072_v6 }
0x16f8   :  { %v4311_v34 = vadd.f32 %v3288_v29, %v1389_v30 }
0x16fa   :  { %v1401_v36 = vmul.f32 0.5, %v4311_v34 }
0x16fc   :  { %v1402_v38 = vmul.f32 1.442695, %v1401_v36 }
0x16fe   :  { %3717 = vpow2.f32 %v1402_v38 }
0x1708   :  { %v3718_v41 = vpop.eup %3717 }
0x1709   :  { %1405 = vrot.lane.b32.xlu0 %v3718_v41, %s3843_s9 }
0x177b   :  { %v1406_v45 = vpop.permute.xlu0 %1405 }
0x177c   :  { %v1408_v46 = vmul.f32 %v1406_v45, %v1400_v44 }
0x177e   :  { %v4353_v47 = vadd.f32 %v1408_v46, %v4311_v34 }
0x1780   :  { %3289 = vmatmul.mubr.msk.f32.vlgmr.msra.gmra.mrb[18].mxu0 %vm1426_vm2, %v4353_v47 }
0x1781   :  { %3510 = vmatpush1.bf16.msra.mxu0 %v4304_v21  ;;  %1748 = vmatprep.mubr.f32.mxu0 %v3837_v3 }
0x1782   :  { %3512 = vmatprep.subr.bf16.mxu0 %v4326_v40 }
0x1785   :  { %3514 = vmatpush1.bf16.msra.mxu0 %v4335_v43 }
0x1786   :  { %3524 = vmatprep.subr.bf16.mxu0 %v4293_v17 }
0x1853   :  { %v1496_v60 = vpop.f32.mrb[18].mxu0 }
0x1854   :  { %v4376_v62 = vadd.f32 %v1496_v60, %v1419_v56  ;;  %v1498_v63 = vpop.f32.mrb[19].mxu0 }
0x1855   :  { %v4380_v1 = vadd.f32 %v1498_v63, %v1423_v58  ;;  %v1526_v58 = vmul.f32 %v4374_v5, %v4076_v8 }
0x1856   :  { %v1529_v4 = vadd.f32 %v1513_v0, %v4376_v62 }
0x1857   :  { %v1544_v7 = vadd.f32 %v1528_v2, %v4380_v1  ;;  %v1542_v63 = vadd.f32 %v1526_v58, %v4380_v1 }
0x1858   :  { %v1628_v11 = vadd.f32 %v1619_v48, %v1529_v4 }
0x1859   :  { %v1629_v12 = vadd.f32 %v1625_v51, %v1544_v7  ;;  %v1531_v51 = vadd.f32 %v1515_v50, %v4376_v62 }
0x185a   :  { %3719 = vtanh.f32 %v1628_v11  ;;  %v1630_v16 = vmul.f32 0.5, %v1628_v11 }
0x185b   :  { %3721 = vtanh.f32 %v1629_v12  ;;  %v1631_v20 = vmul.f32 0.5, %v1629_v12 }
0x185c   :  { %3723 = vtanh.f32 %v1630_v16 }
0x185d   :  { %3725 = vtanh.f32 %v1631_v20 }
0x1864   :  { %v3720_v13 = vpop.eup %3719 }
0x1865   :  { %v3722_v15 = vpop.eup %3721  ;;  %1644 = vrot.lane.b32.xlu1 %v3720_v13, %s3839_s0 }
0x1866   :  { %1646 = vrot.lane.b32.xlu0 %v3722_v15, %s3839_s0  ;;  %v3724_v25 = vpop.eup %3723 }
0x1867   :  { %v3726_v19 = vpop.eup %3725  ;;  %v1634_v24 = vmul.f32 0.5, %v3724_v25 }
0x1868   :  { %v1635_v26 = vmul.f32 0.5, %v3726_v19 }
0x1869   :  { %v1636_v28 = vadd.f32 0.5, %v1634_v24 }
0x186a   :  { %v1637_v29 = vadd.f32 0.5, %v1635_v26 }
0x186b   :  { %v1640_v35 = vmul.f32 0.0, %v1636_v28 }
0x186c   :  { %v1641_v37 = vmul.f32 0.0, %v1637_v29 }
0x18d7   :  { %v1645_v31 = vpop.permute.xlu1 %1644 }
0x18d8   :  { %v1650_v30 = vmul.f32 %v1645_v31, %v1636_v28  ;;  %v1647_v33 = vpop.permute.xlu0 %1646 }
0x18d9   :  { %v1651_v32 = vmul.f32 %v1647_v33, %v1637_v29 }
0x18da   :  { %1654 = vrot.lane.b32.xlu1 %v1650_v30, %s3840_s24 }
0x18db   :  { %1656 = vrot.lane.b32.xlu0 %v1651_v32, %s3840_s24 }
0x194c   :  { %v1655_v36 = vpop.permute.xlu1 %1654 }
0x194d   :  { %v1660_v39 = vadd.f32 %v1655_v36, %v1640_v35  ;;  %v1657_v42 = vpop.permute.xlu0 %1656 }
0x194e   :  { %v1661_v9 = vadd.f32 %v1657_v42, %v1641_v37 }
0x194f   :  { %3727 = vtanh.f32 %v1660_v39 }
0x1950   :  { %3729 = vtanh.f32 %v1661_v9 }
0x1959   :  { %v3728_v14 = vpop.eup %3727 }
0x195a   :  { %v3730_v38 = vpop.eup %3729  ;;  %1666 = vrot.lane.b32.xlu1 %v3728_v14, %s3839_s0 }
0x195b   :  { %1668 = vrot.lane.b32.xlu0 %v3730_v38, %s3839_s0 }
0x19cc   :  { %v1667_v41 = vpop.permute.xlu1 %1666 }
0x19cd   :  { %v1672_v44 = vmul.f32 %v1667_v41, %v1636_v28  ;;  %v1669_v45 = vpop.permute.xlu0 %1668 }
0x19ce   :  { %v1673_v46 = vmul.f32 %v1669_v45, %v1637_v29  ;;  %v1517_v45 = vmul.f32 %v4370_v57, %v4112_v59 }
0x19cf   :  { %1676 = vrot.lane.b32.xlu1 %v1672_v44, %s3840_s24 }
0x19d0   :  { %1678 = vrot.lane.b32.xlu0 %v1673_v46, %s3840_s24  ;;  %v1533_v46 = vadd.f32 %v1517_v45, %v4376_v62 }
0x1a41   :  { %v1677_v48 = vpop.permute.xlu1 %1676 }
0x1a42   :  { %3290 = vmatmul.mubr.msk.f32.vlgmr.msra.gmra.mrb[20].mxu0 %vm182_vm0, %v1677_v48  ;;  %v1679_v49 = vpop.permute.xlu0 %1678 }
0x1a43   :  { %1753 = vmatprep.mubr.f32.mxu0 %v3837_v3  ;;  %3526 = vmatpush1.bf16.msra.mxu0 %v4304_v21 }
0x1a44   :  { %3528 = vmatprep.subr.bf16.mxu0 %v4326_v40 }
0x1a46   :  { %3291 = vmatmul.mubr.msk.f32.gmra.mrb[22].mxu0 %vm182_vm0, %v1679_v49 }
0x1a47   :  { %3530 = vmatpush1.bf16.msra.mxu0 %v4335_v43  ;;  %2010 = vmatprep.mubr.f32.mxu0 %v3837_v3 }
0x1a48   :  { %3540 = vmatprep.subr.bf16.mxu0 %v4293_v17 }
0x1b15   :  { %v1750_v53 = vpop.f32.mrb[20].mxu0 }
0x1b16   :  { %v1759_v54 = vadd.f32 %v1750_v53, %v1531_v51  ;;  %v1752_v56 = vpop.f32.mrb[21].mxu0  ;;  %v1524_v51 = vmul.f32 %v4374_v5, %v4116_v61 }
0x1b18   :  { %3731 = vtanh.f32 %v1759_v54  ;;  %v1761_v11 = vmul.f32 0.5, %v1759_v54  ;;  %v1540_v54 = vadd.f32 %v1524_v51, %v4380_v1 }
0x1b19   :  { %v1755_v60 = vpop.f32.mrb[22].mxu0 }
0x1b1a   :  { %v1756_v0 = vpop.f32.mrb[23].mxu0 }
0x1b1b   :  { %v1760_v2 = vadd.f32 %v1756_v0, %v1542_v63 }
0x1b1d   :  { %3733 = vtanh.f32 %v1760_v2  ;;  %v1762_v12 = vmul.f32 0.5, %v1760_v2 }
0x1b1e   :  { %3735 = vtanh.f32 %v1761_v11 }
0x1b1f   :  { %3737 = vtanh.f32 %v1762_v12 }
0x1b22   :  { %v3732_v4 = vpop.eup %3731 }
0x1b23   :  { %1775 = vrot.lane.b32.xlu1 %v3732_v4, %s3839_s0 }
0x1b27   :  { %v3734_v7 = vpop.eup %3733 }
0x1b28   :  { %1777 = vrot.lane.b32.xlu0 %v3734_v7, %s3839_s0  ;;  %v3736_v13 = vpop.eup %3735 }
0x1b29   :  { %v1765_v15 = vmul.f32 0.5, %v3736_v13  ;;  %v3738_v16 = vpop.eup %3737 }
0x1b2a   :  { %v1766_v19 = vmul.f32 0.5, %v3738_v16 }
0x1b2b   :  { %v1767_v20 = vadd.f32 0.5, %v1765_v15 }
0x1b2c   :  { %v1768_v26 = vadd.f32 0.5, %v1766_v19 }
0x1b2d   :  { %v1771_v29 = vmul.f32 %v1767_v20, %v1660_v39 }
0x1b2e   :  { %v1772_v32 = vmul.f32 %v1768_v26, %v1661_v9 }
0x1b95   :  { %v1776_v25 = vpop.permute.xlu1 %1775 }
0x1b96   :  { %v1781_v24 = vmul.f32 %v1776_v25, %v1767_v20 }
0x1b98   :  { %1785 = vrot.lane.b32.xlu1 %v1781_v24, %s3840_s24 }
0x1b9a   :  { %v1778_v28 = vpop.permute.xlu0 %1777 }
0x1b9b   :  { %v1782_v31 = vmul.f32 %v1778_v28, %v1768_v26 }
0x1b9d   :  { %1787 = vrot.lane.b32.xlu0 %v1782_v31, %s3840_s24 }
0x1c0a   :  { %v1786_v30 = vpop.permute.xlu1 %1785 }
0x1c0b   :  { %v1791_v33 = vadd.f32 %v1786_v30, %v1771_v29 }
0x1c0d   :  { %3739 = vtanh.f32 %v1791_v33 }
0x1c0f   :  { %v1788_v35 = vpop.permute.xlu0 %1787 }
0x1c10   :  { %v1792_v36 = vadd.f32 %v1788_v35, %v1772_v32 }
0x1c12   :  { %3741 = vtanh.f32 %v1792_v36 }
0x1c17   :  { %v3740_v37 = vpop.eup %3739 }
0x1c18   :  { %1797 = vrot.lane.b32.xlu1 %v3740_v37, %s3839_s0 }
0x1c1c   :  { %v3742_v42 = vpop.eup %3741 }
0x1c1d   :  { %1799 = vrot.lane.b32.xlu0 %v3742_v42, %s3839_s0 }
0x1c8a   :  { %v1798_v14 = vpop.permute.xlu1 %1797 }
0x1c8b   :  { %v1803_v38 = vmul.f32 %v1798_v14, %v1767_v20 }
0x1c8d   :  { %1807 = vrot.lane.b32.xlu1 %v1803_v38, %s3840_s24 }
0x1c8f   :  { %v1800_v41 = vpop.permute.xlu0 %1799 }
0x1c90   :  { %v1804_v44 = vmul.f32 %v1800_v41, %v1768_v26  ;;  %v1519_v41 = vmul.f32 %v4370_v57, %v4152_v52 }
0x1c92   :  { %1809 = vrot.lane.b32.xlu0 %v1804_v44, %s3840_s24  ;;  %v1535_v44 = vadd.f32 %v1519_v41, %v4376_v62  ;;  %v1520_v41 = vmul.f32 %v4374_v5, %v4152_v52 }
0x1cff   :  { %v1808_v39 = vpop.permute.xlu1 %1807 }
0x1d00   :  { %3292 = vmatmul.mubr.msk.f32.vlgmr.msra.gmra.mrb[22].mxu1 %vm182_vm0, %v1808_v39 }
0x1d01   :  { %1884 = vmatprep.mubr.f32.mxu1 %v3837_v3  ;;  %3534 = vmatpush1.bf16.msra.mxu1 %v4304_v21 }
0x1d02   :  { %3536 = vmatprep.subr.bf16.mxu1 %v4326_v40 }
0x1d04   :  { %v1810_v9 = vpop.permute.xlu0 %1809 }
0x1d05   :  { %3293 = vmatmul.mubr.msk.f32.gmra.mrb[24].mxu1 %vm182_vm0, %v1810_v9 }
0x1d06   :  { %3538 = vmatpush1.bf16.msra.mxu1 %v4335_v43  ;;  %2141 = vmatprep.mubr.f32.mxu1 %v3837_v3 }
0x1d07   :  { %3548 = vmatprep.subr.bf16.mxu1 %v4293_v17 }
0x1dd3   :  { %v1881_v48 = vpop.f32.mrb[22].mxu1 }
0x1dd4   :  { %v1890_v49 = vadd.f32 %v1881_v48, %v1533_v46  ;;  %v1883_v50 = vpop.f32.mrb[23].mxu1  ;;  %v1522_v46 = vmul.f32 %v4374_v5, %v4157_v55 }
0x1dd6   :  { %3743 = vtanh.f32 %v1890_v49  ;;  %v1892_v0 = vmul.f32 0.5, %v1890_v49  ;;  %v1538_v49 = vadd.f32 %v1522_v46, %v4380_v1 }
0x1dd8   :  { %v1886_v53 = vpop.f32.mrb[24].mxu1 }
0x1dd9   :  { %v1887_v56 = vpop.f32.mrb[25].mxu1 }
0x1dda   :  { %v1891_v58 = vadd.f32 %v1887_v56, %v1540_v54 }
0x1ddc   :  { %3745 = vtanh.f32 %v1891_v58  ;;  %v1893_v2 = vmul.f32 0.5, %v1891_v58 }
0x1ddd   :  { %3747 = vtanh.f32 %v1892_v0 }
0x1dde   :  { %3749 = vtanh.f32 %v1893_v2 }
0x1de0   :  { %v3744_v60 = vpop.eup %3743 }
0x1de1   :  { %1906 = vrot.lane.b32.xlu1 %v3744_v60, %s3839_s0 }
0x1de6   :  { %v3746_v63 = vpop.eup %3745 }
0x1de7   :  { %1908 = vrot.lane.b32.xlu0 %v3746_v63, %s3839_s0  ;;  %v3748_v4 = vpop.eup %3747 }
0x1de8   :  { %v1896_v7 = vmul.f32 0.5, %v3748_v4  ;;  %v3750_v11 = vpop.eup %3749 }
0x1de9   :  { %v1897_v16 = vmul.f32 0.5, %v3750_v11 }
0x1dea   :  { %v1898_v12 = vadd.f32 0.5, %v1896_v7 }
0x1deb   :  { %v1899_v20 = vadd.f32 0.5, %v1897_v16 }
0x1dec   :  { %v1902_v24 = vmul.f32 %v1898_v12, %v1791_v33 }
0x1ded   :  { %v1903_v31 = vmul.f32 %v1899_v20, %v1792_v36 }
0x1e53   :  { %v1907_v13 = vpop.permute.xlu1 %1906 }
0x1e54   :  { %v1912_v15 = vmul.f32 %v1907_v13, %v1898_v12 }
0x1e56   :  { %1916 = vrot.lane.b32.xlu1 %v1912_v15, %s3840_s24 }
0x1e59   :  { %v1909_v25 = vpop.permute.xlu0 %1908 }
0x1e5a   :  { %v1913_v19 = vmul.f32 %v1909_v25, %v1899_v20 }
0x1e5c   :  { %1918 = vrot.lane.b32.xlu0 %v1913_v19, %s3840_s24 }
0x1ec8   :  { %v1917_v26 = vpop.permute.xlu1 %1916 }
0x1ec9   :  { %v1922_v28 = vadd.f32 %v1917_v26, %v1902_v24 }
0x1ecb   :  { %3751 = vtanh.f32 %v1922_v28 }
0x1ece   :  { %v1919_v29 = vpop.permute.xlu0 %1918 }
0x1ecf   :  { %v1923_v30 = vadd.f32 %v1919_v29, %v1903_v31 }
0x1ed1   :  { %3753 = vtanh.f32 %v1923_v30 }
0x1ed5   :  { %v3752_v32 = vpop.eup %3751 }
0x1ed6   :  { %1928 = vrot.lane.b32.xlu1 %v3752_v32, %s3839_s0 }
0x1edb   :  { %v3754_v35 = vpop.eup %3753 }
0x1edc   :  { %1930 = vrot.lane.b32.xlu0 %v3754_v35, %s3839_s0 }
0x1f48   :  { %v1929_v37 = vpop.permute.xlu1 %1928 }
0x1f49   :  { %v1934_v42 = vmul.f32 %v1929_v37, %v1898_v12 }
0x1f4b   :  { %1938 = vrot.lane.b32.xlu1 %v1934_v42, %s3840_s24  ;;  %v1521_v42 = vmul.f32 %v4370_v57, %v4157_v55 }
0x1f4e   :  { %v1931_v14 = vpop.permute.xlu0 %1930 }
0x1f4f   :  { %v1935_v38 = vmul.f32 %v1931_v14, %v1899_v20  ;;  %v1537_v14 = vadd.f32 %v1521_v42, %v4376_v62 }
0x1f51   :  { %1940 = vrot.lane.b32.xlu0 %v1935_v38, %s3840_s24 }
0x1fbd   :  { %v1939_v33 = vpop.permute.xlu1 %1938 }
0x1fbe   :  { %3294 = vmatmul.mubr.msk.f32.vlgmr.msra.gmra.mrb[24].mxu0 %vm182_vm0, %v1939_v33 }
0x1fbf   :  { %2015 = vmatprep.mubr.f32.mxu0 %v3837_v3  ;;  %3542 = vmatpush1.bf16.msra.mxu0 %v4304_v21 }
0x1fc0   :  { %3544 = vmatprep.subr.bf16.mxu0 %v4326_v40 }
0x1fc3   :  { %v1941_v36 = vpop.permute.xlu0 %1940  ;;  %3546 = vmatpush1.bf16.msra.mxu0 %v4335_v43 }
0x1fc4   :  { %3295 = vmatmul.mubr.msk.f32.gmra.mrb[26].mxu0 %vm182_vm0, %v1941_v36  ;;  %3556 = vmatprep.subr.bf16.mxu0 %v4293_v17 }
0x1fc5   :  { %2272 = vmatprep.mubr.f32.mxu0 %v3837_v3 }
0x2091   :  { %v2012_v39 = vpop.f32.mrb[24].mxu0 }
0x2092   :  { %v2021_v9 = vadd.f32 %v2012_v39, %v1535_v44  ;;  %v2014_v45 = vpop.f32.mrb[25].mxu0  ;;  %v1536_v39 = vadd.f32 %v1520_v41, %v4380_v1 }
0x2094   :  { %3755 = vtanh.f32 %v2021_v9  ;;  %v2023_v54 = vmul.f32 0.5, %v2021_v9 }
0x2097   :  { %v2017_v48 = vpop.f32.mrb[26].mxu0 }
0x2098   :  { %v2018_v50 = vpop.f32.mrb[27].mxu0 }
0x2099   :  { %v2022_v51 = vadd.f32 %v2018_v50, %v1538_v49 }
0x209b   :  { %3757 = vtanh.f32 %v2022_v51  ;;  %v2024_v56 = vmul.f32 0.5, %v2022_v51 }
0x209c   :  { %3759 = vtanh.f32 %v2023_v54 }
0x209d   :  { %3761 = vtanh.f32 %v2024_v56 }
0x209e   :  { %v3756_v17 = vpop.eup %3755 }
0x209f   :  { %2037 = vrot.lane.b32.xlu1 %v3756_v17, %s3839_s0 }
0x20a5   :  { %v3758_v53 = vpop.eup %3757 }
0x20a6   :  { %2039 = vrot.lane.b32.xlu0 %v3758_v53, %s3839_s0  ;;  %v3760_v58 = vpop.eup %3759 }
0x20a7   :  { %v2027_v60 = vmul.f32 0.5, %v3760_v58  ;;  %v3762_v63 = vpop.eup %3761 }
0x20a8   :  { %v2028_v7 = vmul.f32 0.5, %v3762_v63 }
0x20a9   :  { %v2029_v0 = vadd.f32 0.5, %v2027_v60 }
0x20aa   :  { %v2030_v11 = vadd.f32 0.5, %v2028_v7 }
0x20ab   :  { %v2033_v15 = vmul.f32 %v2029_v0, %v1922_v28 }
0x20ac   :  { %v2034_v25 = vmul.f32 %v2030_v11, %v1923_v30 }
0x2111   :  { %v2038_v2 = vpop.permute.xlu1 %2037 }
0x2112   :  { %v2043_v4 = vmul.f32 %v2038_v2, %v2029_v0 }
0x2114   :  { %2047 = vrot.lane.b32.xlu1 %v2043_v4, %s3840_s24 }
0x2118   :  { %v2040_v12 = vpop.permute.xlu0 %2039 }
0x2119   :  { %v2044_v13 = vmul.f32 %v2040_v12, %v2030_v11 }
0x211b   :  { %2049 = vrot.lane.b32.xlu0 %v2044_v13, %s3840_s24 }
0x2186   :  { %v2048_v16 = vpop.permute.xlu1 %2047 }
0x2187   :  { %v2053_v20 = vadd.f32 %v2048_v16, %v2033_v15 }
0x2189   :  { %3763 = vtanh.f32 %v2053_v20 }
0x218d   :  { %v2050_v19 = vpop.permute.xlu0 %2049 }
0x218e   :  { %v2054_v24 = vadd.f32 %v2050_v19, %v2034_v25 }
0x2190   :  { %3765 = vtanh.f32 %v2054_v24 }
0x2193   :  { %v3764_v26 = vpop.eup %3763 }
0x2194   :  { %2059 = vrot.lane.b32.xlu1 %v3764_v26, %s3839_s0 }
0x219a   :  { %v3766_v31 = vpop.eup %3765 }
0x219b   :  { %2061 = vrot.lane.b32.xlu0 %v3766_v31, %s3839_s0  ;;  %v1523_v31 = vmul.f32 %v4370_v57, %v4116_v61 }
0x2206   :  { %v2060_v29 = vpop.permute.xlu1 %2059 }
0x2207   :  { %v2065_v32 = vmul.f32 %v2060_v29, %v2029_v0  ;;  %v1539_v29 = vadd.f32 %v1523_v31, %v4376_v62 }
0x2209   :  { %2069 = vrot.lane.b32.xlu1 %v2065_v32, %s3840_s24 }
0x220d   :  { %v2062_v35 = vpop.permute.xlu0 %2061 }
0x220e   :  { %v2066_v37 = vmul.f32 %v2062_v35, %v2030_v11 }
0x2210   :  { %2071 = vrot.lane.b32.xlu0 %v2066_v37, %s3840_s24 }
0x227b   :  { %v2070_v28 = vpop.permute.xlu1 %2069 }
0x227c   :  { %3296 = vmatmul.mubr.msk.f32.vlgmr.msra.gmra.mrb[26].mxu1 %vm182_vm0, %v2070_v28 }
0x227d   :  { %2146 = vmatprep.mubr.f32.mxu1 %v3837_v3  ;;  %3550 = vmatpush1.bf16.msra.mxu1 %v4304_v21 }
0x227e   :  { %3552 = vmatprep.subr.bf16.mxu1 %v4326_v40 }
0x2281   :  { %3554 = vmatpush1.bf16.msra.mxu1 %v4335_v43 }
0x2282   :  { %v2072_v30 = vpop.permute.xlu0 %2071  ;;  %3563 = vmatprep.subr.bf16.mxu1 %v3841_v10 }
0x2283   :  { %3297 = vmatmul.mubr.msk.f32.gmra.mrb[28].mxu1 %vm182_vm0, %v2072_v30 }
0x2284   :  { %2403 = vmatprep.mubr.f32.mxu1 %v3837_v3 }
0x234f   :  { %v2143_v38 = vpop.f32.mrb[26].mxu1 }
0x2350   :  { %v2152_v33 = vadd.f32 %v2143_v38, %v1537_v14  ;;  %v2145_v36 = vpop.f32.mrb[27].mxu1 }
0x2352   :  { %3767 = vtanh.f32 %v2152_v33  ;;  %v2154_v55 = vmul.f32 0.5, %v2152_v33 }
0x2356   :  { %v2148_v44 = vpop.f32.mrb[28].mxu1 }
0x2357   :  { %v2149_v9 = vpop.f32.mrb[29].mxu1 }
0x2358   :  { %v2153_v45 = vadd.f32 %v2149_v9, %v1536_v39 }
0x235a   :  { %3769 = vtanh.f32 %v2153_v45  ;;  %v2155_v49 = vmul.f32 0.5, %v2153_v45 }
0x235b   :  { %3771 = vtanh.f32 %v2154_v55 }
0x235c   :  { %v3768_v46 = vpop.eup %3767  ;;  %3773 = vtanh.f32 %v2155_v49 }
0x235d   :  { %2168 = vrot.lane.b32.xlu1 %v3768_v46, %s3839_s0 }
0x2364   :  { %v3770_v48 = vpop.eup %3769 }
0x2365   :  { %2170 = vrot.lane.b32.xlu0 %v3770_v48, %s3839_s0  ;;  %v3772_v50 = vpop.eup %3771 }
0x2366   :  { %v2158_v51 = vmul.f32 0.5, %v3772_v50  ;;  %v3774_v52 = vpop.eup %3773 }
0x2367   :  { %v2159_v56 = vmul.f32 0.5, %v3774_v52 }
0x2368   :  { %v2160_v17 = vadd.f32 0.5, %v2158_v51 }
0x2369   :  { %v2161_v58 = vadd.f32 0.5, %v2159_v56 }
0x236a   :  { %v2164_v0 = vmul.f32 %v2160_v17, %v2053_v20 }
0x236b   :  { %v2165_v7 = vmul.f32 %v2161_v58, %v2054_v24 }
0x23cf   :  { %v2169_v53 = vpop.permute.xlu1 %2168 }
0x23d0   :  { %v2174_v54 = vmul.f32 %v2169_v53, %v2160_v17 }
0x23d2   :  { %2178 = vrot.lane.b32.xlu1 %v2174_v54, %s3840_s24 }
0x23d7   :  { %v2171_v60 = vpop.permute.xlu0 %2170 }
0x23d8   :  { %v2175_v63 = vmul.f32 %v2171_v60, %v2161_v58 }
0x23da   :  { %2180 = vrot.lane.b32.xlu0 %v2175_v63, %s3840_s24 }
0x2444   :  { %v2179_v2 = vpop.permute.xlu1 %2178 }
0x2445   :  { %v2184_v4 = vadd.f32 %v2179_v2, %v2164_v0 }
0x2447   :  { %3775 = vtanh.f32 %v2184_v4 }
0x244c   :  { %v2181_v11 = vpop.permute.xlu0 %2180 }
0x244d   :  { %v2185_v12 = vadd.f32 %v2181_v11, %v2165_v7 }
0x244f   :  { %3777 = vtanh.f32 %v2185_v12 }
0x2451   :  { %v3776_v13 = vpop.eup %3775 }
0x2452   :  { %2190 = vrot.lane.b32.xlu1 %v3776_v13, %s3839_s0 }
0x2459   :  { %v3778_v15 = vpop.eup %3777 }
0x245a   :  { %2192 = vrot.lane.b32.xlu0 %v3778_v15, %s3839_s0  ;;  %v1516_v15 = vmul.f32 %v4374_v5, %v4072_v6 }
0x24c4   :  { %v2191_v16 = vpop.permute.xlu1 %2190 }
0x24c5   :  { %v2196_v25 = vmul.f32 %v2191_v16, %v2160_v17 }
0x24c7   :  { %2200 = vrot.lane.b32.xlu1 %v2196_v25, %s3840_s24  ;;  %v1532_v25 = vadd.f32 %v1516_v15, %v4380_v1 }
0x24cc   :  { %v2193_v19 = vpop.permute.xlu0 %2192 }
0x24cd   :  { %v2197_v26 = vmul.f32 %v2193_v19, %v2161_v58 }
0x24cf   :  { %2202 = vrot.lane.b32.xlu0 %v2197_v26, %s3840_s24 }
0x2539   :  { %v2201_v20 = vpop.permute.xlu1 %2200 }
0x253a   :  { %3298 = vmatmul.mubr.msk.f32.vlgmr.msra.gmra.mrb[28].mxu0 %vm182_vm0, %v2201_v20 }
0x253b   :  { %2277 = vmatprep.mubr.f32.mxu0 %v3837_v3  ;;  %3558 = vmatpush1.bf16.msra.mxu0 %v4304_v21  ;;  %v1518_v21 = vmul.f32 %v4374_v5, %v4112_v59 }
0x253c   :  { %3560 = vmatprep.subr.bf16.mxu0 %v4326_v40 }
0x253f   :  { %3562 = vmatpush1.bf16.msra.mxu0 %v4335_v43  ;;  %v1534_v43 = vadd.f32 %v1518_v21, %v4380_v1 }
0x2541   :  { %v2203_v24 = vpop.permute.xlu0 %2202 }
0x2542   :  { %3299 = vmatmul.mubr.msk.f32.gmra.mrb[30].mxu0 %vm182_vm0, %v2203_v24 }
0x2543   :  { %2534 = vmatprep.mubr.f32.mxu0 %v3837_v3 }
0x260d   :  { %v2274_v32 = vpop.f32.mrb[28].mxu0 }
0x260e   :  { %v2283_v35 = vadd.f32 %v2274_v32, %v1539_v29  ;;  %v2276_v37 = vpop.f32.mrb[29].mxu0 }
0x2610   :  { %3779 = vtanh.f32 %v2283_v35  ;;  %v2285_v61 = vmul.f32 0.5, %v2283_v35 }
0x2615   :  { %v2279_v40 = vpop.f32.mrb[30].mxu0 }
0x2616   :  { %v2280_v28 = vpop.f32.mrb[31].mxu0 }
0x2617   :  { %v2284_v30 = vadd.f32 %v2280_v28, %v1534_v43 }
0x2619   :  { %3781 = vtanh.f32 %v2284_v30  ;;  %v2286_v38 = vmul.f32 0.5, %v2284_v30 }
0x261a   :  { %v3780_v42 = vpop.eup %3779  ;;  %3783 = vtanh.f32 %v2285_v61 }
0x261b   :  { %2299 = vrot.lane.b32.xlu1 %v3780_v42, %s3839_s0  ;;  %3785 = vtanh.f32 %v2286_v38 }
0x2623   :  { %v3782_v14 = vpop.eup %3781 }
0x2624   :  { %2301 = vrot.lane.b32.xlu0 %v3782_v14, %s3839_s0  ;;  %v3784_v33 = vpop.eup %3783 }
0x2625   :  { %v2289_v36 = vmul.f32 0.5, %v3784_v33  ;;  %v3786_v44 = vpop.eup %3785 }
0x2626   :  { %v2290_v9 = vmul.f32 0.5, %v3786_v44 }
0x2627   :  { %v2291_v41 = vadd.f32 0.5, %v2289_v36 }
0x2628   :  { %v2292_v45 = vadd.f32 0.5, %v2290_v9 }
0x2629   :  { %v2295_v55 = vmul.f32 %v2291_v41, %v2184_v4  ;;  %v1525_v4 = vmul.f32 %v4370_v57, %v4076_v8 }
0x262a   :  { %v2296_v51 = vmul.f32 %v2292_v45, %v2185_v12 }
0x262b   :  { %v1541_v7 = vadd.f32 %v1525_v4, %v4376_v62 }
0x268d   :  { %v2300_v59 = vpop.permute.xlu1 %2299 }
0x268e   :  { %v2305_v39 = vmul.f32 %v2300_v59, %v2291_v41 }
0x2690   :  { %2309 = vrot.lane.b32.xlu1 %v2305_v39, %s3840_s24 }
0x2696   :  { %v2302_v46 = vpop.permute.xlu0 %2301 }
0x2697   :  { %v2306_v48 = vmul.f32 %v2302_v46, %v2292_v45 }
0x2699   :  { %2311 = vrot.lane.b32.xlu0 %v2306_v48, %s3840_s24 }
0x2702   :  { %v2310_v49 = vpop.permute.xlu1 %2309 }
0x2703   :  { %v2315_v50 = vadd.f32 %v2310_v49, %v2295_v55  ;;  %v1527_v55 = vmul.f32 %v4370_v57, %v4035_v27 }
0x2705   :  { %3787 = vtanh.f32 %v2315_v50  ;;  %v1543_v49 = vadd.f32 %v1527_v55, %v4376_v62 }
0x270b   :  { %v2312_v17 = vpop.permute.xlu0 %2311 }
0x270c   :  { %v2316_v52 = vadd.f32 %v2312_v17, %v2296_v51 }
0x270e   :  { %3789 = vtanh.f32 %v2316_v52 }
0x270f   :  { %v3788_v53 = vpop.eup %3787 }
0x2710   :  { %2321 = vrot.lane.b32.xlu1 %v3788_v53, %s3839_s0 }
0x2718   :  { %v3790_v54 = vpop.eup %3789 }
0x2719   :  { %2323 = vrot.lane.b32.xlu0 %v3790_v54, %s3839_s0 }
0x2782   :  { %v2322_v56 = vpop.permute.xlu1 %2321 }
0x2783   :  { %v2327_v58 = vmul.f32 %v2322_v56, %v2291_v41 }
0x2785   :  { %2331 = vrot.lane.b32.xlu1 %v2327_v58, %s3840_s24 }
0x278b   :  { %v2324_v60 = vpop.permute.xlu0 %2323 }
0x278c   :  { %v2328_v63 = vmul.f32 %v2324_v60, %v2292_v45 }
0x278e   :  { %2333 = vrot.lane.b32.xlu0 %v2328_v63, %s3840_s24 }
0x27f7   :  { %v2332_v0 = vpop.permute.xlu1 %2331 }
0x27f8   :  { %3300 = vmatmul.mubr.msk.f32.vlgmr.msra.gmra.mrb[30].mxu1 %vm182_vm0, %v2332_v0 }
0x27f9   :  { %2408 = vmatprep.mubr.f32.mxu1 %v3837_v3 }
0x2800   :  { %v2334_v2 = vpop.permute.xlu0 %2333 }
0x2801   :  { %3301 = vmatmul.mubr.msk.f32.gmra.mrb[32].mxu1 %vm182_vm0, %v2334_v2 }
0x2802   :  { %3376 = vmatprep.mubr.msk.f32.mxu1 %vm3842_vm1, %v3837_v3 }
0x28cb   :  { %v2405_v11 = vpop.f32.mrb[30].mxu1 }
0x28cc   :  { %v2414_v12 = vadd.f32 %v2405_v11, %v1541_v7  ;;  %v2407_v13 = vpop.f32.mrb[31].mxu1 }
0x28ce   :  { %3791 = vtanh.f32 %v2414_v12  ;;  %v2416_v8 = vmul.f32 0.5, %v2414_v12 }
0x28d4   :  { %v2410_v16 = vpop.f32.mrb[32].mxu1 }
0x28d5   :  { %v2411_v19 = vpop.f32.mrb[33].mxu1 }
0x28d6   :  { %v2415_v26 = vadd.f32 %v2411_v19, %v1532_v25 }
0x28d8   :  { %v3792_v20 = vpop.eup %3791  ;;  %3793 = vtanh.f32 %v2415_v26  ;;  %v2417_v31 = vmul.f32 0.5, %v2415_v26 }
0x28d9   :  { %2430 = vrot.lane.b32.xlu1 %v3792_v20, %s3839_s0  ;;  %3795 = vtanh.f32 %v2416_v8 }
0x28da   :  { %3797 = vtanh.f32 %v2417_v31 }
0x28e2   :  { %v3794_v24 = vpop.eup %3793 }
0x28e3   :  { %2432 = vrot.lane.b32.xlu0 %v3794_v24, %s3839_s0  ;;  %v3796_v29 = vpop.eup %3795 }
0x28e4   :  { %v2420_v32 = vmul.f32 0.5, %v3796_v29  ;;  %v3798_v21 = vpop.eup %3797 }
0x28e5   :  { %v2421_v40 = vmul.f32 0.5, %v3798_v21  ;;  %v2598_v21 = vld [vmem:[%s4706_s12 + $0x38] sm:$0xff] }
0x28e6   :  { %v2422_v35 = vadd.f32 0.5, %v2420_v32  ;;  %v2595_v32 = vld [vmem:[%s4706_s12 + $0x20] sm:$0xff] }
0x28e7   :  { %v2423_v43 = vadd.f32 0.5, %v2421_v40 }
0x28e8   :  { %v2426_v42 = vmul.f32 %v2422_v35, %v2315_v50 }
0x28e9   :  { %v2427_v38 = vmul.f32 %v2423_v43, %v2316_v52  ;;  %v1514_v52 = vmul.f32 %v4374_v5, %v4023_v22 }
0x28eb   :  { %v1530_v54 = vadd.f32 %v1514_v52, %v4380_v1  ;;  %v2858_v52 = vld [vmem:[%s4708_s16 + $0x8] sm:$0xff] }
0x294b   :  { %v2431_v6 = vpop.permute.xlu1 %2430 }
0x294c   :  { %v2436_v37 = vmul.f32 %v2431_v6, %v2422_v35  ;;  %v2597_v6 = vld [vmem:[%s4706_s12 + $0x30] sm:$0xff] }
0x294e   :  { %2440 = vrot.lane.b32.xlu1 %v2436_v37, %s3840_s24 }
0x2955   :  { %v2433_v28 = vpop.permute.xlu0 %2432 }
0x2956   :  { %v2437_v30 = vmul.f32 %v2433_v28, %v2423_v43  ;;  %v3567_v28 = vpack.c.bf16 %v2598_v21, %v2597_v6 }
0x2958   :  { %2442 = vrot.lane.b32.xlu0 %v2437_v30, %s3840_s24 }
0x29c0   :  { %v2441_v14 = vpop.permute.xlu1 %2440 }
0x29c1   :  { %v2446_v61 = vadd.f32 %v2441_v14, %v2426_v42 }
0x29c3   :  { %3799 = vtanh.f32 %v2446_v61 }
0x29ca   :  { %v2443_v33 = vpop.permute.xlu0 %2442 }
0x29cb   :  { %v2447_v36 = vadd.f32 %v2443_v33, %v2427_v38 }
0x29cd   :  { %v3800_v41 = vpop.eup %3799  ;;  %3801 = vtanh.f32 %v2447_v36 }
0x29ce   :  { %2452 = vrot.lane.b32.xlu1 %v3800_v41, %s3839_s0 }
0x29d7   :  { %v3802_v59 = vpop.eup %3801 }
0x29d8   :  { %2454 = vrot.lane.b32.xlu0 %v3802_v59, %s3839_s0 }
0x2a40   :  { %v2453_v44 = vpop.permute.xlu1 %2452 }
0x2a41   :  { %v2458_v39 = vmul.f32 %v2453_v44, %v2422_v35  ;;  %v2596_v35 = vld [vmem:[%s4706_s12 + $0x28] sm:$0xff]  ;;  %v2591_v44 = vld [vmem:[%s4706_s12] sm:$0xff] }
0x2a42   :  { %v3564_v37 = vpack.c.bf16 %v2596_v35, %v2595_v32  ;;  %v2861_v32 = vld [vmem:[%s4713_s18] sm:$0x3] }
0x2a43   :  { %2462 = vrot.lane.b32.xlu1 %v2458_v39, %s3840_s24  ;;  %v2592_v39 = vld [vmem:[%s4706_s12 + $0x8] sm:$0xff] }
0x2a44   :  { %3565 = vmatpush3.bf16.msra.mxu1 %v3564_v37  ;;  %v2866_v37 = vrot.slane %v2861_v32, %v4012_v18 }
0x2a45   :  { %3566 = vmatprep.subr.bf16.mxu1 %v3841_v10 }
0x2a48   :  { %3568 = vmatpush3.bf16.msra.mxu1 %v3567_v28 }
0x2a49   :  { %3569 = vmatprep.subr.bf16.mxu1 %v3841_v10 }
0x2a4a   :  { %v2455_v9 = vpop.permute.xlu0 %2454 }
0x2a4b   :  { %v2459_v45 = vmul.f32 %v2455_v9, %v2423_v43  ;;  %v3570_v9 = vpack.c.bf16 %v2592_v39, %v2591_v44 }
0x2a4d   :  { %2464 = vrot.lane.b32.xlu0 %v2459_v45, %s3840_s24  ;;  %v2593_v45 = vld [vmem:[%s4706_s12 + $0x10] sm:$0xff] }
0x2ab5   :  { %v2463_v46 = vpop.permute.xlu1 %2462 }
0x2ab6   :  { %3302 = vmatmul.mubr.msk.f32.vlgmr.msra.gmra.mrb[32].mxu0 %vm182_vm0, %v2463_v46  ;;  %v2594_v46 = vld [vmem:[%s4706_s12 + $0x18] sm:$0xff] }
0x2ab7   :  { %2539 = vmatprep.mubr.f32.mxu0 %v3837_v3  ;;  %v3573_v55 = vpack.c.bf16 %v2594_v46, %v2593_v45 }
0x2abf   :  { %v2465_v48 = vpop.permute.xlu0 %2464 }
0x2ac0   :  { %3303 = vmatmul.mubr.msk.f32.gmra.mrb[34].mxu0 %vm182_vm0, %v2465_v48 }
0x2ac1   :  { %2940 = vmatprep.mubr.f32.mxu0 %v3837_v3 }
0x2b89   :  { %v2536_v50 = vpop.f32.mrb[32].mxu0 }
0x2b8a   :  { %v2545_v51 = vadd.f32 %v2536_v50, %v1543_v49  ;;  %v2538_v17 = vpop.f32.mrb[33].mxu0  ;;  %v2767_v49 = vld [vmem:[%s4707_s14] sm:$0xff]  ;;  %v2768_v50 = vld [vmem:[%s4707_s14 + $0x8] sm:$0xff] }
0x2b8c   :  { %3803 = vtanh.f32 %v2545_v51  ;;  %v2547_v27 = vmul.f32 0.5, %v2545_v51  ;;  %v3576_v51 = vpack.c.bf16 %v2768_v50, %v2767_v49 }
0x2b93   :  { %v2541_v53 = vpop.f32.mrb[34].mxu0 }
0x2b94   :  { %v2542_v56 = vpop.f32.mrb[35].mxu0  ;;  %v2860_v53 = vld [vmem:[%s4708_s16 + $0x18] sm:$0xff] }
0x2b95   :  { %v2546_v58 = vadd.f32 %v2542_v56, %v1530_v54  ;;  %v2857_v54 = vld [vmem:[%s4708_s16] sm:$0xff]  ;;  %v3578_v56 = vpack.c.bf16 %v2860_v53, %v2858_v52 }
0x2b96   :  { %v3804_v60 = vpop.eup %3803 }
0x2b97   :  { %3805 = vtanh.f32 %v2546_v58  ;;  %2561 = vrot.lane.b32.xlu0 %v3804_v60, %s3839_s0  ;;  %v2548_v57 = vmul.f32 0.5, %v2546_v58  ;;  %3579 = vmatprep.subr.bf16.mxu0 %v3578_v56  ;;  %v3306_v60 = vld [vmem:[%s4709_s13] ss:$0 sm:$0xff] }
0x2b98   :  { %3807 = vtanh.f32 %v2547_v27 }
0x2b99   :  { %3809 = vtanh.f32 %v2548_v57 }
0x2ba1   :  { %v3806_v63 = vpop.eup %3805 }
0x2ba2   :  { %2563 = vrot.lane.b32.xlu1 %v3806_v63, %s3839_s0  ;;  %v3808_v62 = vpop.eup %3807  ;;  %v3307_v63 = vld [vmem:[%s4710_s15] ss:$0 sm:$0xff] }
0x2ba3   :  { %v2551_v0 = vmul.f32 0.5, %v3808_v62  ;;  %v3810_v4 = vpop.eup %3809  ;;  %v3602_v27 = vadd.f32 %v3307_v63, %v3306_v60  ;;  %v3080_v60 = vld [vmem:[%s4714_s19 + $0x20] sm:$0xff] }
0x2ba4   :  { %v2552_v1 = vmul.f32 0.5, %v3810_v4  ;;  %v2950_v4 = vld [vmem:[%s4711_s17 + $0x18] sm:$0xff] }
0x2ba5   :  { %v2553_v2 = vadd.f32 0.5, %v2551_v0 }
0x2ba6   :  { %v2554_v7 = vadd.f32 0.5, %v2552_v1 }
0x2ba7   :  { %v2557_v13 = vmul.f32 %v2553_v2, %v2446_v61 }
0x2ba8   :  { %v2558_v25 = vmul.f32 %v2554_v7, %v2447_v36 }
0x2c09   :  { %v2562_v22 = vpop.permute.xlu0 %2561 }
0x2c0a   :  { %v2567_v5 = vmul.f32 %v2562_v22, %v2553_v2 }
0x2c0c   :  { %2571 = vrot.lane.b32.xlu0 %v2567_v5, %s3840_s24  ;;  %v2948_v5 = vld [vmem:[%s4711_s17 + $0x8] sm:$0xff] }
0x2c0d   :  { %v3582_v1 = vpack.c.bf16 %v2950_v4, %v2948_v5 }
0x2c14   :  { %v2564_v11 = vpop.permute.xlu1 %2563 }
0x2c15   :  { %v2568_v12 = vmul.f32 %v2564_v11, %v2554_v7  ;;  %v2847_v11 = vld [vmem:[%s4712_s2] sm:$0xff] }
0x2c17   :  { %2573 = vrot.lane.b32.xlu1 %v2568_v12, %s3840_s24  ;;  %v2947_v12 = vld [vmem:[%s4711_s17] sm:$0xff] }
0x2c7e   :  { %v2572_v15 = vpop.permute.xlu0 %2571 }
0x2c7f   :  { %v2577_v16 = vadd.f32 %v2572_v15, %v2557_v13  ;;  %v2949_v13 = vld [vmem:[%s4711_s17 + $0x10] sm:$0xff] }
0x2c81   :  { %3811 = vtanh.f32 %v2577_v16  ;;  %v2952_v16 = vld [vmem:[%s4711_s17 + $0x28] sm:$0xff] }
0x2c89   :  { %v2574_v19 = vpop.permute.xlu1 %2573 }
0x2c8a   :  { %v2578_v26 = vadd.f32 %v2574_v19, %v2558_v25  ;;  %v2954_v25 = vld [vmem:[%s4711_s17 + $0x38] sm:$0xff] }
0x2c8b   :  { %v3812_v20 = vpop.eup %3811 }
0x2c8c   :  { %3813 = vtanh.f32 %v2578_v26  ;;  %2583 = vrot.lane.b32.xlu0 %v3812_v20, %s3839_s0  ;;  %v3584_v26 = vpack.c.bf16 %v2949_v13, %v2947_v12  ;;  %v3082_v13 = vld [vmem:[%s4714_s19 + $0x30] sm:$0xff] }
0x2c96   :  { %v3814_v24 = vpop.eup %3813 }
0x2c97   :  { %2585 = vrot.lane.b32.xlu1 %v3814_v24, %s3839_s0  ;;  %v3586_v24 = vpack.c.bf16 %v2954_v25, %v2952_v16 }
0x2cfe   :  { %v2584_v8 = vpop.permute.xlu0 %2583 }
0x2cff   :  { %v2589_v31 = vmul.f32 %v2584_v8, %v2553_v2  ;;  %v2951_v8 = vld [vmem:[%s4711_s17 + $0x20] sm:$0xff] }
0x2d01   :  { %v2599_v29 = vmul.f32 0.5, %v2589_v31 }
0x2d03   :  { %3815 = vtanh.f32 %v2599_v29 }
0x2d09   :  { %v2586_v40 = vpop.permute.xlu1 %2585 }
0x2d0a   :  { %v2590_v43 = vmul.f32 %v2586_v40, %v2554_v7  ;;  %v2870_v40 = vrot.slane %v2861_v32, %v4025_v23 }
0x2d0c   :  { %v2604_v30 = vmul.f32 0.5, %v2590_v43 }
0x2d0d   :  { %v3816_v42 = vpop.eup %3815 }
0x2d0e   :  { %v2601_v14 = vmul.f32 0.5, %v3816_v42  ;;  %3817 = vtanh.f32 %v2604_v30 }
0x2d10   :  { %v2602_v61 = vadd.f32 0.5, %v2601_v14 }
0x2d12   :  { %v2603_v38 = vmul.f32 %v2602_v61, %v2589_v31  ;;  %v2953_v31 = vld [vmem:[%s4711_s17 + $0x30] sm:$0xff] }
0x2d13   :  { %v3588_v29 = vpack.c.bf16 %v2953_v31, %v2951_v8 }
0x2d14   :  { %2685 = vrot.lane.b32.xlu0 %v2603_v38, %s3840_s24 }
0x2d18   :  { %v3818_v33 = vpop.eup %3817 }
0x2d19   :  { %v2606_v36 = vmul.f32 0.5, %v3818_v33 }
0x2d1b   :  { %v2607_v41 = vadd.f32 0.5, %v2606_v36 }
0x2d1d   :  { %v2608_v59 = vmul.f32 %v2607_v41, %v2590_v43 }
0x2d1f   :  { %2610 = vrot.lane.b32.xlu1 %v2608_v59, %s3840_s24 }
0x2d86   :  { %v2686_v17 = vpop.permute.xlu0 %2685 }
0x2d91   :  { %v2611_v48 = vpop.permute.xlu1 %2610 }
0x2d92   :  { %3377 = vmatmul.mubr.msk.f32.vlgmr.msra.gmra.mrb[34].mxu1 %vm182_vm0, %v2611_v48 }
0x2d93   :  { %3571 = vmatpush3.bf16.msra.mxu1 %v3570_v9  ;;  %3387 = vmatprep.mubr.msk.f32.mxu1 %vm3842_vm1, %v3837_v3 }
0x2d94   :  { %3572 = vmatprep.subr.bf16.mxu1 %v3841_v10 }
0x2d97   :  { %3574 = vmatpush3.bf16.msra.mxu1 %v3573_v55 }
0x2d98   :  { %3575 = vmatprep.subr.bf16.mxu1 %v3841_v10 }
0x2d9a   :  { %3388 = vmatmul.mubr.msk.f32.vlgmr.msra.gmra.mrb[34].mxu1 %vm182_vm0, %v2686_v17 }
0x2d9b   :  { %3577 = vmatpush3.bf16.msra.mxu1 %v3576_v51  ;;  %3394 = vmatprep.mubr.msk.f32.mxu1 %vm3842_vm1, %v3837_v3 }
0x2d9c   :  { %3596 = vmatprep.subr.bf16.mxu1 %v3841_v10 }
0x2da2   :  { %3395 = vmatmul.mubr.msk.f32.vlgmr.msra.gmra.mrb[34].mxu1 %vm1426_vm2, %v4353_v47  ;;  %v2859_v47 = vld [vmem:[%s4708_s16 + $0x10] sm:$0xff] }
0x2da3   :  { %3416 = vmatprep.mubr.msk.f32.mxu1 %vm3842_vm1, %v3837_v3  ;;  %v3580_v58 = vpack.c.bf16 %v2859_v47, %v2857_v54  ;;  %v3076_v47 = vld [vmem:[%s4714_s19] sm:$0xff] }
0x2da5   :  { %3581 = vmatpush1.bf16.msra.mxu0 %v3580_v58  ;;  %v3077_v58 = vld [vmem:[%s4714_s19 + $0x8] sm:$0xff] }
0x2da6   :  { %3583 = vmatprep.subr.bf16.mxu0 %v3582_v1  ;;  %v3597_v63 = vpack.c.bf16 %v3077_v58, %v3076_v47 }
0x2da8   :  { %3598 = vmatpush3.bf16.msra.mxu1 %v3597_v63 }
0x2da9   :  { %3599 = vmatprep.subr.bf16.mxu1 %v3841_v10 }
0x2e75   :  { %v2842_v57 = vpop.f32.mrb[34].mxu1 }
0x2e76   :  { %v4603_v62 = vadd.f32 %v3602_v27, %v2842_v57  ;;  %v3396_v0 = vpop.f32.mrb[35].mxu1  ;;  %v3081_v27 = vld [vmem:[%s4714_s19 + $0x28] sm:$0xff]  ;;  %v3078_v57 = vld [vmem:[%s4714_s19 + $0x10] sm:$0xff] }
0x2e77   :  { %v3079_v0 = vld [vmem:[%s4714_s19 + $0x18] sm:$0xff] }
0x2e78   :  { %v2848_v2 = vmul.f32 0.5, %v4603_v62 }
0x2e7a   :  { %v2849_v22 = vmul.f32 1.442695, %v2848_v2  ;;  %v3591_v2 = vpack.c.bf16 %v3081_v27, %v3080_v60 }
0x2e7c   :  { %3819 = vpow2.f32 %v2849_v22  ;;  %v3600_v22 = vpack.c.bf16 %v3079_v0, %v3078_v57 }
0x2e7e   :  { %3601 = vmatpush3.bf16.msra.mxu1 %v3600_v22 }
0x2e86   :  { %v3820_v7 = vpop.eup %3819 }
0x2e87   :  { %2852 = vrot.lane.b32.xlu1 %v3820_v7, %s3843_s9 }
0x2ef9   :  { %v2853_v15 = vpop.permute.xlu1 %2852 }
0x2efa   :  { %v2855_v19 = vmul.f32 %v2853_v15, %v2847_v11  ;;  %v3083_v15 = vld [vmem:[%s4714_s19 + $0x38] sm:$0xff] }
0x2efb   :  { %v3594_v16 = vpack.c.bf16 %v3083_v15, %v3082_v13 }
0x2efc   :  { %v2856_v20 = vadd.f32 %v4603_v62, %v2855_v19 }
0x2efe   :  { %3309 = vmatmul.mubr.msk.f32.vlgmr.msra.gmra.mrb[36].mxu0 %vm1426_vm2, %v2856_v20 }
0x2eff   :  { %3585 = vmatpush1.bf16.msra.mxu0 %v3584_v26  ;;  %3019 = vmatprep.mubr.f32.mxu0 %v3837_v3 }
0x2f00   :  { %3587 = vmatprep.subr.bf16.mxu0 %v3586_v24 }
0x2f03   :  { %3589 = vmatpush1.bf16.msra.mxu0 %v3588_v29 }
0x2f04   :  { %3590 = vmatprep.subr.bf16.mxu0 %v3841_v10 }
0x2f06   :  { %3020 = vmatmul.mubr.f32.vlgmr.msra.gmra.mrb[38].mxu0 %v3837_v3 }
0x2f07   :  { %3024 = vmatprep.mubr.f32.mxu0 %v3837_v3  ;;  %3592 = vmatpush3.bf16.msra.mxu0 %v3591_v2 }
0x2f08   :  { %3593 = vmatprep.subr.bf16.mxu0 %v3841_v10 }
0x2f0a   :  { %3025 = vmatmul.mubr.f32.gmra.mrb[40].mxu0 %v3837_v3 }
0x2f0b   :  { %3405 = vmatprep.mubr.msk.f32.mxu0 %vm3842_vm1, %v3837_v3  ;;  %3595 = vmatpush3.bf16.msra.mxu0 %v3594_v16 }
0x2fd1   :  { %v2942_v35 = vpop.f32.mrb[36].mxu0 }
0x2fd2   :  { %v2944_v6 = vpop.f32.mrb[37].mxu0  ;;  %v2943_v21 = vadd.f32 %v2942_v35, %v2866_v37  ;;  %v26_v35 = vstv %s4715_s20 }
0x2fd3   :  { %v2945_v42 = vadd.f32 %v2944_v6, %v2870_v40  ;;  %27 = vst [vmem:[#allocation2] sm:$0x1] %v26_v35 }
0x2fd9   :  { %v3021_v43 = vpop.f32.mrb[38].mxu0 }
0x2fda   :  { %v3030_v28 = vadd.f32 %v3021_v43, %v2943_v21  ;;  %v3023_v30 = vpop.f32.mrb[39].mxu0  ;;  %v3312_v21 = vld [vmem:[#allocation2] ss:$0 sm:$0xff] }
0x2fdc   :  { %3821 = vtanh.f32 %v3030_v28  ;;  %v3032_v36 = vmul.f32 0.5, %v3030_v28 }
0x2fdd   :  { %v3026_v14 = vpop.f32.mrb[40].mxu0 }
0x2fde   :  { %v3027_v61 = vpop.f32.mrb[41].mxu0 }
0x2fdf   :  { %v3031_v38 = vadd.f32 %v3027_v61, %v2945_v42 }
0x2fe1   :  { %3823 = vtanh.f32 %v3031_v38  ;;  %v3033_v18 = vmul.f32 0.5, %v3031_v38 }
0x2fe2   :  { %3825 = vtanh.f32 %v3032_v36 }
0x2fe3   :  { %3827 = vtanh.f32 %v3033_v18 }
0x2fe6   :  { %v3822_v3 = vpop.eup %3821 }
0x2fe7   :  { %3046 = vrot.lane.b32.xlu0 %v3822_v3, %s3839_s0 }
0x2feb   :  { %v3824_v33 = vpop.eup %3823 }
0x2fec   :  { %3048 = vrot.lane.b32.xlu1 %v3824_v33, %s3839_s0  ;;  %v3826_v23 = vpop.eup %3825 }
0x2fed   :  { %v3036_v41 = vmul.f32 0.5, %v3826_v23  ;;  %v3828_v59 = vpop.eup %3827 }
0x2fee   :  { %v3037_v9 = vmul.f32 0.5, %v3828_v59 }
0x2fef   :  { %v3038_v44 = vadd.f32 0.5, %v3036_v41 }
0x2ff0   :  { %v3039_v46 = vadd.f32 0.5, %v3037_v9 }
0x2ff1   :  { %v3042_v49 = vmul.f32 0.0, %v3038_v44 }
0x2ff2   :  { %v3043_v17 = vmul.f32 0.0, %v3039_v46 }
0x3059   :  { %v3047_v39 = vpop.permute.xlu0 %3046 }
0x305a   :  { %v3052_v45 = vmul.f32 %v3047_v39, %v3038_v44 }
0x305c   :  { %3056 = vrot.lane.b32.xlu0 %v3052_v45, %s3840_s24 }
0x305e   :  { %v3049_v48 = vpop.permute.xlu1 %3048 }
0x305f   :  { %v3053_v55 = vmul.f32 %v3049_v48, %v3039_v46 }
0x3061   :  { %3058 = vrot.lane.b32.xlu1 %v3053_v55, %s3840_s24 }
0x30ce   :  { %v3057_v50 = vpop.permute.xlu0 %3056 }
0x30cf   :  { %v3062_v51 = vadd.f32 %v3057_v50, %v3042_v49 }
0x30d1   :  { %3829 = vtanh.f32 %v3062_v51 }
0x30d3   :  { %v3059_v52 = vpop.permute.xlu1 %3058 }
0x30d4   :  { %v3063_v53 = vadd.f32 %v3059_v52, %v3043_v17 }
0x30d6   :  { %3831 = vtanh.f32 %v3063_v53 }
0x30db   :  { %v3830_v54 = vpop.eup %3829 }
0x30dc   :  { %3068 = vrot.lane.b32.xlu0 %v3830_v54, %s3839_s0 }
0x30e0   :  { %v3832_v56 = vpop.eup %3831 }
0x30e1   :  { %3070 = vrot.lane.b32.xlu1 %v3832_v56, %s3839_s0 }
0x314e   :  { %v3069_v5 = vpop.permute.xlu0 %3068 }
0x314f   :  { %v3074_v4 = vmul.f32 %v3069_v5, %v3038_v44 }
0x3151   :  { %v3085_v1 = vmul.f32 0.5, %v3074_v4 }
0x3153   :  { %3833 = vtanh.f32 %v3085_v1  ;;  %v3071_v7 = vpop.permute.xlu1 %3070 }
0x3154   :  { %v3075_v11 = vmul.f32 %v3071_v7, %v3039_v46 }
0x3156   :  { %v3090_v12 = vmul.f32 0.5, %v3075_v11 }
0x3158   :  { %3835 = vtanh.f32 %v3090_v12 }
0x315d   :  { %v3834_v10 = vpop.eup %3833 }
0x315e   :  { %v3087_v25 = vmul.f32 0.5, %v3834_v10 }
0x3160   :  { %v3088_v19 = vadd.f32 0.5, %v3087_v25 }
0x3162   :  { %v3836_v26 = vpop.eup %3835  ;;  %v3089_v20 = vmul.f32 %v3088_v19, %v3074_v4 }
0x3163   :  { %v3092_v24 = vmul.f32 0.5, %v3836_v26 }
0x3164   :  { %3171 = vrot.lane.b32.xlu1 %v3089_v20, %s3840_s24 }
0x3165   :  { %v3093_v8 = vadd.f32 0.5, %v3092_v24 }
0x3167   :  { %v3094_v31 = vmul.f32 %v3093_v8, %v3075_v11 }
0x3169   :  { %3096 = vrot.lane.b32.xlu0 %v3094_v31, %s3840_s24 }
0x316d   :  { %3253 = vrot.lane.b32.xlu0 %v4603_v62, %s3840_s24 }
0x31d6   :  { %v3172_v29 = vpop.permute.xlu1 %3171 }
0x31d7   :  { %3417 = vmatmul.mubr.msk.f32.vlgmr.msra.gmra.mrb[36].mxu1 %vm182_vm0, %v3172_v29 }
0x31db   :  { %v3097_v32 = vpop.permute.xlu0 %3096 }
0x31dc   :  { %3406 = vmatmul.mubr.msk.f32.vlgmr.msra.gmra.mrb[42].mxu0 %vm182_vm0, %v3097_v32 }
0x31df   :  { %v3254_v62 = vpop.permute.xlu0 %3253 }
0x31e0   :  { %v3260_v42 = vsel %vm182_vm0, %v4311_v34, %v3254_v62 }
0x31e1   :  { %v3262_v14 = vsel %vm3261_vm3, %v3260_v42, %v3254_v62 }
0x32aa   :  { %v3241_v6 = vpop.f32.mrb[36].mxu1 }
0x32ab   :  { %v3418_v37 = vpop.f32.mrb[37].mxu1 }
0x32af   :  { %v3166_v40 = vpop.f32.mrb[42].mxu0 }
0x32b0   :  { %v3242_v43 = vadd.f32 %v3241_v6, %v3166_v40  ;;  %v3407_v28 = vpop.f32.mrb[43].mxu0 }
0x32b2   :  { %v3251_v30 = vadd.f32 %v3312_v21, %v3242_v43 }
0x32b4   :  { %3257 = vrot.lane.b32.xlu1 %v3251_v30, %s3839_s0 }
0x3326   :  { %v3258_v61 = vpop.permute.xlu1 %3257 }
0x3327   :  { %v3264_v38 = vsel %vm3263_vm4, %v3262_v14, %v3258_v61 }
0x3328   :  { %v3266_v3 = vsel %vm3265_vm5, %v3264_v38, 0.0 }
0x3329   :  { %3267 = vst [vmem:[%s4716_s21] sm:$0xff] %v3266_v3 }

</bundles_post_ra>
